<compile_context>
chip_gen: v6e
topology: v6e:2x2x1
jax: 0.10.0
libtpu: 0.0.40
codegen_flags: <defaults>
</compile_context>

<pallas_src>
import numpy as np
import jax
import jax.numpy as jnp
from jax.experimental import pallas as pl
from jax.experimental.pallas import tpu as pltpu

KERNEL_W = 3  # Conv2d kernel size [1, 3]
HIGHEST = jax.lax.Precision.HIGHEST


# ----------------------------------------------------------------------------
# Model structure (mirrors RLGCNN.__init__ modlist construction)
# ----------------------------------------------------------------------------
def build_conv_shapes(max_degree, in_channels, feat_channels):
    """List of (c_out, c_in) for the conv stack."""
    shapes = []
    j = int(max_degree)
    in_chans = in_channels
    while j > 2:
        if j - 2 > 2:
            shapes.append((feat_channels, in_chans))
        else:
            shapes.append((in_channels, in_chans))
        in_chans = feat_channels
        j -= 2
    return shapes


# ----------------------------------------------------------------------------
# Host-side operand preparation (tiny, done once)
# ----------------------------------------------------------------------------
def prepare_gather_matrix(gather_idx, gather_mask):
    """G[j, w*N + i] = mask[i, w] * (idx[i, w] == j), so that
    (z @ G)[b, w*N + i] == z[b, idx[i, w]] * mask[i, w]  (the input_preprocessor)."""
    n_nodes, w0 = gather_idx.shape
    g = np.zeros((n_nodes, w0 * n_nodes), dtype=np.float32)
    for i in range(n_nodes):
        for w in range(w0):
            g[int(gather_idx[i, w]), w * n_nodes + i] = float(gather_mask[i, w])
    return jnp.asarray(g)


def prepare_driver_matrix(drivers, n_nodes):
    d = np.zeros((n_nodes, len(drivers)), dtype=np.float32)
    d[np.asarray(drivers), np.arange(len(drivers))] = 1.0
    return jnp.asarray(d)


def prepare_conv_params(weights, biases, batch):
    """Expand conv params for the (c*B, W*N) in-kernel layout.

    weights[l]: (c_out, c_in, 3) -> (c_out*B, 3*c_in*B); column blocks ordered by
    tap k, each block = kron(W[:, :, k], I_B) so the contraction is batch-diagonal.
    biases[l]:  (c_out,)         -> (c_out*B, 1) bias column.
    """
    eye_b = jnp.eye(batch, dtype=jnp.float32)
    wexps, bexps = [], []
    for w, b in zip(weights, biases):
        taps = [jnp.kron(w[:, :, k], eye_b) for k in range(w.shape[2])]
        wexps.append(jnp.concatenate(taps, axis=1))
        bexps.append(jnp.repeat(b, batch)[:, None])
    return wexps, bexps


# ----------------------------------------------------------------------------
# The fused Pallas kernel
# ----------------------------------------------------------------------------
def make_fused_rlgcnn_kernel(conv_shapes, message_passes, batch, n_nodes, w0):
    n_convs = len(conv_shapes)

    def kernel(*refs):
        z_ref, g_ref = refs[0], refs[1]
        w_refs = refs[2:2 + n_convs]
        b_refs = refs[2 + n_convs:2 + 2 * n_convs]
        d_ref = refs[2 + 2 * n_convs]
        o_ref = refs[3 + 2 * n_convs]

        B, N = batch, n_nodes
        gmat = g_ref[...]                                     # (N, W0*N)
        wexp = [w_refs[l][...] for l in range(n_convs)]       # VMEM weight tiles
        bexp = [b_refs[l][...] for l in range(n_convs)]       # VMEM bias columns

        z = z_ref[...]                                        # (B, N) node states
        for _ in range(message_passes):                       # static unroll (tiny body)
            # input_preprocessor: neighbor gather as ONE contraction.
            # rows = (channel=0)*B + b, columns = w*N + node.
            h = jnp.dot(z, gmat, precision=HIGHEST,
                        preferred_element_type=jnp.float32)   # (B, W0*N)
            width = w0
            for l, (_c_out, c_in) in enumerate(conv_shapes):
                wn = width - (KERNEL_W - 1)
                kb = c_in * B
                acc = None
                for k in range(KERNEL_W):                     # 3 hoisted shifted views
                    hk = h[:, k * N:k * N + wn * N]           # (c_in*B, Wn*N)
                    wk = wexp[l][:, k * kb:(k + 1) * kb]      # kron(W_k, I_B)
                    t = jnp.dot(wk, hk, precision=HIGHEST,
                                preferred_element_type=jnp.float32)
                    acc = t if acc is None else acc + t
                h = jnp.maximum(acc + bexp[l], 0.0)           # bias + relu epilogue
                width = wn
            # AvgPool2d([1, 2], stride 1) along the conv-width axis (no relu).
            wp = width - 1
            h = 0.5 * (h[:, :wp * N] + h[:, N:(wp + 1) * N])  # (c_last*B, WP*N)
            # Next-pass node state (torch: z.view(B, -1)); valid because
            # c_last * WP == 1 (asserted by the wrapper), so h is exactly (B, N).
            z = h
        # Final channel-mean is the identity (c_last == 1 here); driver selection
        # is a contraction with a static 0/1 matrix.
        o_ref[...] = jnp.dot(z, d_ref[...], precision=HIGHEST,
                             preferred_element_type=jnp.float32)

    return kernel


def rlgcnn_pallas(z0, gmat, dsel, wexps, bexps, conv_shapes, w0, message_passes):
    batch, n_nodes = z0.shape
    n_drivers = dsel.shape[1]
    n_convs = len(conv_shapes)
    kernel = make_fused_rlgcnn_kernel(conv_shapes, message_passes, batch, n_nodes, w0)
    n_in = 3 + 2 * n_convs
    # Everything fits trivially in VMEM -> single program, no grid.  Scaling lever:
    # grid over batch with dimension_semantics=("parallel",) and N padded to 128.
    return pl.pallas_call(
        kernel,
        out_shape=jax.ShapeDtypeStruct((batch, n_drivers), jnp.float32),
        in_specs=[pl.BlockSpec(memory_space=pltpu.MemorySpace.VMEM)] * n_in,
        out_specs=pl.BlockSpec(memory_space=pltpu.MemorySpace.VMEM),
    )(z0, gmat, *wexps, *bexps, dsel)


def actor_forward(s, gmat, dsel, wexps, bexps, conv_shapes, w0, message_passes):
    """torch Actor.forward: s -> s.view(batch, -1) -> model(s) -> (logits, None)."""
    batch = s.shape[0]
    z0 = jnp.asarray(s, dtype=jnp.float32).reshape(batch, -1)
    logits = rlgcnn_pallas(z0, gmat, dsel, wexps, bexps, conv_shapes, w0,
                           message_passes)
    return logits, None


# ----------------------------------------------------------------------------
# Pure-JAX reference of RLGCNN.forward (for correctness cross-check)
# ----------------------------------------------------------------------------
def rlgcnn_reference(x, weights, biases, gather_idx, gather_mask, drivers,
                     message_passes):
    B = x.shape[0]
    z = x
    for j in range(message_passes):
        g = jnp.take(z, gather_idx, axis=1) * gather_mask[None]     # (B, N, W0)
        cur = jnp.transpose(g, (0, 2, 1))[:, None, :, :]            # (B, 1, W0, N)
        for w, b in zip(weights, biases):
            wn = cur.shape[2] - (KERNEL_W - 1)
            shifted = jnp.stack([cur[:, :, k:k + wn, :] for k in range(KERNEL_W)],
                                axis=2)                             # (B, c_in, 3, Wn, N)
            out = jnp.einsum('oik,bikwn->bown', w, shifted,
                             precision=HIGHEST) + b[None, :, None, None]
            cur = jnp.maximum(out, 0.0)
        wp = cur.shape[2] - 1
        zc = 0.5 * (cur[:, :, :wp, :] + cur[:, :, 1:wp + 1, :])     # (B, c_last, WP, N)
        z = zc.reshape(B, -1) if j < message_passes - 1 else zc
    zm = jnp.mean(z, axis=1)[:, 0, :]                               # (B, N)
    return zm[:, drivers]


if __name__ == "__main__":
    # ---- deterministic problem setup ---------------------------------------
    N = 16                 # graph nodes
    B = 2                  # batch
    in_channels = 1
    feat_channels = 5
    message_passes = 4

    # Circulant adjacency with offsets {±1, ±2, ±3} -> degree 6 everywhere.
    adjacency = np.zeros((N, N), dtype=np.float32)
    for i in range(N):
        for off in (1, 2, 3):
            adjacency[i, (i + off) % N] = 1.0
            adjacency[i, (i - off) % N] = 1.0
    max_degree = int(adjacency.sum(-1).max())          # = 6

    drivers = np.array([0, 3, 7, 12], dtype=np.int32)

    conv_shapes = build_conv_shapes(max_degree, in_channels, feat_channels)
    n_convs = len(conv_shapes)
    W0 = 2 * n_convs + 2                               # gather width fed to conv stack
    WP = W0 - 2 * n_convs - 1                          # width after final avgpool
    c_last = conv_shapes[-1][0]
    # Between-pass z.view(B, -1) only round-trips to (B, N) node states if the
    # conv stack collapses to one scalar per node (reviewer fragility note).
    assert c_last * WP == 1, "conv stack must emit one scalar per node"
    assert max_degree <= W0, "gather table would truncate neighbor lists"

    # input_preprocessor gather tables (zero-padded neighbor lists).
    gather_idx = np.zeros((N, W0), dtype=np.int32)
    gather_mask = np.zeros((N, W0), dtype=np.float32)
    for i in range(N):
        nbrs = np.where(adjacency[i] == 1)[0]
        d = min(len(nbrs), W0)
        gather_idx[i, :d] = nbrs[:d]
        gather_mask[i, :d] = 1.0

    # ---- deterministic parameter init (torch Conv2d-like uniform) ----------
    key = jax.random.PRNGKey(0)
    weights, biases = [], []
    for (c_out, c_in) in conv_shapes:
        key, kw, kb = jax.random.split(key, 3)
        bound = 1.0 / np.sqrt(c_in * KERNEL_W)
        weights.append(jax.random.uniform(kw, (c_out, c_in, KERNEL_W), jnp.float32,
                                          minval=-bound, maxval=bound))
        biases.append(jax.random.uniform(kb, (c_out,), jnp.float32,
                                         minval=-bound, maxval=bound))

    # ---- precompute kernel operands (once, all tiny) ------------------------
    gmat = prepare_gather_matrix(gather_idx, gather_mask)      # (N, W0*N) = (16, 96)
    dsel = prepare_driver_matrix(drivers, N)                   # (N, 4)
    wexps, bexps = prepare_conv_params(weights, biases, B)     # [(10,6),(2,30)], [(10,1),(2,1)]

    # ---- input ---------------------------------------------------------------
    key, kx = jax.random.split(key)
    x = jax.random.normal(kx, (B, N), dtype=jnp.float32)

    fwd = jax.jit(lambda s: actor_forward(s, gmat, dsel, wexps, bexps,
                                          conv_shapes, W0, message_passes))
    logits, state = fwd(x)
    jax.block_until_ready(logits)

    assert state is None
    assert logits.shape == (B, len(drivers))
    assert bool(jnp.all(jnp.isfinite(logits)))

    # Cross-check against the pure-JAX reference of RLGCNN.forward.
    ref = rlgcnn_reference(x, weights, biases, jnp.asarray(gather_idx),
                           jnp.asarray(gather_mask), jnp.asarray(drivers),
                           message_passes)
    np.testing.assert_allclose(np.asarray(logits), np.asarray(ref),
                               rtol=1e-4, atol=1e-6)

    print("KERNEL_OK")
</pallas_src>

<mosaic_0001>
module attributes {stable_mosaic.version = 11 : i64} {
  func.func @kernel(%arg0: memref<2x16xf32, #tpu.memory_space<vmem>>, %arg1: memref<16x96xf32, #tpu.memory_space<vmem>>, %arg2: memref<10x6xf32, #tpu.memory_space<vmem>>, %arg3: memref<2x30xf32, #tpu.memory_space<vmem>>, %arg4: memref<10x1xf32, #tpu.memory_space<vmem>>, %arg5: memref<2x1xf32, #tpu.memory_space<vmem>>, %arg6: memref<16x4xf32, #tpu.memory_space<vmem>>, %arg7: memref<2x4xf32, #tpu.memory_space<vmem>>) attributes {dimension_semantics = [], scalar_prefetch = 0 : i64, scratch_operands = 0 : i64, tpu.core_type = #tpu.core_type<tc>} {
    %c0 = arith.constant 0 : index
    %c0_0 = arith.constant 0 : index
    %0 = vector.load %arg1[%c0, %c0_0] : memref<16x96xf32, #tpu.memory_space<vmem>>, vector<16x96xf32>
    %c0_1 = arith.constant 0 : index
    %c0_2 = arith.constant 0 : index
    %1 = vector.load %arg2[%c0_1, %c0_2] : memref<10x6xf32, #tpu.memory_space<vmem>>, vector<10x6xf32>
    %c0_3 = arith.constant 0 : index
    %c0_4 = arith.constant 0 : index
    %2 = vector.load %arg3[%c0_3, %c0_4] : memref<2x30xf32, #tpu.memory_space<vmem>>, vector<2x30xf32>
    %c0_5 = arith.constant 0 : index
    %c0_6 = arith.constant 0 : index
    %3 = vector.load %arg4[%c0_5, %c0_6] : memref<10x1xf32, #tpu.memory_space<vmem>>, vector<10x1xf32>
    %c0_7 = arith.constant 0 : index
    %c0_8 = arith.constant 0 : index
    %4 = vector.load %arg5[%c0_7, %c0_8] : memref<2x1xf32, #tpu.memory_space<vmem>>, vector<2x1xf32>
    %c0_9 = arith.constant 0 : index
    %c0_10 = arith.constant 0 : index
    %5 = vector.load %arg0[%c0_9, %c0_10] : memref<2x16xf32, #tpu.memory_space<vmem>>, vector<2x16xf32>
    %cst = arith.constant dense<0.000000e+00> : vector<2x96xf32>
    %6 = tpu.matmul %5, %0, %cst {dimension_numbers = #tpu.dot_dimension_numbers<[1], [0], [0], [1], [0, 0, 1, 1], [], []>, precision = #tpu.contract_precision<fp32>} : vector<2x16xf32>, vector<16x96xf32>, vector<2x96xf32> -> vector<2x96xf32>
    %7 = vector.extract_strided_slice %6 {offsets = [0, 0], sizes = [2, 64], strides = [1, 1]} : vector<2x96xf32> to vector<2x64xf32>
    %8 = vector.extract_strided_slice %1 {offsets = [0, 0], sizes = [10, 2], strides = [1, 1]} : vector<10x6xf32> to vector<10x2xf32>
    %cst_11 = arith.constant dense<0.000000e+00> : vector<10x64xf32>
    %9 = tpu.matmul %8, %7, %cst_11 {dimension_numbers = #tpu.dot_dimension_numbers<[1], [0], [0], [1], [0, 0, 1, 1], [], []>, precision = #tpu.contract_precision<fp32>} : vector<10x2xf32>, vector<2x64xf32>, vector<10x64xf32> -> vector<10x64xf32>
    %10 = vector.extract_strided_slice %6 {offsets = [0, 16], sizes = [2, 64], strides = [1, 1]} : vector<2x96xf32> to vector<2x64xf32>
    %11 = vector.extract_strided_slice %1 {offsets = [0, 2], sizes = [10, 2], strides = [1, 1]} : vector<10x6xf32> to vector<10x2xf32>
    %cst_12 = arith.constant dense<0.000000e+00> : vector<10x64xf32>
    %12 = tpu.matmul %11, %10, %cst_12 {dimension_numbers = #tpu.dot_dimension_numbers<[1], [0], [0], [1], [0, 0, 1, 1], [], []>, precision = #tpu.contract_precision<fp32>} : vector<10x2xf32>, vector<2x64xf32>, vector<10x64xf32> -> vector<10x64xf32>
    %13 = arith.addf %9, %12 : vector<10x64xf32>
    %14 = vector.extract_strided_slice %6 {offsets = [0, 32], sizes = [2, 64], strides = [1, 1]} : vector<2x96xf32> to vector<2x64xf32>
    %15 = vector.extract_strided_slice %1 {offsets = [0, 4], sizes = [10, 2], strides = [1, 1]} : vector<10x6xf32> to vector<10x2xf32>
    %cst_13 = arith.constant dense<0.000000e+00> : vector<10x64xf32>
    %16 = tpu.matmul %15, %14, %cst_13 {dimension_numbers = #tpu.dot_dimension_numbers<[1], [0], [0], [1], [0, 0, 1, 1], [], []>, precision = #tpu.contract_precision<fp32>} : vector<10x2xf32>, vector<2x64xf32>, vector<10x64xf32> -> vector<10x64xf32>
    %17 = arith.addf %13, %16 : vector<10x64xf32>
    %18 = vector.broadcast %3 : vector<10x1xf32> to vector<10x64xf32>
    %19 = arith.addf %17, %18 : vector<10x64xf32>
    %cst_14 = arith.constant 0.000000e+00 : f32
    %20 = vector.broadcast %cst_14 : f32 to vector<10x64xf32>
    %21 = arith.maximumf %19, %20 : vector<10x64xf32>
    %22 = vector.extract_strided_slice %21 {offsets = [0, 0], sizes = [10, 32], strides = [1, 1]} : vector<10x64xf32> to vector<10x32xf32>
    %23 = vector.extract_strided_slice %2 {offsets = [0, 0], sizes = [2, 10], strides = [1, 1]} : vector<2x30xf32> to vector<2x10xf32>
    %cst_15 = arith.constant dense<0.000000e+00> : vector<2x32xf32>
    %24 = tpu.matmul %23, %22, %cst_15 {dimension_numbers = #tpu.dot_dimension_numbers<[1], [0], [0], [1], [0, 0, 1, 1], [], []>, precision = #tpu.contract_precision<fp32>} : vector<2x10xf32>, vector<10x32xf32>, vector<2x32xf32> -> vector<2x32xf32>
    %25 = vector.extract_strided_slice %21 {offsets = [0, 16], sizes = [10, 32], strides = [1, 1]} : vector<10x64xf32> to vector<10x32xf32>
    %26 = vector.extract_strided_slice %2 {offsets = [0, 10], sizes = [2, 10], strides = [1, 1]} : vector<2x30xf32> to vector<2x10xf32>
    %cst_16 = arith.constant dense<0.000000e+00> : vector<2x32xf32>
    %27 = tpu.matmul %26, %25, %cst_16 {dimension_numbers = #tpu.dot_dimension_numbers<[1], [0], [0], [1], [0, 0, 1, 1], [], []>, precision = #tpu.contract_precision<fp32>} : vector<2x10xf32>, vector<10x32xf32>, vector<2x32xf32> -> vector<2x32xf32>
    %28 = arith.addf %24, %27 : vector<2x32xf32>
    %29 = vector.extract_strided_slice %21 {offsets = [0, 32], sizes = [10, 32], strides = [1, 1]} : vector<10x64xf32> to vector<10x32xf32>
    %30 = vector.extract_strided_slice %2 {offsets = [0, 20], sizes = [2, 10], strides = [1, 1]} : vector<2x30xf32> to vector<2x10xf32>
    %cst_17 = arith.constant dense<0.000000e+00> : vector<2x32xf32>
    %31 = tpu.matmul %30, %29, %cst_17 {dimension_numbers = #tpu.dot_dimension_numbers<[1], [0], [0], [1], [0, 0, 1, 1], [], []>, precision = #tpu.contract_precision<fp32>} : vector<2x10xf32>, vector<10x32xf32>, vector<2x32xf32> -> vector<2x32xf32>
    %32 = arith.addf %28, %31 : vector<2x32xf32>
    %33 = vector.broadcast %4 : vector<2x1xf32> to vector<2x32xf32>
    %34 = arith.addf %32, %33 : vector<2x32xf32>
    %cst_18 = arith.constant 0.000000e+00 : f32
    %35 = vector.broadcast %cst_18 : f32 to vector<2x32xf32>
    %36 = arith.maximumf %34, %35 : vector<2x32xf32>
    %37 = vector.extract_strided_slice %36 {offsets = [0, 0], sizes = [2, 16], strides = [1, 1]} : vector<2x32xf32> to vector<2x16xf32>
    %38 = vector.extract_strided_slice %36 {offsets = [0, 16], sizes = [2, 16], strides = [1, 1]} : vector<2x32xf32> to vector<2x16xf32>
    %39 = arith.addf %37, %38 : vector<2x16xf32>
    %cst_19 = arith.constant 5.000000e-01 : f32
    %40 = vector.broadcast %cst_19 : f32 to vector<2x16xf32>
    %41 = arith.mulf %40, %39 : vector<2x16xf32>
    %cst_20 = arith.constant dense<0.000000e+00> : vector<2x96xf32>
    %42 = tpu.matmul %41, %0, %cst_20 {dimension_numbers = #tpu.dot_dimension_numbers<[1], [0], [0], [1], [0, 0, 1, 1], [], []>, precision = #tpu.contract_precision<fp32>} : vector<2x16xf32>, vector<16x96xf32>, vector<2x96xf32> -> vector<2x96xf32>
    %43 = vector.extract_strided_slice %42 {offsets = [0, 0], sizes = [2, 64], strides = [1, 1]} : vector<2x96xf32> to vector<2x64xf32>
    %44 = vector.extract_strided_slice %1 {offsets = [0, 0], sizes = [10, 2], strides = [1, 1]} : vector<10x6xf32> to vector<10x2xf32>
    %cst_21 = arith.constant dense<0.000000e+00> : vector<10x64xf32>
    %45 = tpu.matmul %44, %43, %cst_21 {dimension_numbers = #tpu.dot_dimension_numbers<[1], [0], [0], [1], [0, 0, 1, 1], [], []>, precision = #tpu.contract_precision<fp32>} : vector<10x2xf32>, vector<2x64xf32>, vector<10x64xf32> -> vector<10x64xf32>
    %46 = vector.extract_strided_slice %42 {offsets = [0, 16], sizes = [2, 64], strides = [1, 1]} : vector<2x96xf32> to vector<2x64xf32>
    %47 = vector.extract_strided_slice %1 {offsets = [0, 2], sizes = [10, 2], strides = [1, 1]} : vector<10x6xf32> to vector<10x2xf32>
    %cst_22 = arith.constant dense<0.000000e+00> : vector<10x64xf32>
    %48 = tpu.matmul %47, %46, %cst_22 {dimension_numbers = #tpu.dot_dimension_numbers<[1], [0], [0], [1], [0, 0, 1, 1], [], []>, precision = #tpu.contract_precision<fp32>} : vector<10x2xf32>, vector<2x64xf32>, vector<10x64xf32> -> vector<10x64xf32>
    %49 = arith.addf %45, %48 : vector<10x64xf32>
    %50 = vector.extract_strided_slice %42 {offsets = [0, 32], sizes = [2, 64], strides = [1, 1]} : vector<2x96xf32> to vector<2x64xf32>
    %51 = vector.extract_strided_slice %1 {offsets = [0, 4], sizes = [10, 2], strides = [1, 1]} : vector<10x6xf32> to vector<10x2xf32>
    %cst_23 = arith.constant dense<0.000000e+00> : vector<10x64xf32>
    %52 = tpu.matmul %51, %50, %cst_23 {dimension_numbers = #tpu.dot_dimension_numbers<[1], [0], [0], [1], [0, 0, 1, 1], [], []>, precision = #tpu.contract_precision<fp32>} : vector<10x2xf32>, vector<2x64xf32>, vector<10x64xf32> -> vector<10x64xf32>
    %53 = arith.addf %49, %52 : vector<10x64xf32>
    %54 = vector.broadcast %3 : vector<10x1xf32> to vector<10x64xf32>
    %55 = arith.addf %53, %54 : vector<10x64xf32>
    %cst_24 = arith.constant 0.000000e+00 : f32
    %56 = vector.broadcast %cst_24 : f32 to vector<10x64xf32>
    %57 = arith.maximumf %55, %56 : vector<10x64xf32>
    %58 = vector.extract_strided_slice %57 {offsets = [0, 0], sizes = [10, 32], strides = [1, 1]} : vector<10x64xf32> to vector<10x32xf32>
    %59 = vector.extract_strided_slice %2 {offsets = [0, 0], sizes = [2, 10], strides = [1, 1]} : vector<2x30xf32> to vector<2x10xf32>
    %cst_25 = arith.constant dense<0.000000e+00> : vector<2x32xf32>
    %60 = tpu.matmul %59, %58, %cst_25 {dimension_numbers = #tpu.dot_dimension_numbers<[1], [0], [0], [1], [0, 0, 1, 1], [], []>, precision = #tpu.contract_precision<fp32>} : vector<2x10xf32>, vector<10x32xf32>, vector<2x32xf32> -> vector<2x32xf32>
    %61 = vector.extract_strided_slice %57 {offsets = [0, 16], sizes = [10, 32], strides = [1, 1]} : vector<10x64xf32> to vector<10x32xf32>
    %62 = vector.extract_strided_slice %2 {offsets = [0, 10], sizes = [2, 10], strides = [1, 1]} : vector<2x30xf32> to vector<2x10xf32>
    %cst_26 = arith.constant dense<0.000000e+00> : vector<2x32xf32>
    %63 = tpu.matmul %62, %61, %cst_26 {dimension_numbers = #tpu.dot_dimension_numbers<[1], [0], [0], [1], [0, 0, 1, 1], [], []>, precision = #tpu.contract_precision<fp32>} : vector<2x10xf32>, vector<10x32xf32>, vector<2x32xf32> -> vector<2x32xf32>
    %64 = arith.addf %60, %63 : vector<2x32xf32>
    %65 = vector.extract_strided_slice %57 {offsets = [0, 32], sizes = [10, 32], strides = [1, 1]} : vector<10x64xf32> to vector<10x32xf32>
    %66 = vector.extract_strided_slice %2 {offsets = [0, 20], sizes = [2, 10], strides = [1, 1]} : vector<2x30xf32> to vector<2x10xf32>
    %cst_27 = arith.constant dense<0.000000e+00> : vector<2x32xf32>
    %67 = tpu.matmul %66, %65, %cst_27 {dimension_numbers = #tpu.dot_dimension_numbers<[1], [0], [0], [1], [0, 0, 1, 1], [], []>, precision = #tpu.contract_precision<fp32>} : vector<2x10xf32>, vector<10x32xf32>, vector<2x32xf32> -> vector<2x32xf32>
    %68 = arith.addf %64, %67 : vector<2x32xf32>
    %69 = vector.broadcast %4 : vector<2x1xf32> to vector<2x32xf32>
    %70 = arith.addf %68, %69 : vector<2x32xf32>
    %cst_28 = arith.constant 0.000000e+00 : f32
    %71 = vector.broadcast %cst_28 : f32 to vector<2x32xf32>
    %72 = arith.maximumf %70, %71 : vector<2x32xf32>
    %73 = vector.extract_strided_slice %72 {offsets = [0, 0], sizes = [2, 16], strides = [1, 1]} : vector<2x32xf32> to vector<2x16xf32>
    %74 = vector.extract_strided_slice %72 {offsets = [0, 16], sizes = [2, 16], strides = [1, 1]} : vector<2x32xf32> to vector<2x16xf32>
    %75 = arith.addf %73, %74 : vector<2x16xf32>
    %cst_29 = arith.constant 5.000000e-01 : f32
    %76 = vector.broadcast %cst_29 : f32 to vector<2x16xf32>
    %77 = arith.mulf %76, %75 : vector<2x16xf32>
    %cst_30 = arith.constant dense<0.000000e+00> : vector<2x96xf32>
    %78 = tpu.matmul %77, %0, %cst_30 {dimension_numbers = #tpu.dot_dimension_numbers<[1], [0], [0], [1], [0, 0, 1, 1], [], []>, precision = #tpu.contract_precision<fp32>} : vector<2x16xf32>, vector<16x96xf32>, vector<2x96xf32> -> vector<2x96xf32>
    %79 = vector.extract_strided_slice %78 {offsets = [0, 0], sizes = [2, 64], strides = [1, 1]} : vector<2x96xf32> to vector<2x64xf32>
    %80 = vector.extract_strided_slice %1 {offsets = [0, 0], sizes = [10, 2], strides = [1, 1]} : vector<10x6xf32> to vector<10x2xf32>
    %cst_31 = arith.constant dense<0.000000e+00> : vector<10x64xf32>
    %81 = tpu.matmul %80, %79, %cst_31 {dimension_numbers = #tpu.dot_dimension_numbers<[1], [0], [0], [1], [0, 0, 1, 1], [], []>, precision = #tpu.contract_precision<fp32>} : vector<10x2xf32>, vector<2x64xf32>, vector<10x64xf32> -> vector<10x64xf32>
    %82 = vector.extract_strided_slice %78 {offsets = [0, 16], sizes = [2, 64], strides = [1, 1]} : vector<2x96xf32> to vector<2x64xf32>
    %83 = vector.extract_strided_slice %1 {offsets = [0, 2], sizes = [10, 2], strides = [1, 1]} : vector<10x6xf32> to vector<10x2xf32>
    %cst_32 = arith.constant dense<0.000000e+00> : vector<10x64xf32>
    %84 = tpu.matmul %83, %82, %cst_32 {dimension_numbers = #tpu.dot_dimension_numbers<[1], [0], [0], [1], [0, 0, 1, 1], [], []>, precision = #tpu.contract_precision<fp32>} : vector<10x2xf32>, vector<2x64xf32>, vector<10x64xf32> -> vector<10x64xf32>
    %85 = arith.addf %81, %84 : vector<10x64xf32>
    %86 = vector.extract_strided_slice %78 {offsets = [0, 32], sizes = [2, 64], strides = [1, 1]} : vector<2x96xf32> to vector<2x64xf32>
    %87 = vector.extract_strided_slice %1 {offsets = [0, 4], sizes = [10, 2], strides = [1, 1]} : vector<10x6xf32> to vector<10x2xf32>
    %cst_33 = arith.constant dense<0.000000e+00> : vector<10x64xf32>
    %88 = tpu.matmul %87, %86, %cst_33 {dimension_numbers = #tpu.dot_dimension_numbers<[1], [0], [0], [1], [0, 0, 1, 1], [], []>, precision = #tpu.contract_precision<fp32>} : vector<10x2xf32>, vector<2x64xf32>, vector<10x64xf32> -> vector<10x64xf32>
    %89 = arith.addf %85, %88 : vector<10x64xf32>
    %90 = vector.broadcast %3 : vector<10x1xf32> to vector<10x64xf32>
    %91 = arith.addf %89, %90 : vector<10x64xf32>
    %cst_34 = arith.constant 0.000000e+00 : f32
    %92 = vector.broadcast %cst_34 : f32 to vector<10x64xf32>
    %93 = arith.maximumf %91, %92 : vector<10x64xf32>
    %94 = vector.extract_strided_slice %93 {offsets = [0, 0], sizes = [10, 32], strides = [1, 1]} : vector<10x64xf32> to vector<10x32xf32>
    %95 = vector.extract_strided_slice %2 {offsets = [0, 0], sizes = [2, 10], strides = [1, 1]} : vector<2x30xf32> to vector<2x10xf32>
    %cst_35 = arith.constant dense<0.000000e+00> : vector<2x32xf32>
    %96 = tpu.matmul %95, %94, %cst_35 {dimension_numbers = #tpu.dot_dimension_numbers<[1], [0], [0], [1], [0, 0, 1, 1], [], []>, precision = #tpu.contract_precision<fp32>} : vector<2x10xf32>, vector<10x32xf32>, vector<2x32xf32> -> vector<2x32xf32>
    %97 = vector.extract_strided_slice %93 {offsets = [0, 16], sizes = [10, 32], strides = [1, 1]} : vector<10x64xf32> to vector<10x32xf32>
    %98 = vector.extract_strided_slice %2 {offsets = [0, 10], sizes = [2, 10], strides = [1, 1]} : vector<2x30xf32> to vector<2x10xf32>
    %cst_36 = arith.constant dense<0.000000e+00> : vector<2x32xf32>
    %99 = tpu.matmul %98, %97, %cst_36 {dimension_numbers = #tpu.dot_dimension_numbers<[1], [0], [0], [1], [0, 0, 1, 1], [], []>, precision = #tpu.contract_precision<fp32>} : vector<2x10xf32>, vector<10x32xf32>, vector<2x32xf32> -> vector<2x32xf32>
    %100 = arith.addf %96, %99 : vector<2x32xf32>
    %101 = vector.extract_strided_slice %93 {offsets = [0, 32], sizes = [10, 32], strides = [1, 1]} : vector<10x64xf32> to vector<10x32xf32>
    %102 = vector.extract_strided_slice %2 {offsets = [0, 20], sizes = [2, 10], strides = [1, 1]} : vector<2x30xf32> to vector<2x10xf32>
    %cst_37 = arith.constant dense<0.000000e+00> : vector<2x32xf32>
    %103 = tpu.matmul %102, %101, %cst_37 {dimension_numbers = #tpu.dot_dimension_numbers<[1], [0], [0], [1], [0, 0, 1, 1], [], []>, precision = #tpu.contract_precision<fp32>} : vector<2x10xf32>, vector<10x32xf32>, vector<2x32xf32> -> vector<2x32xf32>
    %104 = arith.addf %100, %103 : vector<2x32xf32>
    %105 = vector.broadcast %4 : vector<2x1xf32> to vector<2x32xf32>
    %106 = arith.addf %104, %105 : vector<2x32xf32>
    %cst_38 = arith.constant 0.000000e+00 : f32
    %107 = vector.broadcast %cst_38 : f32 to vector<2x32xf32>
    %108 = arith.maximumf %106, %107 : vector<2x32xf32>
    %109 = vector.extract_strided_slice %108 {offsets = [0, 0], sizes = [2, 16], strides = [1, 1]} : vector<2x32xf32> to vector<2x16xf32>
    %110 = vector.extract_strided_slice %108 {offsets = [0, 16], sizes = [2, 16], strides = [1, 1]} : vector<2x32xf32> to vector<2x16xf32>
    %111 = arith.addf %109, %110 : vector<2x16xf32>
    %cst_39 = arith.constant 5.000000e-01 : f32
    %112 = vector.broadcast %cst_39 : f32 to vector<2x16xf32>
    %113 = arith.mulf %112, %111 : vector<2x16xf32>
    %cst_40 = arith.constant dense<0.000000e+00> : vector<2x96xf32>
    %114 = tpu.matmul %113, %0, %cst_40 {dimension_numbers = #tpu.dot_dimension_numbers<[1], [0], [0], [1], [0, 0, 1, 1], [], []>, precision = #tpu.contract_precision<fp32>} : vector<2x16xf32>, vector<16x96xf32>, vector<2x96xf32> -> vector<2x96xf32>
    %115 = vector.extract_strided_slice %114 {offsets = [0, 0], sizes = [2, 64], strides = [1, 1]} : vector<2x96xf32> to vector<2x64xf32>
    %116 = vector.extract_strided_slice %1 {offsets = [0, 0], sizes = [10, 2], strides = [1, 1]} : vector<10x6xf32> to vector<10x2xf32>
    %cst_41 = arith.constant dense<0.000000e+00> : vector<10x64xf32>
    %117 = tpu.matmul %116, %115, %cst_41 {dimension_numbers = #tpu.dot_dimension_numbers<[1], [0], [0], [1], [0, 0, 1, 1], [], []>, precision = #tpu.contract_precision<fp32>} : vector<10x2xf32>, vector<2x64xf32>, vector<10x64xf32> -> vector<10x64xf32>
    %118 = vector.extract_strided_slice %114 {offsets = [0, 16], sizes = [2, 64], strides = [1, 1]} : vector<2x96xf32> to vector<2x64xf32>
    %119 = vector.extract_strided_slice %1 {offsets = [0, 2], sizes = [10, 2], strides = [1, 1]} : vector<10x6xf32> to vector<10x2xf32>
    %cst_42 = arith.constant dense<0.000000e+00> : vector<10x64xf32>
    %120 = tpu.matmul %119, %118, %cst_42 {dimension_numbers = #tpu.dot_dimension_numbers<[1], [0], [0], [1], [0, 0, 1, 1], [], []>, precision = #tpu.contract_precision<fp32>} : vector<10x2xf32>, vector<2x64xf32>, vector<10x64xf32> -> vector<10x64xf32>
    %121 = arith.addf %117, %120 : vector<10x64xf32>
    %122 = vector.extract_strided_slice %114 {offsets = [0, 32], sizes = [2, 64], strides = [1, 1]} : vector<2x96xf32> to vector<2x64xf32>
    %123 = vector.extract_strided_slice %1 {offsets = [0, 4], sizes = [10, 2], strides = [1, 1]} : vector<10x6xf32> to vector<10x2xf32>
    %cst_43 = arith.constant dense<0.000000e+00> : vector<10x64xf32>
    %124 = tpu.matmul %123, %122, %cst_43 {dimension_numbers = #tpu.dot_dimension_numbers<[1], [0], [0], [1], [0, 0, 1, 1], [], []>, precision = #tpu.contract_precision<fp32>} : vector<10x2xf32>, vector<2x64xf32>, vector<10x64xf32> -> vector<10x64xf32>
    %125 = arith.addf %121, %124 : vector<10x64xf32>
    %126 = vector.broadcast %3 : vector<10x1xf32> to vector<10x64xf32>
    %127 = arith.addf %125, %126 : vector<10x64xf32>
    %cst_44 = arith.constant 0.000000e+00 : f32
    %128 = vector.broadcast %cst_44 : f32 to vector<10x64xf32>
    %129 = arith.maximumf %127, %128 : vector<10x64xf32>
    %130 = vector.extract_strided_slice %129 {offsets = [0, 0], sizes = [10, 32], strides = [1, 1]} : vector<10x64xf32> to vector<10x32xf32>
    %131 = vector.extract_strided_slice %2 {offsets = [0, 0], sizes = [2, 10], strides = [1, 1]} : vector<2x30xf32> to vector<2x10xf32>
    %cst_45 = arith.constant dense<0.000000e+00> : vector<2x32xf32>
    %132 = tpu.matmul %131, %130, %cst_45 {dimension_numbers = #tpu.dot_dimension_numbers<[1], [0], [0], [1], [0, 0, 1, 1], [], []>, precision = #tpu.contract_precision<fp32>} : vector<2x10xf32>, vector<10x32xf32>, vector<2x32xf32> -> vector<2x32xf32>
    %133 = vector.extract_strided_slice %129 {offsets = [0, 16], sizes = [10, 32], strides = [1, 1]} : vector<10x64xf32> to vector<10x32xf32>
    %134 = vector.extract_strided_slice %2 {offsets = [0, 10], sizes = [2, 10], strides = [1, 1]} : vector<2x30xf32> to vector<2x10xf32>
    %cst_46 = arith.constant dense<0.000000e+00> : vector<2x32xf32>
    %135 = tpu.matmul %134, %133, %cst_46 {dimension_numbers = #tpu.dot_dimension_numbers<[1], [0], [0], [1], [0, 0, 1, 1], [], []>, precision = #tpu.contract_precision<fp32>} : vector<2x10xf32>, vector<10x32xf32>, vector<2x32xf32> -> vector<2x32xf32>
    %136 = arith.addf %132, %135 : vector<2x32xf32>
    %137 = vector.extract_strided_slice %129 {offsets = [0, 32], sizes = [10, 32], strides = [1, 1]} : vector<10x64xf32> to vector<10x32xf32>
    %138 = vector.extract_strided_slice %2 {offsets = [0, 20], sizes = [2, 10], strides = [1, 1]} : vector<2x30xf32> to vector<2x10xf32>
    %cst_47 = arith.constant dense<0.000000e+00> : vector<2x32xf32>
    %139 = tpu.matmul %138, %137, %cst_47 {dimension_numbers = #tpu.dot_dimension_numbers<[1], [0], [0], [1], [0, 0, 1, 1], [], []>, precision = #tpu.contract_precision<fp32>} : vector<2x10xf32>, vector<10x32xf32>, vector<2x32xf32> -> vector<2x32xf32>
    %140 = arith.addf %136, %139 : vector<2x32xf32>
    %141 = vector.broadcast %4 : vector<2x1xf32> to vector<2x32xf32>
    %142 = arith.addf %140, %141 : vector<2x32xf32>
    %cst_48 = arith.constant 0.000000e+00 : f32
    %143 = vector.broadcast %cst_48 : f32 to vector<2x32xf32>
    %144 = arith.maximumf %142, %143 : vector<2x32xf32>
    %145 = vector.extract_strided_slice %144 {offsets = [0, 0], sizes = [2, 16], strides = [1, 1]} : vector<2x32xf32> to vector<2x16xf32>
    %146 = vector.extract_strided_slice %144 {offsets = [0, 16], sizes = [2, 16], strides = [1, 1]} : vector<2x32xf32> to vector<2x16xf32>
    %147 = arith.addf %145, %146 : vector<2x16xf32>
    %cst_49 = arith.constant 5.000000e-01 : f32
    %148 = vector.broadcast %cst_49 : f32 to vector<2x16xf32>
    %149 = arith.mulf %148, %147 : vector<2x16xf32>
    %c0_50 = arith.constant 0 : index
    %c0_51 = arith.constant 0 : index
    %150 = vector.load %arg6[%c0_50, %c0_51] : memref<16x4xf32, #tpu.memory_space<vmem>>, vector<16x4xf32>
    %cst_52 = arith.constant dense<0.000000e+00> : vector<2x4xf32>
    %151 = tpu.matmul %149, %150, %cst_52 {dimension_numbers = #tpu.dot_dimension_numbers<[1], [0], [0], [1], [0, 0, 1, 1], [], []>, precision = #tpu.contract_precision<fp32>} : vector<2x16xf32>, vector<16x4xf32>, vector<2x4xf32> -> vector<2x4xf32>
    %c0_53 = arith.constant 0 : index
    %c0_54 = arith.constant 0 : index
    %152 = vector.load %arg7[%c0_53, %c0_54] : memref<2x4xf32, #tpu.memory_space<vmem>>, vector<2x4xf32>
    tpu.vector_store %arg7[%c0_53, %c0_54], %151 {strides = array<i32>} : memref<2x4xf32, #tpu.memory_space<vmem>>, vector<2x4xf32>,
    return
  }
}

</mosaic_0001>

<bundles_post_ra>
// kernel: _lambda_.1
= control target key start
LH: loop header
LB: loop body
LE: loop exit
PB: predicated region body
PF: predicated region fallthrough
CT: control target
= control target key end

     0   :  { %12 = vsyncpa [#allocation3], 0  ;;  %s16876_s0 = inlined_call_operand.vmem [shape: f32[2,16], index: 0, kind: input, shape index: {}]   ;;  %s16877_s1 = inlined_call_operand.hbm [shape: f32[16,96], index: 1, kind: input, shape index: {}]   ;;  %s16878_s2 = inlined_call_operand.hbm [shape: f32[10,6], index: 2, kind: input, shape index: {}]   ;;  %s16879_s3 = inlined_call_operand.vmem [shape: f32[2,30], index: 3, kind: input, shape index: {}]   ;;  %s16880_s4 = inlined_call_operand.hbm [shape: f32[10,1], index: 4, kind: input, shape index: {}]   ;;  %s16881_s5 = inlined_call_operand.vmem [shape: f32[2,1], index: 5, kind: input, shape index: {}]   ;;  %s16882_s6 = inlined_call_operand.hbm [shape: f32[16,4], index: 6, kind: input, shape index: {}]   ;;  %s16883_s7 = inlined_call_operand.hbm [shape: f32[2,4], index: 7, kind: output, shape index: {}]  }
   0x1   :  { %13 = vsyncpa [#allocation6], 0 }
   0x2   :  { %14 = vsyncpa [#allocation9], 0 }
   0x3   :  { %15 = vsyncpa [#allocation4], 0  ;;  %s15748_s24 = smov [#allocation5]   ;;  %s15749_s26 = smov [#allocation2]  }
   0x4   :  { %s35_s25 = sshll.u32 %s15748_s24, 4  ;;  %s23_s27 = sshll.u32 %s15749_s26, 4  ;;  %s36_s25 = int_to_ptr.vmem [resolvable:$true] %s35_s25  ;;  %s24_s27 = int_to_ptr.vmem [resolvable:$true] %s23_s27 }
   0x5   :  { %s15648_s28 = scalar_lea.vmem %s36_s25, 256  ;;  %p15653_p1 = scmp.lt.s32.totalorder %s36_s25, %s36_s25 }
   0x6   :  { %p15649_p0 = scmp.ne.s32.totalorder %s36_s25, %s15648_s28  ;;  %p15654_p2 = scmp.lt.s32.totalorder %s15648_s28, %s15648_s28 }
   0x8   :  { %p15655_p3 = por %p15654_p2, %p15653_p1 }
   0xa   :  { %p15656_p4 = pnand %p15655_p3, %p15649_p0 }
   0xc   :  { %15659 = shalt.err (!%p15656_p4)
}
   0xd   :  { %s15750_s29 = smov 128   ;;  %s15751_s30 = smov 8  }
   0xe   :  { %41 = dma.hbm_to_vmem [thread:$0]  %s16878_s2, 256, %s36_s25, [#allocation6], %s15750_s29, %s15750_s29, %s15751_s30  }
   0xf   :  { %s15668_s10 = scalar_lea.vmem %s24_s27, 256  ;;  %p15673_p6 = scmp.lt.s32.totalorder %s24_s27, %s24_s27 }
  0x10   :  { %p15669_p5 = scmp.ne.s32.totalorder %s24_s27, %s15668_s10  ;;  %p15674_p7 = scmp.lt.s32.totalorder %s15668_s10, %s15668_s10 }
  0x12   :  { %p15675_p8 = por %p15674_p7, %p15673_p6 }
  0x14   :  { %p15676_p9 = pnand %p15675_p8, %p15669_p5 }
  0x16   :  { %15679 = shalt.err (!%p15676_p9)
}
  0x17   :  { %29 = dma.hbm_to_vmem [thread:$0]  %s16877_s1, 256, %s24_s27, [#allocation3], %s15750_s29, %s15750_s29, %s15751_s30  }
  0x18   :  { %s15752_s13 = smov [#allocation7]   ;;  %s15753_s15 = smov [#allocation8]  }
  0x19   :  { %s49_s14 = sshll.u32 %s15752_s13, 4  ;;  %s63_s16 = sshll.u32 %s15753_s15, 4  ;;  %s50_s14 = int_to_ptr.vmem [resolvable:$true] %s49_s14  ;;  %s64_s16 = int_to_ptr.vmem [resolvable:$true] %s63_s16 }
  0x1a   :  { %s15688_s2 = scalar_lea.vmem %s50_s14, 256  ;;  %p15693_p11 = scmp.lt.s32.totalorder %s50_s14, %s50_s14 }
  0x1b   :  { %p15689_p10 = scmp.ne.s32.totalorder %s50_s14, %s15688_s2  ;;  %p15694_p12 = scmp.lt.s32.totalorder %s15688_s2, %s15688_s2 }
  0x1d   :  { %p15695_p13 = por %p15694_p12, %p15693_p11 }
  0x1f   :  { %p15696_p0 = pnand %p15695_p13, %p15689_p10 }
  0x21   :  { %15699 = shalt.err (!%p15696_p0)
}
  0x22   :  { %55 = dma.hbm_to_vmem [thread:$0]  %s16880_s4, 256, %s50_s14, [#allocation6], %s15750_s29, %s15750_s29, %s15751_s30  }
  0x23   :  { %s15708_s1 = scalar_lea.vmem %s64_s16, 256  ;;  %p15713_p2 = scmp.lt.s32.totalorder %s64_s16, %s64_s16 }
  0x24   :  { %p15709_p1 = scmp.ne.s32.totalorder %s64_s16, %s15708_s1  ;;  %p15714_p3 = scmp.lt.s32.totalorder %s15708_s1, %s15708_s1 }
  0x26   :  { %p15715_p4 = por %p15714_p3, %p15713_p2 }
  0x28   :  { %p15716_p5 = pnand %p15715_p4, %p15709_p1 }
  0x2a   :  { %15719 = shalt.err (!%p15716_p5)
}
  0x2b   :  { %69 = dma.hbm_to_vmem [thread:$0]  %s16882_s6, 256, %s64_s16, [#allocation9], %s15750_s29, %s15750_s29, %s15751_s30  }
  0x2c   :  { %15740 = dma.done.wait [#allocation3], 256  }
  0x2d   :  { %15741 = vsyncadd [#allocation3], 4294967040 }
  0x2e   :  { %15742 = dma.done.wait [#allocation6], 512  }
  0x2f   :  { %15743 = vsyncadd [#allocation6], 4294966784 }
  0x30   :  { %15744 = dma.done.wait [#allocation9], 256  }
  0x31   :  { %15745 = vsyncadd [#allocation9], 4294967040  ;;  %v16884_v0 = vmov 0.0   ;;  %vm15755_vm0 = vmmov 0   ;;  %vm91_vm1 = vcmask 130048   ;;  %v83_v1 = vld [vmem:[#allocation2 + $0x8] sm:$0xff] }
  0x32   :  { %14548 = vmatprep.subr.mxu0 %v16884_v0  ;;  %14555 = vmatprep.subr.mxu1 %v16884_v0  ;;  %v82_v2 = vld [vmem:[#allocation2] sm:$0xff]  ;;  %v15837_v4 = vand.u32 4294901760, %v83_v1  ;;  %v84_v20 = vld [vmem:[#allocation5] sm:$0xff]  ;;  %v85_v21 = vld [vmem:[#allocation5 + $0x8] sm:$0x3]  ;;  %s15757_s21 = smov 124  }
  0x33   :  { %14552 = vmatprep.mubr.msk.f32.mxu0 %vm15755_vm0, %v16884_v0  ;;  %14559 = vmatprep.mubr.msk.f32.mxu1 %vm15755_vm0, %v16884_v0  ;;  %v90_v3 = vld [vmem:[%s16876_s0] sm:$0x3]  ;;  %v15839_v5 = vand.u32 4294901760, %v82_v2  ;;  %s15756_s0 = smov 126   ;;  %vm563_vm2 = vcmask 15360   ;;  %s15758_s22 = smov 112  }
  0x34   :  { %v93_v6 = vsel %vm91_vm1, %v90_v3, 0  ;;  %14549 = vmatpush3.msra.mxu0 %v15837_v4  ;;  %v15844_v8 = vsub.f32 %v83_v1, %v15837_v4  ;;  %556 = vrot.lane.b32.xlu0 %v84_v20, %s15756_s0  ;;  %s15759_s23 = smov 96   ;;  %v88_v46 = vld [vmem:[#allocation7 + $0x8] sm:$0x3]  ;;  %v87_v47 = vld [vmem:[#allocation7] sm:$0xff]  ;;  %v15760_v48 = vmov 0  }
  0x35   :  { %v162_v7 = vand.u32 4294901760, %v93_v6  ;;  %v15847_v9 = vsub.f32 %v82_v2, %v15839_v5  ;;  %14550 = vmatprep.subr.mxu0 %v16884_v0  ;;  %15638 = vset.pattern.permute.xlu0 %v15760_v48  ;;  %v1060_v54 = vsel %vm563_vm2, %v84_v20, 0  ;;  %v1062_v55 = vsel %vm563_vm2, %v85_v21, 0  ;;  %s15761_s26 = smov 118  }
  0x36   :  { %14551 = vmatpush3.msra.mxu0 %v15839_v5  ;;  %v15852_v11 = vand.u32 4294901760, %v15844_v8  ;;  %15639 = vset.pattern.permute.xlu1 %v15760_v48  ;;  %vm568_vm3 = vcmask 1041408   ;;  %v15922_v56 = vand.u32 4294901760, %v1060_v54  ;;  %v15926_v58 = vand.u32 4294901760, %v1062_v55 }
  0x37   :  { %v163_v10 = vsub.f32 %v93_v6, %v162_v7  ;;  %v15855_v12 = vand.u32 4294901760, %v15847_v9  ;;  %14562 = vmatprep.subr.mxu0 %v16884_v0  ;;  %vm2082_vm4 = vcmask 80896   ;;  %vm14007_vm5 = vcmask 25600  }
  0x38   :  { %v204_v14 = vsub.f32 %v15844_v8, %v15852_v11  ;;  %558 = vrot.lane.b32.xlu0 %v85_v21, %s15756_s0  ;;  %16932 = vst [vmem:[#allocation17_spill] sm:$0xff] %v15922_v56  ;;  %16933 = vst [vmem:[#allocation18_spill] sm:$0xff] %v15926_v58  ;;  %v15931_v62 = vsub.f32 %v1060_v54, %v15922_v56  ;;  %v15936_v2 = vsub.f32 %v1062_v55, %v15926_v58  ;;  %v16040_v54 = vld [vmem:[%s16879_s3] sm:$0x3]  ;;  %s15762_s3 = smov 108  }
  0x39   :  { %v164_v13 = vand.u32 4294901760, %v163_v10  ;;  %v211_v15 = vsub.f32 %v15847_v9, %v15855_v12 }
  0x3a   :  { %v15862_v17 = vand.u32 4294901760, %v204_v14  ;;  %16934 = vst [vmem:[#allocation19_spill] sm:$0xff] %v15931_v62  ;;  %16935 = vst [vmem:[#allocation20_spill] sm:$0xff] %v15936_v2 }
  0x3b   :  { %v165_v16 = vsub.f32 %v163_v10, %v164_v13  ;;  %v15864_v18 = vand.u32 4294901760, %v211_v15  ;;  %v15943_v15 = vand.u32 4294901760, %v15931_v62 }
  0x3c   :  { %16930 = vst [vmem:[#allocation15_spill] sm:$0xff] %v15862_v17  ;;  %14556 = vmatpush3.msra.mxu1 %v15862_v17  ;;  %1557 = vrot.lane.b32.xlu0 %v85_v21, %s15757_s21 }
  0x3d   :  { %16931 = vst [vmem:[#allocation16_spill] sm:$0xff] %v15864_v18  ;;  %v166_v19 = vand.u32 4294901760, %v165_v16  ;;  %14557 = vmatprep.subr.mxu1 %v16884_v0  ;;  %16936 = vst [vmem:[#allocation21_spill] sm:$0xff] %v15943_v15 }
  0x3e   :  { %14558 = vmatpush3.msra.mxu1 %v15864_v18 }
  0x3f   :  { %14553 = vmatmul.mubr.f32.vlgmr.msra.gmra.mxu0 %v166_v19  ;;  %14560 = vmatmul.mubr.f32.vlgmr.msra.gmra.mxu1 %v162_v7  ;;  %v15948_v19 = vand.u32 4294901760, %v15936_v2 }
  0x40   :  { %14563 = vmatpush3.msra.mxu0 %v15844_v8  ;;  %14569 = vmatprep.subr.mxu1 %v16884_v0 }
  0x41   :  { %14564 = vmatprep.subr.mxu0 %v16884_v0  ;;  %14566 = vmatprep.mubr.msk.f32.mxu0 %vm15755_vm0, %v16884_v0  ;;  %16937 = vst [vmem:[#allocation22_spill] sm:$0xff] %v15948_v19 }
  0x42   :  { %14565 = vmatpush3.msra.mxu0 %v15847_v9  ;;  %14570 = vmatpush3.msra.mxu1 %v15837_v4 }
  0x43   :  { %14567 = vmatmul.mubr.f32.vlgmr.msra.gmra.mxu0 %v163_v10  ;;  %14571 = vmatprep.subr.mxu1 %v16884_v0 }
  0x44   :  { %14576 = vmatprep.subr.mxu0 %v16884_v0  ;;  %14572 = vmatpush3.msra.mxu1 %v15839_v5 }
  0x45   :  { %14573 = vmatprep.mubr.msk.f32.mxu1 %vm15755_vm0, %v16884_v0  ;;  %14577 = vmatpush3.msra.mxu0 %v15852_v11 }
  0x46   :  { %14574 = vmatmul.mubr.f32.vlgmr.msra.gmra.mxu1 %v164_v13  ;;  %14578 = vmatprep.subr.mxu0 %v16884_v0 }
  0x47   :  { %14583 = vmatprep.subr.mxu1 %v16884_v0  ;;  %14579 = vmatpush3.msra.mxu0 %v15855_v12 }
  0x48   :  { %14580 = vmatprep.mubr.msk.f32.mxu0 %vm15755_vm0, %v16884_v0  ;;  %14584 = vmatpush3.msra.mxu1 %v15837_v4 }
  0x49   :  { %14581 = vmatmul.mubr.f32.vlgmr.msra.gmra.mxu0 %v162_v7  ;;  %14585 = vmatprep.subr.mxu1 %v16884_v0 }
  0x4a   :  { %14586 = vmatpush3.msra.mxu1 %v15839_v5  ;;  %14587 = vmatprep.mubr.msk.f32.mxu1 %vm15755_vm0, %v16884_v0 }
  0x4b   :  { %14588 = vmatmul.mubr.f32.vlgmr.msra.gmra.mxu1 %v162_v7  ;;  %2065 = vperm.xlu0 %15638, %v88_v46  }
  0x4f   :  { %2073 = vrot.lane.b32.xlu0 %v16040_v54, %s15761_s26 }
  0xa6   :  { %v557_v22 = vpop.permute.xlu0 %556 }
  0xa7   :  { %v564_v23 = vsel %vm563_vm2, %v557_v22, 0 }
  0xa8   :  { %v15894_v24 = vand.u32 4294901760, %v564_v23 }
  0xaa   :  { %v15897_v25 = vsub.f32 %v564_v23, %v15894_v24  ;;  %14597 = vmatprep.mubr.f32.mxu1 %v15894_v24  ;;  %v559_v49 = vpop.permute.xlu0 %558 }
  0xab   :  { %v566_v50 = vsel %vm563_vm2, %v559_v49, 0 }
  0xac   :  { %v15901_v26 = vand.u32 4294901760, %v15897_v25  ;;  %v15912_v51 = vand.u32 4294901760, %v566_v50 }
  0xae   :  { %v640_v30 = vsub.f32 %v15897_v25, %v15901_v26  ;;  %v15915_v52 = vsub.f32 %v566_v50, %v15912_v51  ;;  %v1558_v10 = vpop.permute.xlu0 %1557 }
  0xaf   :  { %v1563_v21 = vsel %vm563_vm2, %v1558_v10, 0 }
  0xb0   :  { %v15905_v33 = vand.u32 4294901760, %v640_v30  ;;  %v15918_v53 = vand.u32 4294901760, %v15915_v52  ;;  %v1145_v30 = vsub.f32 %v15936_v2, %v15948_v19 }
  0xb2   :  { %14592 = vmatprep.mubr.f32.mxu0 %v15905_v33  ;;  %v650_v57 = vsub.f32 %v15915_v52, %v15918_v53 }
  0xb4   :  { %v15933_v1 = vand.u32 4294901760, %v650_v57 }
  0xff   :  { %v168_v27 = vpop.f32.mrf.mxu0  ;;  %v249_v29 = vpop.f32.mrf.mxu1 }
 0x100   :  { %v250_v31 = vadd.f32 %v249_v29, %v168_v27  ;;  %v15957_v29 = vand.u32 4294901760, %v1563_v21 }
 0x101   :  { %v14554_v28 = vpop.f32.mrf.mxu0  ;;  %v14561_v32 = vpop.f32.mrf.mxu1 }
 0x102   :  { %v1135_v28 = vsub.f32 %v15931_v62, %v15943_v15  ;;  %16939 = vst [vmem:[#allocation24_spill] sm:$0xff] %v15957_v29 }
 0x103   :  { %v325_v34 = vpop.f32.mrf.mxu0 }
 0x104   :  { %v326_v35 = vadd.f32 %v325_v34, %v250_v31 }
 0x105   :  { %v14568_v36 = vpop.f32.mrf.mxu0 }
 0x106   :  { %v400_v37 = vpop.f32.mrf.mxu1 }
 0x107   :  { %v401_v38 = vadd.f32 %v400_v37, %v326_v35  ;;  %v15967_v35 = vand.u32 4294901760, %v1135_v28  ;;  %v15973_v37 = vsub.f32 %v1563_v21, %v15957_v29 }
 0x108   :  { %v14575_v39 = vpop.f32.mrf.mxu1 }
 0x109   :  { %v477_v40 = vpop.f32.mrf.mxu0  ;;  %16941 = vst [vmem:[#allocation26_spill] sm:$0xff] %v15973_v37 }
 0x10a   :  { %v478_v41 = vadd.f32 %v477_v40, %v401_v38  ;;  %v15975_v38 = vand.u32 4294901760, %v1145_v30 }
 0x10b   :  { %v14582_v42 = vpop.f32.mrf.mxu0  ;;  %v550_v43 = vpop.f32.mrf.mxu1 }
 0x10c   :  { %v551_v44 = vadd.f32 %v550_v43, %v478_v41  ;;  %16942 = vst [vmem:[#allocation27_spill] sm:$0xff] %v15975_v38  ;;  %v15986_v42 = vand.u32 4294901760, %v15973_v37 }
 0x10d   :  { %v14589_v45 = vpop.f32.mrf.mxu1 }
 0x10e   :  { %561 = vrot.lane.b32.xlu1 %v551_v44, %s15758_s22  ;;  %v1064_v59 = vsel %vm568_vm3, %v551_v44, 0  ;;  %16944 = vst [vmem:[#allocation29_spill] sm:$0xff] %v15986_v42  ;;  %v1646_v45 = vsub.f32 %v15973_v37, %v15986_v42 }
 0x10f   :  { %v15938_v3 = vand.u32 4294901760, %v1064_v59 }
 0x110   :  { %v16006_v48 = vand.u32 4294901760, %v1646_v45 }
 0x111   :  { %v1184_v16 = vsub.f32 %v1064_v59, %v15938_v3 }
 0x112   :  { %1555 = vrot.lane.b32.xlu1 %v84_v20, %s15757_s21  ;;  %16946 = vst [vmem:[#allocation31_spill] sm:$0xff] %v16006_v48 }
 0x113   :  { %v1185_v31 = vand.u32 4294901760, %v1184_v16 }
 0x115   :  { %v1186_v39 = vsub.f32 %v1184_v16, %v1185_v31 }
 0x116   :  { %1559 = vrot.lane.b32.xlu1 %v551_v44, %s15759_s23 }
 0x117   :  { %v1187_v43 = vand.u32 4294901760, %v1186_v39 }
 0x11a   :  { %2060 = vperm.xlu1 %15639, %v87_v47  }
 0x180   :  { %v562_v60 = vpop.permute.xlu1 %561 }
 0x181   :  { %v569_v61 = vsel %vm568_vm3, %v562_v60, 0 }
 0x182   :  { %v602_v63 = vand.u32 4294901760, %v569_v61 }
 0x184   :  { %v689_v6 = vsub.f32 %v569_v61, %v602_v63  ;;  %14590 = vmatprep.subr.mxu0 %v602_v63  ;;  %v1556_v7 = vpop.permute.xlu1 %1555 }
 0x185   :  { %14591 = vmatpush3.msra.mxu0 %v602_v63  ;;  %v1561_v13 = vsel %vm563_vm2, %v1556_v7, 0 }
 0x186   :  { %14593 = vmatmul.mubr.f32.vlgmr.msra.gmra.mxu0 %v15933_v1  ;;  %14600 = vmatprep.subr.mxu0 %v689_v6  ;;  %v690_v14 = vand.u32 4294901760, %v689_v6  ;;  %v15951_v22 = vand.u32 4294901760, %v1561_v13 }
 0x187   :  { %14601 = vmatpush3.msra.mxu0 %v689_v6  ;;  %14602 = vmatprep.mubr.f32.mxu0 %v15897_v25 }
 0x188   :  { %14610 = vmatprep.subr.mxu0 %v690_v14  ;;  %v691_v20 = vsub.f32 %v689_v6, %v690_v14  ;;  %16938 = vst [vmem:[#allocation23_spill] sm:$0xff] %v15951_v22  ;;  %v1560_v23 = vpop.permute.xlu1 %1559  ;;  %v15964_v34 = vsub.f32 %v1561_v13, %v15951_v22 }
 0x189   :  { %v1565_v32 = vsel %vm568_vm3, %v1560_v23, 0 }
 0x18a   :  { %14603 = vmatmul.mubr.f32.vlgmr.msra.gmra.mxu0 %v15915_v52  ;;  %v692_v27 = vand.u32 4294901760, %v691_v20  ;;  %16940 = vst [vmem:[#allocation25_spill] sm:$0xff] %v15964_v34  ;;  %v15969_v36 = vand.u32 4294901760, %v1565_v32  ;;  %v15980_v40 = vand.u32 4294901760, %v15964_v34 }
 0x18b   :  { %14611 = vmatpush3.msra.mxu0 %v690_v14  ;;  %14612 = vmatprep.mubr.f32.mxu0 %v15894_v24 }
 0x18c   :  { %14620 = vmatprep.subr.mxu0 %v15938_v3  ;;  %14595 = vmatprep.subr.mxu1 %v692_v27  ;;  %16943 = vst [vmem:[#allocation28_spill] sm:$0xff] %v15980_v40  ;;  %v1685_v41 = vsub.f32 %v1565_v32, %v15969_v36  ;;  %v1636_v44 = vsub.f32 %v15964_v34, %v15980_v40 }
 0x18d   :  { %14596 = vmatpush3.msra.mxu1 %v692_v27 }
 0x18e   :  { %14598 = vmatmul.mubr.f32.vlgmr.msra.gmra.mxu1 %v15912_v51  ;;  %14605 = vmatprep.subr.mxu1 %v602_v63  ;;  %v1686_v46 = vand.u32 4294901760, %v1685_v41  ;;  %v16000_v47 = vand.u32 4294901760, %v1636_v44 }
 0x18f   :  { %14613 = vmatmul.mubr.f32.vlgmr.msra.gmra.mxu0 %v15912_v51  ;;  %14606 = vmatpush3.msra.mxu1 %v602_v63 }
 0x190   :  { %14621 = vmatpush3.msra.mxu0 %v15938_v3  ;;  %14607 = vmatprep.mubr.f32.mxu1 %v15901_v26  ;;  %16945 = vst [vmem:[#allocation30_spill] sm:$0xff] %v16000_v47  ;;  %v1687_v49 = vsub.f32 %v1685_v41, %v1686_v46 }
 0x191   :  { %14630 = vmatprep.subr.mxu0 %v1184_v16  ;;  %14615 = vmatprep.subr.mxu1 %v602_v63 }
 0x192   :  { %14622 = vmatprep.mubr.f32.mxu0 %v15967_v35  ;;  %14608 = vmatmul.mubr.f32.vlgmr.msra.gmra.mxu1 %v15918_v53  ;;  %v1688_v50 = vand.u32 4294901760, %v1687_v49 }
 0x193   :  { %14616 = vmatpush3.msra.mxu1 %v602_v63  ;;  %14623 = vmatmul.mubr.f32.vlgmr.msra.gmra.mxu0 %v15975_v38 }
 0x194   :  { %14631 = vmatpush3.msra.mxu0 %v1184_v16  ;;  %14617 = vmatprep.mubr.f32.mxu1 %v15894_v24 }
 0x195   :  { %14625 = vmatprep.subr.mxu1 %v1187_v43  ;;  %14640 = vmatprep.subr.mxu0 %v1185_v31 }
 0x196   :  { %14632 = vmatprep.mubr.f32.mxu0 %v15931_v62  ;;  %14618 = vmatmul.mubr.f32.vlgmr.msra.gmra.mxu1 %v15912_v51 }
 0x197   :  { %14626 = vmatpush3.msra.mxu1 %v1187_v43  ;;  %14633 = vmatmul.mubr.f32.vlgmr.msra.gmra.mxu0 %v15936_v2 }
 0x198   :  { %14641 = vmatpush3.msra.mxu0 %v1185_v31  ;;  %14635 = vmatprep.subr.mxu1 %v15938_v3 }
 0x199   :  { %14650 = vmatprep.subr.mxu0 %v15969_v36  ;;  %14627 = vmatprep.mubr.f32.mxu1 %v15922_v56 }
 0x19a   :  { %14642 = vmatprep.mubr.f32.mxu0 %v15922_v56  ;;  %14628 = vmatmul.mubr.f32.vlgmr.msra.gmra.mxu1 %v15926_v58 }
 0x19b   :  { %14636 = vmatpush3.msra.mxu1 %v15938_v3  ;;  %14643 = vmatmul.mubr.f32.vlgmr.msra.gmra.mxu0 %v15926_v58 }
 0x19c   :  { %14651 = vmatpush3.msra.mxu0 %v15969_v36  ;;  %14645 = vmatprep.subr.mxu1 %v15938_v3 }
 0x19d   :  { %14660 = vmatprep.subr.mxu0 %v1685_v41  ;;  %14652 = vmatprep.mubr.f32.mxu0 %v16000_v47 }
 0x19e   :  { %14637 = vmatprep.mubr.f32.mxu1 %v15943_v15 }
 0x19f   :  { %14638 = vmatmul.mubr.f32.vlgmr.msra.gmra.mxu1 %v15948_v19  ;;  %14653 = vmatmul.mubr.f32.vlgmr.msra.gmra.mxu0 %v16006_v48 }
 0x1a0   :  { %14646 = vmatpush3.msra.mxu1 %v15938_v3  ;;  %14661 = vmatpush3.msra.mxu0 %v1685_v41 }
 0x1a1   :  { %14655 = vmatprep.subr.mxu1 %v1688_v50  ;;  %14662 = vmatprep.mubr.f32.mxu0 %v15964_v34 }
 0x1a2   :  { %14670 = vmatprep.subr.mxu0 %v1686_v46  ;;  %14647 = vmatprep.mubr.f32.mxu1 %v15922_v56 }
 0x1a3   :  { %14648 = vmatmul.mubr.f32.vlgmr.msra.gmra.mxu1 %v15926_v58  ;;  %14663 = vmatmul.mubr.f32.vlgmr.msra.gmra.mxu0 %v15973_v37 }
 0x1a4   :  { %14656 = vmatpush3.msra.mxu1 %v1688_v50  ;;  %14671 = vmatpush3.msra.mxu0 %v1686_v46 }
 0x1a5   :  { %14657 = vmatprep.mubr.f32.mxu1 %v15951_v22  ;;  %14665 = vmatprep.subr.mxu1 %v15969_v36 }
 0x1a6   :  { %14672 = vmatprep.mubr.f32.mxu0 %v15951_v22  ;;  %14680 = vmatprep.subr.mxu0 %v16884_v0 }
 0x1a7   :  { %14658 = vmatmul.mubr.f32.vlgmr.msra.gmra.mxu1 %v15957_v29  ;;  %14673 = vmatmul.mubr.f32.vlgmr.msra.gmra.mxu0 %v15957_v29 }
 0x1a8   :  { %14666 = vmatpush3.msra.mxu1 %v15969_v36  ;;  %14667 = vmatprep.mubr.f32.mxu1 %v15980_v40 }
 0x1a9   :  { %14675 = vmatprep.subr.mxu1 %v15969_v36  ;;  %14684 = vmatprep.mubr.msk.f32.mxu0 %vm15755_vm0, %v16884_v0 }
 0x1ab   :  { %14668 = vmatmul.mubr.f32.vlgmr.msra.gmra.mxu1 %v15986_v42 }
 0x1ac   :  { %14676 = vmatpush3.msra.mxu1 %v15969_v36  ;;  %14677 = vmatprep.mubr.f32.mxu1 %v15951_v22 }
 0x1ad   :  { %14687 = vmatprep.subr.mxu1 %v16884_v0 }
 0x1af   :  { %14678 = vmatmul.mubr.f32.vlgmr.msra.gmra.mxu1 %v15957_v29 }
 0x1b0   :  { %14691 = vmatprep.mubr.msk.f32.mxu1 %vm15755_vm0, %v16884_v0 }
 0x246   :  { %v14594_v55 = vpop.f32.mrf.mxu0 }
 0x248   :  { %v643_v57 = vpop.f32.mrf.mxu0 }
 0x24a   :  { %v14604_v59 = vpop.f32.mrf.mxu0 }
 0x24c   :  { %v809_v60 = vpop.f32.mrf.mxu0 }
 0x24e   :  { %v14599_v61 = vpop.f32.mrf.mxu1 }
 0x24f   :  { %v736_v63 = vadd.f32 %v14599_v61, %v14594_v55  ;;  %v14614_v3 = vpop.f32.mrf.mxu0 }
 0x250   :  { %v729_v6 = vpop.f32.mrf.mxu1 }
 0x251   :  { %v730_v7 = vadd.f32 %v729_v6, %v643_v57  ;;  %v972_v10 = vpop.f32.mrf.mxu0  ;;  %v817_v13 = vadd.f32 %v14604_v59, %v736_v63 }
 0x252   :  { %v14609_v14 = vpop.f32.mrf.mxu1 }
 0x253   :  { %v899_v16 = vadd.f32 %v14609_v14, %v817_v13  ;;  %v14624_v20 = vpop.f32.mrf.mxu0  ;;  %v810_v21 = vadd.f32 %v809_v60, %v730_v7 }
 0x254   :  { %v890_v23 = vpop.f32.mrf.mxu1 }
 0x255   :  { %v891_v27 = vadd.f32 %v890_v23, %v810_v21  ;;  %v1138_v28 = vpop.f32.mrf.mxu0  ;;  %v979_v30 = vadd.f32 %v14614_v3, %v899_v16 }
 0x256   :  { %v14619_v31 = vpop.f32.mrf.mxu1 }
 0x257   :  { %v14634_v32 = vpop.f32.mrf.mxu0  ;;  %v973_v36 = vadd.f32 %v972_v10, %v891_v27  ;;  %v1057_v39 = vadd.f32 %v14619_v31, %v979_v30 }
 0x258   :  { %v1050_v41 = vpop.f32.mrf.mxu1 }
 0x259   :  { %v1304_v43 = vpop.f32.mrf.mxu0  ;;  %v1051_v44 = vadd.f32 %v1050_v41, %v973_v36  ;;  %v1149_v49 = vadd.f32 %v14624_v20, %v1057_v39 }
 0x25a   :  { %v14629_v45 = vpop.f32.mrf.mxu1 }
 0x25b   :  { %v14644_v46 = vpop.f32.mrf.mxu0  ;;  %v1139_v57 = vadd.f32 %v1138_v28, %v1051_v44  ;;  %v1231_v60 = vadd.f32 %v14629_v45, %v1149_v49 }
 0x25c   :  { %v1224_v50 = vpop.f32.mrf.mxu1 }
 0x25d   :  { %v1467_v55 = vpop.f32.mrf.mxu0  ;;  %v1225_v7 = vadd.f32 %v1224_v50, %v1139_v57  ;;  %v1312_v14 = vadd.f32 %v14634_v32, %v1231_v60 }
 0x25f   :  { %v14639_v59 = vpop.f32.mrf.mxu1  ;;  %v14654_v61 = vpop.f32.mrf.mxu0  ;;  %v1305_v16 = vadd.f32 %v1304_v43, %v1225_v7 }
 0x260   :  { %v1394_v27 = vadd.f32 %v14639_v59, %v1312_v14  ;;  %v16045_v14 = vpop.permute.xlu1 %2060 }
 0x261   :  { %v1385_v63 = vpop.f32.mrf.mxu1  ;;  %v1639_v6 = vpop.f32.mrf.mxu0 }
 0x262   :  { %v1386_v20 = vadd.f32 %v1385_v63, %v1305_v16  ;;  %v1474_v44 = vadd.f32 %v14644_v46, %v1394_v27 }
 0x263   :  { %v14649_v3 = vpop.f32.mrf.mxu1  ;;  %v14664_v13 = vpop.f32.mrf.mxu0 }
 0x264   :  { %v1468_v50 = vadd.f32 %v1467_v55, %v1386_v20  ;;  %v1552_v43 = vadd.f32 %v14649_v3, %v1474_v44 }
 0x265   :  { %v1545_v10 = vpop.f32.mrf.mxu1  ;;  %v1805_v21 = vpop.f32.mrf.mxu0 }
 0x266   :  { %v1546_v63 = vadd.f32 %v1545_v10, %v1468_v50  ;;  %v16948_v50 = vmov 0.0  }
 0x267   :  { %v14659_v23 = vpop.f32.mrf.mxu1  ;;  %v14674_v28 = vpop.f32.mrf.mxu0 }
 0x268   :  { %v1732_v30 = vadd.f32 %v14659_v23, %v14654_v61  ;;  %v16043_v61 = vpop.permute.xlu0 %2065 }
 0x269   :  { %v1725_v31 = vpop.f32.mrf.mxu1  ;;  %v1968_v32 = vpop.f32.mrf.mxu0 }
 0x26a   :  { %v1726_v36 = vadd.f32 %v1725_v31, %v1639_v6  ;;  %v1813_v39 = vadd.f32 %v14664_v13, %v1732_v30  ;;  %v2546_v30 = vsel %vm2082_vm4, %v16040_v54, 0 }
 0x26b   :  { %v14669_v41 = vpop.f32.mrf.mxu1 }
 0x26c   :  { %v1895_v45 = vadd.f32 %v14669_v41, %v1813_v39  ;;  %v1806_v49 = vadd.f32 %v1805_v21, %v1726_v36  ;;  %v2074_v3 = vpop.permute.xlu0 %2073 }
 0x26d   :  { %v1886_v0 = vpop.f32.mrf.mxu1  ;;  %v2083_v10 = vsel %vm2082_vm4, %v2074_v3, 0 }
 0x26e   :  { %v1887_v57 = vadd.f32 %v1886_v0, %v1806_v49  ;;  %v1975_v42 = vadd.f32 %v14674_v28, %v1895_v45  ;;  %v16058_v21 = vand.u32 4294901760, %v2083_v10  ;;  %v16071_v28 = vand.u32 4294901760, %v2546_v30 }
 0x26f   :  { %v14679_v60 = vpop.f32.mrf.mxu1 }
 0x270   :  { %v2053_v7 = vadd.f32 %v14679_v60, %v1975_v42  ;;  %v1969_v40 = vadd.f32 %v1968_v32, %v1887_v57  ;;  %v16061_v23 = vsub.f32 %v2083_v10, %v16058_v21  ;;  %16947 = vst [vmem:[#allocation32_spill] sm:$0xff] %v16071_v28 }
 0x271   :  { %v2046_v59 = vpop.f32.mrf.mxu1 }
 0x272   :  { %v2057_v6 = vadd.f32 %v2053_v7, %v1552_v43  ;;  %v2047_v13 = vadd.f32 %v2046_v59, %v1969_v40  ;;  %v89_v40 = vld [vmem:[%s16881_s5] sm:$0x3]  ;;  %v16064_v27 = vand.u32 4294901760, %v16061_v23  ;;  %s15763_s5 = smov [#allocation10]  }
 0x273   :  { %s14015_s29 = sshll.u32 %s15763_s5, 4  ;;  %s14016_s29 = int_to_ptr.vmem [resolvable:$true] %s14015_s29 }
 0x274   :  { %v2056_v46 = vadd.f32 %v2047_v13, %v1546_v63  ;;  %v2069_v16 = vadd.f32 %v16043_v61, %v2057_v6  ;;  %v2157_v20 = vsub.f32 %v16061_v23, %v16064_v27  ;;  %s15720_s30 = scalar_lea.vmem %s14016_s29, 32  ;;  %p15725_p7 = scmp.lt.s32.totalorder %s14016_s29, %s14016_s29 }
 0x275   :  { %p15721_p6 = scmp.ne.s32.totalorder %s14016_s29, %s15720_s30  ;;  %p15726_p8 = scmp.lt.s32.totalorder %s15720_s30, %s15720_s30 }
 0x276   :  { %v2068_v55 = vadd.f32 %v16045_v14, %v2056_v46  ;;  %v2071_v0 = vmax.f32 %v2069_v16, 0.0  ;;  %v16073_v45 = vand.u32 4294901760, %v2157_v20 }
 0x277   :  { %p15727_p9 = por %p15726_p8, %p15725_p7 }
 0x278   :  { %3013 = vrot.lane.b32.xlu0 %v2071_v0, %s15759_s23  ;;  %2079 = vrot.lane.b32.xlu1 %v2071_v0, %s15758_s22  ;;  %v2070_v42 = vmax.f32 %v2068_v55, 0.0  ;;  %v2548_v7 = vsel %vm568_vm3, %v2071_v0, 0 }
 0x279   :  { %v16089_v13 = vand.u32 4294901760, %v2548_v7  ;;  %p15728_p10 = pnand %p15727_p9, %p15721_p6 }
 0x27a   :  { %v16095_v16 = vand.u32 4294901760, %v2070_v42 }
 0x27b   :  { %v2657_v0 = vsub.f32 %v2548_v7, %v16089_v13 }
 0x27c   :  { %3011 = vrot.lane.b32.xlu0 %v2070_v42, %s15759_s23  ;;  %2077 = vrot.lane.b32.xlu1 %v2070_v42, %s15758_s22  ;;  %v2664_v10 = vsub.f32 %v2070_v42, %v16095_v16 }
 0x27e   :  { %v2665_v42 = vand.u32 4294901760, %v2664_v10 }
 0x280   :  { %3009 = vrot.lane.b32.xlu1 %v16040_v54, %s15762_s3  ;;  %v16077_v54 = vsub.f32 %v2546_v30, %v16071_v28 }
 0x282   :  { %v16086_v6 = vand.u32 4294901760, %v16077_v54 }
 0x284   :  { %3482 = vperm.xlu1 %15639, %v89_v40   ;;  %16949 = vst [vmem:[#allocation33_spill] sm:$0xff] %v16086_v6  ;;  %v2620_v55 = vsub.f32 %v16077_v54, %v16086_v6 }
 0x286   :  { %v16109_v30 = vand.u32 4294901760, %v2620_v55 }
 0x2ea   :  { %v2080_v31 = vpop.permute.xlu1 %2079 }
 0x2eb   :  { %v2085_v36 = vsel %vm568_vm3, %v2080_v31, 0  ;;  %v2658_v31 = vand.u32 4294901760, %v2657_v0 }
 0x2ec   :  { %v2116_v39 = vand.u32 4294901760, %v2085_v36 }
 0x2ee   :  { %v2194_v41 = vsub.f32 %v2085_v36, %v2116_v39  ;;  %14681 = vmatpush3.msra.mxu0 %v2116_v39  ;;  %v2078_v44 = vpop.permute.xlu1 %2077  ;;  %v3014_v36 = vpop.permute.xlu0 %3013 }
 0x2ef   :  { %v2119_v49 = vand.u32 4294901760, %v2078_v44  ;;  %14682 = vmatprep.subr.mxu0 %v16948_v50 }
 0x2f0   :  { %v2195_v57 = vand.u32 4294901760, %v2194_v41 }
 0x2f1   :  { %v2201_v32 = vsub.f32 %v2078_v44, %v2119_v49  ;;  %14683 = vmatpush3.msra.mxu0 %v2119_v49 }
 0x2f2   :  { %v2196_v60 = vsub.f32 %v2194_v41, %v2195_v57  ;;  %14685 = vmatmul.mubr.f32.vlgmr.msra.gmra.mxu0 %v16073_v45  ;;  %14694 = vmatprep.subr.mxu0 %v16948_v50  ;;  %v3010_v40 = vpop.permute.xlu1 %3009 }
 0x2f3   :  { %v2202_v43 = vand.u32 4294901760, %v2201_v32  ;;  %14695 = vmatpush3.msra.mxu0 %v2194_v41  ;;  %14698 = vmatprep.mubr.msk.f32.mxu0 %vm15755_vm0, %v16948_v50  ;;  %v3016_v3 = vsel %vm2082_vm4, %v3010_v40, 0  ;;  %v2659_v41 = vsub.f32 %v2657_v0, %v2658_v31 }
 0x2f4   :  { %v2197_v59 = vand.u32 4294901760, %v2196_v60  ;;  %14696 = vmatprep.subr.mxu0 %v16948_v50  ;;  %v16112_v20 = vand.u32 4294901760, %v3016_v3  ;;  %v3012_v60 = vpop.permute.xlu0 %3011 }
 0x2f5   :  { %v2203_v63 = vsub.f32 %v2201_v32, %v2202_v43  ;;  %14697 = vmatpush3.msra.mxu0 %v2201_v32  ;;  %v3018_v32 = vsel %vm568_vm3, %v3014_v36, 0 }
 0x2f6   :  { %14688 = vmatpush3.msra.mxu1 %v2197_v59  ;;  %14699 = vmatmul.mubr.f32.vlgmr.msra.gmra.mxu0 %v16061_v23  ;;  %16950 = vst [vmem:[#allocation34_spill] sm:$0xff] %v16112_v20  ;;  %v16124_v44 = vsub.f32 %v3016_v3, %v16112_v20  ;;  %v16143_v59 = vand.u32 4294901760, %v3012_v60 }
 0x2f7   :  { %v2204_v46 = vand.u32 4294901760, %v2203_v63  ;;  %14708 = vmatprep.subr.mxu0 %v16948_v50  ;;  %14689 = vmatprep.subr.mxu1 %v16948_v50 }
 0x2f8   :  { %14709 = vmatpush3.msra.mxu0 %v2195_v57  ;;  %14712 = vmatprep.mubr.msk.f32.mxu0 %vm15755_vm0, %v16948_v50  ;;  %16951 = vst [vmem:[#allocation35_spill] sm:$0xff] %v16124_v44  ;;  %v2666_v57 = vsub.f32 %v2664_v10, %v2665_v42  ;;  %v3134_v55 = vsub.f32 %v3012_v60, %v16143_v59 }
 0x2f9   :  { %14710 = vmatprep.subr.mxu0 %v16948_v50  ;;  %14690 = vmatpush3.msra.mxu1 %v2204_v46 }
 0x2fa   :  { %14711 = vmatpush3.msra.mxu0 %v2202_v43  ;;  %14692 = vmatmul.mubr.f32.vlgmr.msra.gmra.mxu1 %v16058_v21  ;;  %v16135_v43 = vand.u32 4294901760, %v16124_v44  ;;  %v2667_v7 = vand.u32 4294901760, %v2666_v57  ;;  %v3135_v3 = vand.u32 4294901760, %v3134_v55 }
 0x2fb   :  { %14701 = vmatprep.subr.mxu1 %v16948_v50  ;;  %14713 = vmatmul.mubr.f32.vlgmr.msra.gmra.mxu0 %v16058_v21 }
 0x2fc   :  { %14722 = vmatprep.subr.mxu0 %v16948_v50  ;;  %14702 = vmatpush3.msra.mxu1 %v2116_v39  ;;  %16952 = vst [vmem:[#allocation36_spill] sm:$0xff] %v16135_v43  ;;  %v3090_v63 = vsub.f32 %v16124_v44, %v16135_v43 }
 0x2fd   :  { %14723 = vmatpush3.msra.mxu0 %v16089_v13  ;;  %14703 = vmatprep.subr.mxu1 %v16948_v50 }
 0x2fe   :  { %14724 = vmatprep.subr.mxu0 %v16948_v50  ;;  %14704 = vmatpush3.msra.mxu1 %v2119_v49 }
 0x2ff   :  { %14705 = vmatprep.mubr.msk.f32.mxu1 %vm15755_vm0, %v16948_v50  ;;  %14725 = vmatpush3.msra.mxu0 %v16095_v16 }
 0x300   :  { %14726 = vmatprep.mubr.msk.f32.mxu0 %vm15755_vm0, %v16948_v50  ;;  %14706 = vmatmul.mubr.f32.vlgmr.msra.gmra.mxu1 %v16064_v27 }
 0x301   :  { %14715 = vmatprep.subr.mxu1 %v16948_v50  ;;  %14727 = vmatmul.mubr.f32.vlgmr.msra.gmra.mxu0 %v16109_v30 }
 0x302   :  { %14736 = vmatprep.subr.mxu0 %v16948_v50  ;;  %14716 = vmatpush3.msra.mxu1 %v2116_v39  ;;  %v2660_v39 = vand.u32 4294901760, %v2659_v41 }
 0x303   :  { %14737 = vmatpush3.msra.mxu0 %v2657_v0  ;;  %14717 = vmatprep.subr.mxu1 %v16948_v50  ;;  %v16161_v0 = vand.u32 4294901760, %v3090_v63 }
 0x304   :  { %14738 = vmatprep.subr.mxu0 %v16948_v50  ;;  %14718 = vmatpush3.msra.mxu1 %v2119_v49  ;;  %v16139_v49 = vand.u32 4294901760, %v3018_v32 }
 0x305   :  { %14719 = vmatprep.mubr.msk.f32.mxu1 %vm15755_vm0, %v16948_v50  ;;  %14739 = vmatpush3.msra.mxu0 %v2664_v10  ;;  %16953 = vst [vmem:[#allocation37_spill] sm:$0xff] %v16161_v0 }
 0x306   :  { %14740 = vmatprep.mubr.msk.f32.mxu0 %vm15755_vm0, %v16948_v50  ;;  %14720 = vmatmul.mubr.f32.vlgmr.msra.gmra.mxu1 %v16058_v21  ;;  %v3127_v46 = vsub.f32 %v3018_v32, %v16139_v49 }
 0x307   :  { %14729 = vmatprep.subr.mxu1 %v16948_v50  ;;  %14741 = vmatmul.mubr.f32.vlgmr.msra.gmra.mxu0 %v16077_v54 }
 0x308   :  { %14750 = vmatprep.subr.mxu0 %v16948_v50  ;;  %14730 = vmatpush3.msra.mxu1 %v2660_v39  ;;  %v3128_v40 = vand.u32 4294901760, %v3127_v46 }
 0x309   :  { %14751 = vmatpush3.msra.mxu0 %v2658_v31  ;;  %14731 = vmatprep.subr.mxu1 %v16948_v50  ;;  %v3136_v31 = vsub.f32 %v3134_v55, %v3135_v3 }
 0x30a   :  { %14752 = vmatprep.subr.mxu0 %v16948_v50  ;;  %14732 = vmatpush3.msra.mxu1 %v2667_v7  ;;  %v3129_v10 = vsub.f32 %v3127_v46, %v3128_v40 }
 0x30b   :  { %14733 = vmatprep.mubr.msk.f32.mxu1 %vm15755_vm0, %v16948_v50  ;;  %14753 = vmatpush3.msra.mxu0 %v2665_v42 }
 0x30c   :  { %14754 = vmatprep.mubr.msk.f32.mxu0 %vm15755_vm0, %v16948_v50  ;;  %14734 = vmatmul.mubr.f32.vlgmr.msra.gmra.mxu1 %v16071_v28  ;;  %v3130_v42 = vand.u32 4294901760, %v3129_v10 }
 0x30d   :  { %14743 = vmatprep.subr.mxu1 %v16948_v50  ;;  %14755 = vmatmul.mubr.f32.vlgmr.msra.gmra.mxu0 %v16071_v28 }
 0x30e   :  { %14764 = vmatprep.subr.mxu0 %v16948_v50  ;;  %14744 = vmatpush3.msra.mxu1 %v16089_v13 }
 0x30f   :  { %14765 = vmatpush3.msra.mxu0 %v16139_v49  ;;  %14745 = vmatprep.subr.mxu1 %v16948_v50 }
 0x310   :  { %14766 = vmatprep.subr.mxu0 %v16948_v50  ;;  %14746 = vmatpush3.msra.mxu1 %v16095_v16 }
 0x311   :  { %14747 = vmatprep.mubr.msk.f32.mxu1 %vm15755_vm0, %v16948_v50  ;;  %14767 = vmatpush3.msra.mxu0 %v16143_v59 }
 0x312   :  { %14768 = vmatprep.mubr.msk.f32.mxu0 %vm15755_vm0, %v16948_v50  ;;  %14748 = vmatmul.mubr.f32.vlgmr.msra.gmra.mxu1 %v16086_v6 }
 0x313   :  { %14757 = vmatprep.subr.mxu1 %v16948_v50  ;;  %14769 = vmatmul.mubr.f32.vlgmr.msra.gmra.mxu0 %v16161_v0 }
 0x314   :  { %14778 = vmatprep.subr.mxu0 %v16948_v50  ;;  %14758 = vmatpush3.msra.mxu1 %v16089_v13  ;;  %v3137_v13 = vand.u32 4294901760, %v3136_v31 }
 0x315   :  { %14779 = vmatpush3.msra.mxu0 %v3127_v46  ;;  %14759 = vmatprep.subr.mxu1 %v16948_v50 }
 0x316   :  { %14780 = vmatprep.subr.mxu0 %v16948_v50  ;;  %14760 = vmatpush3.msra.mxu1 %v16095_v16 }
 0x317   :  { %14761 = vmatprep.mubr.msk.f32.mxu1 %vm15755_vm0, %v16948_v50  ;;  %14781 = vmatpush3.msra.mxu0 %v3134_v55 }
 0x318   :  { %14782 = vmatprep.mubr.msk.f32.mxu0 %vm15755_vm0, %v16948_v50  ;;  %14762 = vmatmul.mubr.f32.vlgmr.msra.gmra.mxu1 %v16071_v28 }
 0x319   :  { %14771 = vmatprep.subr.mxu1 %v16948_v50  ;;  %14783 = vmatmul.mubr.f32.vlgmr.msra.gmra.mxu0 %v16124_v44 }
 0x31a   :  { %14792 = vmatprep.subr.mxu0 %v16948_v50  ;;  %14772 = vmatpush3.msra.mxu1 %v3130_v42 }
 0x31b   :  { %14793 = vmatpush3.msra.mxu0 %v3128_v40  ;;  %14773 = vmatprep.subr.mxu1 %v16948_v50 }
 0x31c   :  { %14794 = vmatprep.subr.mxu0 %v16948_v50  ;;  %14774 = vmatpush3.msra.mxu1 %v3137_v13 }
 0x31d   :  { %14775 = vmatprep.mubr.msk.f32.mxu1 %vm15755_vm0, %v16948_v50  ;;  %14795 = vmatpush3.msra.mxu0 %v3135_v3 }
 0x31e   :  { %14796 = vmatprep.mubr.msk.f32.mxu0 %vm15755_vm0, %v16948_v50  ;;  %14776 = vmatmul.mubr.f32.vlgmr.msra.gmra.mxu1 %v16112_v20 }
 0x31f   :  { %14785 = vmatprep.subr.mxu1 %v16948_v50  ;;  %14797 = vmatmul.mubr.f32.vlgmr.msra.gmra.mxu0 %v16112_v20 }
 0x320   :  { %14786 = vmatpush3.msra.mxu1 %v16139_v49  ;;  %14789 = vmatprep.mubr.msk.f32.mxu1 %vm15755_vm0, %v16948_v50 }
 0x321   :  { %14787 = vmatprep.subr.mxu1 %v16948_v50  ;;  %14806 = vmatprep.subr.mxu0 %v16948_v50 }
 0x322   :  { %14788 = vmatpush3.msra.mxu1 %v16143_v59  ;;  %14807 = vmatpush3.msra.mxu0 %v15837_v4 }
 0x323   :  { %14790 = vmatmul.mubr.f32.vlgmr.msra.gmra.mxu1 %v16135_v43  ;;  %14799 = vmatprep.subr.mxu1 %v16948_v50 }
 0x324   :  { %14800 = vmatpush3.msra.mxu1 %v16139_v49  ;;  %14803 = vmatprep.mubr.msk.f32.mxu1 %vm15755_vm0, %v16948_v50 }
 0x325   :  { %14801 = vmatprep.subr.mxu1 %v16948_v50  ;;  %14808 = vmatprep.subr.mxu0 %v16948_v50 }
 0x326   :  { %14802 = vmatpush3.msra.mxu1 %v16143_v59  ;;  %14809 = vmatpush3.msra.mxu0 %v15839_v5 }
 0x327   :  { %14804 = vmatmul.mubr.f32.vlgmr.msra.gmra.mxu1 %v16112_v20  ;;  %14813 = vmatprep.subr.mxu1 %v16948_v50 }
 0x328   :  { %14814 = vmatpush3.msra.mxu1 %v15862_v17  ;;  %14817 = vmatprep.mubr.msk.f32.mxu1 %vm15755_vm0, %v16948_v50 }
 0x329   :  { %14815 = vmatprep.subr.mxu1 %v16948_v50  ;;  %14810 = vmatprep.mubr.msk.f32.mxu0 %vm15755_vm0, %v16948_v50 }
 0x32a   :  { %14816 = vmatpush3.msra.mxu1 %v15864_v18  ;;  %14820 = vmatprep.subr.mxu0 %v16948_v50 }
 0x32b   :  { %14827 = vmatprep.subr.mxu1 %v16948_v50 }
 0x3b2   :  { %v2160_v16 = vpop.f32.mrf.mxu0 }
 0x3b4   :  { %v14686_v36 = vpop.f32.mrf.mxu0 }
 0x3b6   :  { %v2317_v41 = vpop.f32.mrf.mxu0 }
 0x3b8   :  { %v14700_v57 = vpop.f32.mrf.mxu0 }
 0x3ba   :  { %v2241_v32 = vpop.f32.mrf.mxu1 }
 0x3bb   :  { %v2469_v39 = vpop.f32.mrf.mxu0  ;;  %v2242_v7 = vadd.f32 %v2241_v32, %v2160_v16 }
 0x3bc   :  { %v14693_v60 = vpop.f32.mrf.mxu1 }
 0x3bd   :  { %v14714_v49 = vpop.f32.mrf.mxu0  ;;  %v2318_v40 = vadd.f32 %v2317_v41, %v2242_v7 }
 0x3c0   :  { %v2392_v59 = vpop.f32.mrf.mxu1 }
 0x3c1   :  { %v2623_v63 = vpop.f32.mrf.mxu0  ;;  %v2393_v31 = vadd.f32 %v2392_v59, %v2318_v40 }
 0x3c2   :  { %v14707_v46 = vpop.f32.mrf.mxu1 }
 0x3c3   :  { %v14728_v55 = vpop.f32.mrf.mxu0  ;;  %v2470_v18 = vadd.f32 %v2469_v39, %v2393_v31 }
 0x3c6   :  { %v2542_v3 = vpop.f32.mrf.mxu1 }
 0x3c7   :  { %v2780_v10 = vpop.f32.mrf.mxu0  ;;  %v2543_v20 = vadd.f32 %v2542_v3, %v2470_v18 }
 0x3c8   :  { %v14721_v42 = vpop.f32.mrf.mxu1 }
 0x3c9   :  { %v14742_v13 = vpop.f32.mrf.mxu0  ;;  %v2624_v49 = vadd.f32 %v2623_v63, %v2543_v20 }
 0x3cc   :  { %v2704_v17 = vpop.f32.mrf.mxu1 }
 0x3cd   :  { %v2932_v36 = vpop.f32.mrf.mxu0  ;;  %v2705_v0 = vadd.f32 %v2704_v17, %v2624_v49 }
 0x3ce   :  { %v14735_v43 = vpop.f32.mrf.mxu1 }
 0x3cf   :  { %v14756_v57 = vpop.f32.mrf.mxu0  ;;  %v2781_v6 = vadd.f32 %v2780_v10, %v2705_v0 }
 0x3d2   :  { %v2855_v44 = vpop.f32.mrf.mxu1 }
 0x3d3   :  { %v3093_v60 = vpop.f32.mrf.mxu0  ;;  %v2856_v39 = vadd.f32 %v2855_v44, %v2781_v6 }
 0x3d4   :  { %v14749_v16 = vpop.f32.mrf.mxu1 }
 0x3d5   :  { %v14770_v32 = vpop.f32.mrf.mxu0  ;;  %v2933_v18 = vadd.f32 %v2932_v36, %v2856_v39 }
 0x3d8   :  { %v3005_v46 = vpop.f32.mrf.mxu1 }
 0x3d9   :  { %v3250_v55 = vpop.f32.mrf.mxu0  ;;  %v3006_v16 = vadd.f32 %v3005_v46, %v2933_v18 }
 0x3da   :  { %v14763_v41 = vpop.f32.mrf.mxu1 }
 0x3db   :  { %v14784_v7 = vpop.f32.mrf.mxu0  ;;  %v16222_v41 = vpop.permute.xlu1 %3482 }
 0x3de   :  { %v3174_v59 = vpop.f32.mrf.mxu1 }
 0x3df   :  { %v3175_v40 = vadd.f32 %v3174_v59, %v3093_v60  ;;  %v3402_v42 = vpop.f32.mrf.mxu0 }
 0x3e0   :  { %v14777_v31 = vpop.f32.mrf.mxu1 }
 0x3e1   :  { %v14798_v13 = vpop.f32.mrf.mxu0  ;;  %v3251_v43 = vadd.f32 %v3250_v55, %v3175_v40 }
 0x3e3   :  { %v3325_v57 = vpop.f32.mrf.mxu1 }
 0x3e4   :  { %v3326_v3 = vadd.f32 %v3325_v57, %v3251_v43 }
 0x3e5   :  { %v14791_v28 = vpop.f32.mrf.mxu1 }
 0x3e6   :  { %v3403_v20 = vadd.f32 %v3402_v42, %v3326_v3 }
 0x3e7   :  { %v3475_v63 = vpop.f32.mrf.mxu1 }
 0x3e8   :  { %v3476_v17 = vadd.f32 %v3475_v63, %v3403_v20 }
 0x3e9   :  { %v14805_v49 = vpop.f32.mrf.mxu1 }
 0x3ea   :  { %v3479_v32 = vadd.f32 %v3476_v17, %v3006_v16 }
 0x3ec   :  { %v3485_v0 = vadd.f32 %v16222_v41, %v3479_v32 }
 0x3ee   :  { %v3486_v10 = vmax.f32 %v3485_v0, 0.0 }
 0x3f0   :  { %3488 = vrot.lane.b32.xlu0 %v3486_v10, %s15758_s22 }
 0x462   :  { %v3489_v6 = vpop.permute.xlu0 %3488 }
 0x463   :  { %v3491_v44 = vadd.f32 %v3489_v6, %v3486_v10 }
 0x465   :  { %v3492_v60 = vmul.f32 0.5, %v3491_v44 }
 0x467   :  { %v3494_v36 = vsel %vm91_vm1, %v3492_v60, 0 }
 0x468   :  { %v3563_v55 = vand.u32 4294901760, %v3494_v36 }
 0x46a   :  { %v3564_v28 = vsub.f32 %v3494_v36, %v3563_v55  ;;  %14818 = vmatmul.mubr.f32.vlgmr.msra.gmra.mxu1 %v3563_v55 }
 0x46b   :  { %14828 = vmatpush3.msra.mxu1 %v15837_v4  ;;  %14831 = vmatprep.mubr.msk.f32.mxu1 %vm15755_vm0, %v16948_v50 }
 0x46c   :  { %14829 = vmatprep.subr.mxu1 %v16948_v50  ;;  %v3565_v46 = vand.u32 4294901760, %v3564_v28 }
 0x46d   :  { %14830 = vmatpush3.msra.mxu1 %v15839_v5 }
 0x46e   :  { %14832 = vmatmul.mubr.f32.vlgmr.msra.gmra.mxu1 %v3565_v46  ;;  %14841 = vmatprep.subr.mxu1 %v16948_v50  ;;  %v3566_v7 = vsub.f32 %v3564_v28, %v3565_v46 }
 0x46f   :  { %14842 = vmatpush3.msra.mxu1 %v15837_v4  ;;  %14845 = vmatprep.mubr.msk.f32.mxu1 %vm15755_vm0, %v16948_v50 }
 0x470   :  { %14843 = vmatprep.subr.mxu1 %v16948_v50  ;;  %v3567_v59 = vand.u32 4294901760, %v3566_v7 }
 0x471   :  { %14844 = vmatpush3.msra.mxu1 %v15839_v5 }
 0x472   :  { %14811 = vmatmul.mubr.f32.vlgmr.msra.gmra.mxu0 %v3567_v59  ;;  %14846 = vmatmul.mubr.f32.vlgmr.msra.gmra.mxu1 %v3563_v55 }
 0x473   :  { %14821 = vmatpush3.msra.mxu0 %v15844_v8  ;;  %14855 = vmatprep.mubr.f32.mxu1 %v15894_v24 }
 0x474   :  { %14822 = vmatprep.subr.mxu0 %v16948_v50  ;;  %14824 = vmatprep.mubr.msk.f32.mxu0 %vm15755_vm0, %v16948_v50 }
 0x475   :  { %14823 = vmatpush3.msra.mxu0 %v15847_v9 }
 0x476   :  { %14825 = vmatmul.mubr.f32.vlgmr.msra.gmra.mxu0 %v3564_v28  ;;  %14834 = vmatprep.subr.mxu0 %v16948_v50 }
 0x477   :  { %14835 = vmatpush3.msra.mxu0 %v15852_v11  ;;  %14838 = vmatprep.mubr.msk.f32.mxu0 %vm15755_vm0, %v16948_v50 }
 0x478   :  { %14836 = vmatprep.subr.mxu0 %v16948_v50 }
 0x479   :  { %14837 = vmatpush3.msra.mxu0 %v15855_v12 }
 0x47a   :  { %14839 = vmatmul.mubr.f32.vlgmr.msra.gmra.mxu0 %v3563_v55 }
 0x47b   :  { %14850 = vmatprep.mubr.f32.mxu0 %v15905_v33 }
 0x52a   :  { %v3650_v40 = vpop.f32.mrf.mxu1 }
 0x52c   :  { %v14819_v42 = vpop.f32.mrf.mxu1 }
 0x52e   :  { %v3801_v39 = vpop.f32.mrf.mxu1 }
 0x530   :  { %v14833_v31 = vpop.f32.mrf.mxu1 }
 0x532   :  { %v3569_v13 = vpop.f32.mrf.mxu0  ;;  %v3951_v43 = vpop.f32.mrf.mxu1 }
 0x533   :  { %v3651_v3 = vadd.f32 %v3650_v40, %v3569_v13 }
 0x534   :  { %v14812_v57 = vpop.f32.mrf.mxu0  ;;  %v14847_v18 = vpop.f32.mrf.mxu1 }
 0x536   :  { %v3726_v20 = vpop.f32.mrf.mxu0 }
 0x537   :  { %v3727_v63 = vadd.f32 %v3726_v20, %v3651_v3 }
 0x538   :  { %v14826_v16 = vpop.f32.mrf.mxu0 }
 0x539   :  { %v3802_v17 = vadd.f32 %v3801_v39, %v3727_v63  ;;  %v16954_v16 = vld [vmem:[#allocation28_spill] sm:$0xff] }
 0x53a   :  { %v3878_v49 = vpop.f32.mrf.mxu0 }
 0x53b   :  { %v3879_v32 = vadd.f32 %v3878_v49, %v3802_v17  ;;  %v16955_v17 = vld [vmem:[#allocation29_spill] sm:$0xff] }
 0x53c   :  { %v14840_v0 = vpop.f32.mrf.mxu0 }
 0x53d   :  { %v3952_v10 = vadd.f32 %v3951_v43, %v3879_v32 }
 0x53f   :  { %4940 = vrot.lane.b32.xlu0 %v3952_v10, %s15759_s23  ;;  %3956 = vrot.lane.b32.xlu1 %v3952_v10, %s15758_s22  ;;  %v4449_v6 = vsel %vm568_vm3, %v3952_v10, 0 }
 0x540   :  { %v16255_v55 = vand.u32 4294901760, %v4449_v6 }
 0x542   :  { %v4569_v7 = vsub.f32 %v4449_v6, %v16255_v55 }
 0x544   :  { %v4570_v39 = vand.u32 4294901760, %v4569_v7 }
 0x546   :  { %v4571_v43 = vsub.f32 %v4569_v7, %v4570_v39 }
 0x548   :  { %v4572_v18 = vand.u32 4294901760, %v4571_v43 }
 0x5b1   :  { %v3957_v44 = vpop.permute.xlu1 %3956  ;;  %v4941_v40 = vpop.permute.xlu0 %4940 }
 0x5b2   :  { %v3958_v60 = vsel %vm568_vm3, %v3957_v44, 0  ;;  %v4942_v31 = vsel %vm568_vm3, %v4941_v40, 0 }
 0x5b3   :  { %v3991_v36 = vand.u32 4294901760, %v3958_v60  ;;  %v4975_v13 = vand.u32 4294901760, %v4942_v31 }
 0x5b5   :  { %v4078_v28 = vsub.f32 %v3958_v60, %v3991_v36  ;;  %14848 = vmatprep.subr.mxu0 %v3991_v36  ;;  %v5062_v57 = vsub.f32 %v4942_v31, %v4975_v13 }
 0x5b6   :  { %14849 = vmatpush3.msra.mxu0 %v3991_v36 }
 0x5b7   :  { %14851 = vmatmul.mubr.f32.vlgmr.msra.gmra.mxu0 %v15933_v1  ;;  %14858 = vmatprep.subr.mxu0 %v4078_v28  ;;  %v4079_v46 = vand.u32 4294901760, %v4078_v28  ;;  %v5063_v3 = vand.u32 4294901760, %v5062_v57 }
 0x5b8   :  { %14859 = vmatpush3.msra.mxu0 %v4078_v28  ;;  %14860 = vmatprep.mubr.f32.mxu0 %v15897_v25 }
 0x5b9   :  { %14868 = vmatprep.subr.mxu0 %v4079_v46  ;;  %v4080_v59 = vsub.f32 %v4078_v28, %v4079_v46  ;;  %v5064_v20 = vsub.f32 %v5062_v57, %v5063_v3 }
 0x5bb   :  { %14861 = vmatmul.mubr.f32.vlgmr.msra.gmra.mxu0 %v15915_v52  ;;  %v4081_v42 = vand.u32 4294901760, %v4080_v59  ;;  %v5065_v63 = vand.u32 4294901760, %v5064_v20 }
 0x5bc   :  { %14869 = vmatpush3.msra.mxu0 %v4079_v46  ;;  %14870 = vmatprep.mubr.f32.mxu0 %v15894_v24 }
 0x5bd   :  { %14878 = vmatprep.subr.mxu0 %v16255_v55  ;;  %14853 = vmatprep.subr.mxu1 %v4081_v42 }
 0x5be   :  { %14854 = vmatpush3.msra.mxu1 %v4081_v42 }
 0x5bf   :  { %14856 = vmatmul.mubr.f32.vlgmr.msra.gmra.mxu1 %v15912_v51  ;;  %14863 = vmatprep.subr.mxu1 %v3991_v36 }
 0x5c0   :  { %14871 = vmatmul.mubr.f32.vlgmr.msra.gmra.mxu0 %v15912_v51  ;;  %14864 = vmatpush3.msra.mxu1 %v3991_v36 }
 0x5c1   :  { %14879 = vmatpush3.msra.mxu0 %v16255_v55  ;;  %14865 = vmatprep.mubr.f32.mxu1 %v15901_v26 }
 0x5c2   :  { %14888 = vmatprep.subr.mxu0 %v4569_v7  ;;  %14873 = vmatprep.subr.mxu1 %v3991_v36 }
 0x5c3   :  { %14880 = vmatprep.mubr.f32.mxu0 %v15967_v35  ;;  %14866 = vmatmul.mubr.f32.vlgmr.msra.gmra.mxu1 %v15918_v53 }
 0x5c4   :  { %14874 = vmatpush3.msra.mxu1 %v3991_v36  ;;  %14881 = vmatmul.mubr.f32.vlgmr.msra.gmra.mxu0 %v15975_v38 }
 0x5c5   :  { %14889 = vmatpush3.msra.mxu0 %v4569_v7  ;;  %14875 = vmatprep.mubr.f32.mxu1 %v15894_v24 }
 0x5c6   :  { %14883 = vmatprep.subr.mxu1 %v4572_v18  ;;  %14898 = vmatprep.subr.mxu0 %v4570_v39 }
 0x5c7   :  { %14890 = vmatprep.mubr.f32.mxu0 %v15931_v62  ;;  %14876 = vmatmul.mubr.f32.vlgmr.msra.gmra.mxu1 %v15912_v51 }
 0x5c8   :  { %14884 = vmatpush3.msra.mxu1 %v4572_v18  ;;  %14891 = vmatmul.mubr.f32.vlgmr.msra.gmra.mxu0 %v15936_v2 }
 0x5c9   :  { %14899 = vmatpush3.msra.mxu0 %v4570_v39  ;;  %14893 = vmatprep.subr.mxu1 %v16255_v55 }
 0x5ca   :  { %14908 = vmatprep.subr.mxu0 %v4975_v13  ;;  %14885 = vmatprep.mubr.f32.mxu1 %v15922_v56 }
 0x5cb   :  { %14900 = vmatprep.mubr.f32.mxu0 %v15922_v56  ;;  %14886 = vmatmul.mubr.f32.vlgmr.msra.gmra.mxu1 %v15926_v58 }
 0x5cc   :  { %14894 = vmatpush3.msra.mxu1 %v16255_v55  ;;  %14901 = vmatmul.mubr.f32.vlgmr.msra.gmra.mxu0 %v15926_v58 }
 0x5cd   :  { %14909 = vmatpush3.msra.mxu0 %v4975_v13  ;;  %14903 = vmatprep.subr.mxu1 %v16255_v55 }
 0x5ce   :  { %14910 = vmatprep.mubr.f32.mxu0 %v16000_v47  ;;  %14918 = vmatprep.subr.mxu0 %v5062_v57 }
 0x5cf   :  { %14895 = vmatprep.mubr.f32.mxu1 %v15943_v15 }
 0x5d0   :  { %14896 = vmatmul.mubr.f32.vlgmr.msra.gmra.mxu1 %v15948_v19  ;;  %14911 = vmatmul.mubr.f32.vlgmr.msra.gmra.mxu0 %v16006_v48 }
 0x5d1   :  { %14904 = vmatpush3.msra.mxu1 %v16255_v55  ;;  %14919 = vmatpush3.msra.mxu0 %v5062_v57 }
 0x5d2   :  { %14913 = vmatprep.subr.mxu1 %v5065_v63  ;;  %14920 = vmatprep.mubr.f32.mxu0 %v15964_v34 }
 0x5d3   :  { %14928 = vmatprep.subr.mxu0 %v5063_v3  ;;  %14905 = vmatprep.mubr.f32.mxu1 %v15922_v56 }
 0x5d4   :  { %14906 = vmatmul.mubr.f32.vlgmr.msra.gmra.mxu1 %v15926_v58  ;;  %14921 = vmatmul.mubr.f32.vlgmr.msra.gmra.mxu0 %v15973_v37 }
 0x5d5   :  { %14914 = vmatpush3.msra.mxu1 %v5065_v63  ;;  %14929 = vmatpush3.msra.mxu0 %v5063_v3 }
 0x5d6   :  { %14915 = vmatprep.mubr.f32.mxu1 %v15951_v22  ;;  %14923 = vmatprep.subr.mxu1 %v4975_v13 }
 0x5d7   :  { %14930 = vmatprep.mubr.f32.mxu0 %v15951_v22  ;;  %14938 = vmatprep.subr.mxu0 %v16948_v50 }
 0x5d8   :  { %14916 = vmatmul.mubr.f32.vlgmr.msra.gmra.mxu1 %v15957_v29  ;;  %14931 = vmatmul.mubr.f32.vlgmr.msra.gmra.mxu0 %v15957_v29 }
 0x5d9   :  { %14924 = vmatpush3.msra.mxu1 %v4975_v13  ;;  %14925 = vmatprep.mubr.f32.mxu1 %v16954_v16 }
 0x5da   :  { %14933 = vmatprep.subr.mxu1 %v4975_v13  ;;  %14942 = vmatprep.mubr.msk.f32.mxu0 %vm15755_vm0, %v16948_v50 }
 0x5dc   :  { %14926 = vmatmul.mubr.f32.vlgmr.msra.gmra.mxu1 %v16955_v17 }
 0x5dd   :  { %14934 = vmatpush3.msra.mxu1 %v4975_v13  ;;  %14935 = vmatprep.mubr.f32.mxu1 %v15951_v22 }
 0x5de   :  { %14945 = vmatprep.subr.mxu1 %v16948_v50 }
 0x5e0   :  { %14936 = vmatmul.mubr.f32.vlgmr.msra.gmra.mxu1 %v15957_v29 }
 0x5e1   :  { %14949 = vmatprep.mubr.msk.f32.mxu1 %vm15755_vm0, %v16948_v50 }
 0x677   :  { %v14852_v49 = vpop.f32.mrf.mxu0 }
 0x679   :  { %v4032_v32 = vpop.f32.mrf.mxu0 }
 0x67b   :  { %v14862_v0 = vpop.f32.mrf.mxu0 }
 0x67d   :  { %v4198_v10 = vpop.f32.mrf.mxu0 }
 0x67f   :  { %v14857_v6 = vpop.f32.mrf.mxu1 }
 0x680   :  { %v4125_v44 = vadd.f32 %v14857_v6, %v14852_v49  ;;  %v14872_v60 = vpop.f32.mrf.mxu0 }
 0x681   :  { %v4118_v36 = vpop.f32.mrf.mxu1 }
 0x682   :  { %v4119_v55 = vadd.f32 %v4118_v36, %v4032_v32  ;;  %v4361_v28 = vpop.f32.mrf.mxu0  ;;  %v4206_v46 = vadd.f32 %v14862_v0, %v4125_v44 }
 0x683   :  { %v14867_v7 = vpop.f32.mrf.mxu1 }
 0x684   :  { %v4288_v59 = vadd.f32 %v14867_v7, %v4206_v46  ;;  %v14882_v40 = vpop.f32.mrf.mxu0  ;;  %v4199_v42 = vadd.f32 %v4198_v10, %v4119_v55 }
 0x685   :  { %v4279_v39 = vpop.f32.mrf.mxu1 }
 0x686   :  { %v4280_v31 = vadd.f32 %v4279_v39, %v4199_v42  ;;  %v4523_v13 = vpop.f32.mrf.mxu0  ;;  %v4368_v43 = vadd.f32 %v14872_v60, %v4288_v59 }
 0x687   :  { %v14877_v57 = vpop.f32.mrf.mxu1 }
 0x688   :  { %v14892_v18 = vpop.f32.mrf.mxu0  ;;  %v4362_v3 = vadd.f32 %v4361_v28, %v4280_v31  ;;  %v4446_v20 = vadd.f32 %v14877_v57, %v4368_v43 }
 0x689   :  { %v4439_v63 = vpop.f32.mrf.mxu1 }
 0x68a   :  { %v4689_v17 = vpop.f32.mrf.mxu0  ;;  %v4440_v49 = vadd.f32 %v4439_v63, %v4362_v3  ;;  %v4534_v32 = vadd.f32 %v14882_v40, %v4446_v20 }
 0x68b   :  { %v14887_v6 = vpop.f32.mrf.mxu1 }
 0x68c   :  { %v14902_v16 = vpop.f32.mrf.mxu0  ;;  %v4524_v44 = vadd.f32 %v4523_v13, %v4440_v49  ;;  %v4616_v10 = vadd.f32 %v14887_v6, %v4534_v32 }
 0x68d   :  { %v4609_v36 = vpop.f32.mrf.mxu1 }
 0x68e   :  { %v4852_v0 = vpop.f32.mrf.mxu0  ;;  %v4610_v39 = vadd.f32 %v4609_v36, %v4524_v44  ;;  %v4697_v29 = vadd.f32 %v14892_v18, %v4616_v10 }
 0x690   :  { %v14897_v46 = vpop.f32.mrf.mxu1  ;;  %v14912_v7 = vpop.f32.mrf.mxu0  ;;  %v4690_v31 = vadd.f32 %v4689_v17, %v4610_v39 }
 0x691   :  { %v4779_v3 = vadd.f32 %v14897_v46, %v4697_v29 }
 0x692   :  { %v4770_v55 = vpop.f32.mrf.mxu1  ;;  %v5016_v42 = vpop.f32.mrf.mxu0 }
 0x693   :  { %v4771_v40 = vadd.f32 %v4770_v55, %v4690_v31  ;;  %v4859_v34 = vadd.f32 %v14902_v16, %v4779_v3 }
 0x694   :  { %v14907_v60 = vpop.f32.mrf.mxu1  ;;  %v14922_v59 = vpop.f32.mrf.mxu0 }
 0x695   :  { %v4853_v36 = vadd.f32 %v4852_v0, %v4771_v40  ;;  %v4937_v17 = vadd.f32 %v14907_v60, %v4859_v34 }
 0x696   :  { %v4930_v28 = vpop.f32.mrf.mxu1  ;;  %v5182_v43 = vpop.f32.mrf.mxu0 }
 0x697   :  { %v4931_v46 = vadd.f32 %v4930_v28, %v4853_v36 }
 0x698   :  { %v14917_v57 = vpop.f32.mrf.mxu1  ;;  %v14932_v13 = vpop.f32.mrf.mxu0 }
 0x699   :  { %v5109_v63 = vadd.f32 %v14917_v57, %v14912_v7 }
 0x69a   :  { %v5102_v22 = vpop.f32.mrf.mxu1  ;;  %v5345_v18 = vpop.f32.mrf.mxu0 }
 0x69b   :  { %v5103_v20 = vadd.f32 %v5102_v22, %v5016_v42  ;;  %v5190_v37 = vadd.f32 %v14922_v59, %v5109_v63 }
 0x69c   :  { %v14927_v49 = vpop.f32.mrf.mxu1 }
 0x69d   :  { %v5272_v6 = vadd.f32 %v14927_v49, %v5190_v37  ;;  %v5183_v32 = vadd.f32 %v5182_v43, %v5103_v20 }
 0x69e   :  { %v5263_v48 = vpop.f32.mrf.mxu1 }
 0x69f   :  { %v5264_v44 = vadd.f32 %v5263_v48, %v5183_v32  ;;  %v5352_v19 = vadd.f32 %v14932_v13, %v5272_v6 }
 0x6a0   :  { %v14937_v10 = vpop.f32.mrf.mxu1 }
 0x6a1   :  { %v5430_v39 = vadd.f32 %v14937_v10, %v5352_v19  ;;  %v5346_v15 = vadd.f32 %v5345_v18, %v5264_v44 }
 0x6a2   :  { %v5423_v29 = vpop.f32.mrf.mxu1 }
 0x6a3   :  { %v5434_v7 = vadd.f32 %v5430_v39, %v4937_v17  ;;  %v5424_v55 = vadd.f32 %v5423_v29, %v5346_v15 }
 0x6a5   :  { %v5433_v22 = vadd.f32 %v5424_v55, %v4931_v46  ;;  %v5436_v42 = vadd.f32 %v5434_v7, %v16043_v61 }
 0x6a7   :  { %v5435_v16 = vadd.f32 %v5433_v22, %v16045_v14  ;;  %v5438_v37 = vmax.f32 %v5436_v42, 0.0 }
 0x6a9   :  { %v5437_v59 = vmax.f32 %v5435_v16, 0.0  ;;  %5443 = vrot.lane.b32.xlu1 %v5438_v37, %s15758_s22  ;;  %v5907_v3 = vsel %vm568_vm3, %v5438_v37, 0  ;;  %v16956_v16 = vld [vmem:[#allocation32_spill] sm:$0xff] }
 0x6aa   :  { %v16321_v13 = vand.u32 4294901760, %v5907_v3 }
 0x6ab   :  { %5441 = vrot.lane.b32.xlu0 %v5437_v59, %s15758_s22  ;;  %v16325_v49 = vand.u32 4294901760, %v5437_v59 }
 0x6ac   :  { %v6016_v6 = vsub.f32 %v5907_v3, %v16321_v13  ;;  %v16962_v3 = vld [vmem:[#allocation15_spill] sm:$0xff] }
 0x6ad   :  { %6370 = vrot.lane.b32.xlu1 %v5438_v37, %s15759_s23  ;;  %v6023_v32 = vsub.f32 %v5437_v59, %v16325_v49 }
 0x6ae   :  { %v6017_v36 = vand.u32 4294901760, %v6016_v6 }
 0x6af   :  { %6368 = vrot.lane.b32.xlu0 %v5437_v59, %s15759_s23  ;;  %v6024_v44 = vand.u32 4294901760, %v6023_v32 }
 0x6b0   :  { %v6018_v10 = vsub.f32 %v6016_v6, %v6017_v36 }
 0x6b1   :  { %v6025_v17 = vsub.f32 %v6023_v32, %v6024_v44 }
 0x6b2   :  { %v6019_v29 = vand.u32 4294901760, %v6018_v10 }
 0x6b3   :  { %v6026_v55 = vand.u32 4294901760, %v6025_v17 }
 0x71b   :  { %v5444_v19 = vpop.permute.xlu1 %5443 }
 0x71c   :  { %v5446_v34 = vsel %vm568_vm3, %v5444_v19, 0 }
 0x71d   :  { %v5477_v48 = vand.u32 4294901760, %v5446_v34  ;;  %v5442_v15 = vpop.permute.xlu0 %5441 }
 0x71e   :  { %v5480_v0 = vand.u32 4294901760, %v5442_v15 }
 0x71f   :  { %v5555_v60 = vsub.f32 %v5446_v34, %v5477_v48  ;;  %14939 = vmatpush3.msra.mxu0 %v5477_v48  ;;  %v6371_v18 = vpop.permute.xlu1 %6370  ;;  %v16957_v34 = vld [vmem:[#allocation33_spill] sm:$0xff] }
 0x720   :  { %v5562_v28 = vsub.f32 %v5442_v15, %v5480_v0  ;;  %14940 = vmatprep.subr.mxu0 %v16948_v50  ;;  %v6373_v39 = vsel %vm568_vm3, %v6371_v18, 0 }
 0x721   :  { %v5556_v31 = vand.u32 4294901760, %v5555_v60  ;;  %14941 = vmatpush3.msra.mxu0 %v5480_v0  ;;  %v6369_v46 = vpop.permute.xlu0 %6368  ;;  %v16357_v7 = vand.u32 4294901760, %v6373_v39 }
 0x722   :  { %v5563_v43 = vand.u32 4294901760, %v5562_v28  ;;  %14943 = vmatmul.mubr.f32.vlgmr.msra.gmra.mxu0 %v16073_v45  ;;  %14952 = vmatprep.subr.mxu0 %v16948_v50  ;;  %v16361_v22 = vand.u32 4294901760, %v6369_v46 }
 0x723   :  { %v5557_v57 = vsub.f32 %v5555_v60, %v5556_v31  ;;  %14953 = vmatpush3.msra.mxu0 %v5555_v60  ;;  %14956 = vmatprep.mubr.msk.f32.mxu0 %vm15755_vm0, %v16948_v50  ;;  %v6482_v42 = vsub.f32 %v6373_v39, %v16357_v7 }
 0x724   :  { %v5564_v63 = vsub.f32 %v5562_v28, %v5563_v43  ;;  %14954 = vmatprep.subr.mxu0 %v16948_v50  ;;  %v6489_v37 = vsub.f32 %v6369_v46, %v16361_v22 }
 0x725   :  { %v5558_v40 = vand.u32 4294901760, %v5557_v57  ;;  %14955 = vmatpush3.msra.mxu0 %v5562_v28  ;;  %v6483_v59 = vand.u32 4294901760, %v6482_v42  ;;  %v16959_v28 = vld [vmem:[#allocation35_spill] sm:$0xff]  ;;  %v16961_v57 = vld [vmem:[#allocation36_spill] sm:$0xff] }
 0x726   :  { %v5565_v20 = vand.u32 4294901760, %v5564_v63  ;;  %14957 = vmatmul.mubr.f32.vlgmr.msra.gmra.mxu0 %v16061_v23  ;;  %14966 = vmatprep.subr.mxu0 %v16948_v50  ;;  %v6490_v19 = vand.u32 4294901760, %v6489_v37  ;;  %v16963_v63 = vld [vmem:[#allocation16_spill] sm:$0xff] }
 0x727   :  { %14946 = vmatpush3.msra.mxu1 %v5558_v40  ;;  %14967 = vmatpush3.msra.mxu0 %v5556_v31  ;;  %v6484_v15 = vsub.f32 %v6482_v42, %v6483_v59 }
 0x728   :  { %14947 = vmatprep.subr.mxu1 %v16948_v50  ;;  %14968 = vmatprep.subr.mxu0 %v16948_v50 }
 0x729   :  { %14948 = vmatpush3.msra.mxu1 %v5565_v20  ;;  %14969 = vmatpush3.msra.mxu0 %v5563_v43  ;;  %v6485_v60 = vand.u32 4294901760, %v6484_v15  ;;  %v16960_v43 = vld [vmem:[#allocation34_spill] sm:$0xff] }
 0x72a   :  { %14970 = vmatprep.mubr.msk.f32.mxu0 %vm15755_vm0, %v16948_v50  ;;  %14950 = vmatmul.mubr.f32.vlgmr.msra.gmra.mxu1 %v16058_v21 }
 0x72b   :  { %14959 = vmatprep.subr.mxu1 %v16948_v50  ;;  %14971 = vmatmul.mubr.f32.vlgmr.msra.gmra.mxu0 %v16058_v21 }
 0x72c   :  { %14980 = vmatprep.subr.mxu0 %v16948_v50  ;;  %14960 = vmatpush3.msra.mxu1 %v5477_v48 }
 0x72d   :  { %14981 = vmatpush3.msra.mxu0 %v16321_v13  ;;  %14961 = vmatprep.subr.mxu1 %v16948_v50 }
 0x72e   :  { %14982 = vmatprep.subr.mxu0 %v16948_v50  ;;  %14962 = vmatpush3.msra.mxu1 %v5480_v0 }
 0x72f   :  { %14963 = vmatprep.mubr.msk.f32.mxu1 %vm15755_vm0, %v16948_v50  ;;  %14983 = vmatpush3.msra.mxu0 %v16325_v49 }
 0x730   :  { %14984 = vmatprep.mubr.msk.f32.mxu0 %vm15755_vm0, %v16948_v50  ;;  %14964 = vmatmul.mubr.f32.vlgmr.msra.gmra.mxu1 %v16064_v27 }
 0x731   :  { %14973 = vmatprep.subr.mxu1 %v16948_v50  ;;  %14985 = vmatmul.mubr.f32.vlgmr.msra.gmra.mxu0 %v16109_v30 }
 0x732   :  { %14994 = vmatprep.subr.mxu0 %v16948_v50  ;;  %14974 = vmatpush3.msra.mxu1 %v5477_v48  ;;  %v16958_v48 = vld [vmem:[#allocation37_spill] sm:$0xff] }
 0x733   :  { %14995 = vmatpush3.msra.mxu0 %v6016_v6  ;;  %14975 = vmatprep.subr.mxu1 %v16948_v50 }
 0x734   :  { %14996 = vmatprep.subr.mxu0 %v16948_v50  ;;  %14976 = vmatpush3.msra.mxu1 %v5480_v0  ;;  %v6491_v0 = vsub.f32 %v6489_v37, %v6490_v19 }
 0x735   :  { %14977 = vmatprep.mubr.msk.f32.mxu1 %vm15755_vm0, %v16948_v50  ;;  %14997 = vmatpush3.msra.mxu0 %v6023_v32 }
 0x736   :  { %14998 = vmatprep.mubr.msk.f32.mxu0 %vm15755_vm0, %v16948_v50  ;;  %14978 = vmatmul.mubr.f32.vlgmr.msra.gmra.mxu1 %v16058_v21  ;;  %v6492_v31 = vand.u32 4294901760, %v6491_v0 }
 0x737   :  { %14987 = vmatprep.subr.mxu1 %v16948_v50  ;;  %14999 = vmatmul.mubr.f32.vlgmr.msra.gmra.mxu0 %v16077_v54 }
 0x738   :  { %15008 = vmatprep.subr.mxu0 %v16948_v50  ;;  %14988 = vmatpush3.msra.mxu1 %v6019_v29 }
 0x739   :  { %15009 = vmatpush3.msra.mxu0 %v6017_v36  ;;  %14989 = vmatprep.subr.mxu1 %v16948_v50 }
 0x73a   :  { %15010 = vmatprep.subr.mxu0 %v16948_v50  ;;  %14990 = vmatpush3.msra.mxu1 %v6026_v55 }
 0x73b   :  { %14991 = vmatprep.mubr.msk.f32.mxu1 %vm15755_vm0, %v16948_v50  ;;  %15011 = vmatpush3.msra.mxu0 %v6024_v44 }
 0x73c   :  { %15012 = vmatprep.mubr.msk.f32.mxu0 %vm15755_vm0, %v16948_v50  ;;  %14992 = vmatmul.mubr.f32.vlgmr.msra.gmra.mxu1 %v16956_v16 }
 0x73d   :  { %15001 = vmatprep.subr.mxu1 %v16948_v50  ;;  %15013 = vmatmul.mubr.f32.vlgmr.msra.gmra.mxu0 %v16956_v16 }
 0x73e   :  { %15022 = vmatprep.subr.mxu0 %v16948_v50  ;;  %15002 = vmatpush3.msra.mxu1 %v16321_v13 }
 0x73f   :  { %15023 = vmatpush3.msra.mxu0 %v16357_v7  ;;  %15003 = vmatprep.subr.mxu1 %v16948_v50 }
 0x740   :  { %15024 = vmatprep.subr.mxu0 %v16948_v50  ;;  %15004 = vmatpush3.msra.mxu1 %v16325_v49 }
 0x741   :  { %15005 = vmatprep.mubr.msk.f32.mxu1 %vm15755_vm0, %v16948_v50  ;;  %15025 = vmatpush3.msra.mxu0 %v16361_v22 }
 0x742   :  { %15026 = vmatprep.mubr.msk.f32.mxu0 %vm15755_vm0, %v16948_v50  ;;  %15006 = vmatmul.mubr.f32.vlgmr.msra.gmra.mxu1 %v16957_v34 }
 0x743   :  { %15015 = vmatprep.subr.mxu1 %v16948_v50  ;;  %15027 = vmatmul.mubr.f32.vlgmr.msra.gmra.mxu0 %v16958_v48 }
 0x744   :  { %15036 = vmatprep.subr.mxu0 %v16948_v50  ;;  %15016 = vmatpush3.msra.mxu1 %v16321_v13 }
 0x745   :  { %15037 = vmatpush3.msra.mxu0 %v6482_v42  ;;  %15017 = vmatprep.subr.mxu1 %v16948_v50 }
 0x746   :  { %15038 = vmatprep.subr.mxu0 %v16948_v50  ;;  %15018 = vmatpush3.msra.mxu1 %v16325_v49 }
 0x747   :  { %15019 = vmatprep.mubr.msk.f32.mxu1 %vm15755_vm0, %v16948_v50  ;;  %15039 = vmatpush3.msra.mxu0 %v6489_v37 }
 0x748   :  { %15040 = vmatprep.mubr.msk.f32.mxu0 %vm15755_vm0, %v16948_v50  ;;  %15020 = vmatmul.mubr.f32.vlgmr.msra.gmra.mxu1 %v16956_v16 }
 0x749   :  { %15029 = vmatprep.subr.mxu1 %v16948_v50  ;;  %15041 = vmatmul.mubr.f32.vlgmr.msra.gmra.mxu0 %v16959_v28 }
 0x74a   :  { %15050 = vmatprep.subr.mxu0 %v16948_v50  ;;  %15030 = vmatpush3.msra.mxu1 %v6485_v60 }
 0x74b   :  { %15051 = vmatpush3.msra.mxu0 %v6483_v59  ;;  %15031 = vmatprep.subr.mxu1 %v16948_v50 }
 0x74c   :  { %15052 = vmatprep.subr.mxu0 %v16948_v50  ;;  %15032 = vmatpush3.msra.mxu1 %v6492_v31 }
 0x74d   :  { %15033 = vmatprep.mubr.msk.f32.mxu1 %vm15755_vm0, %v16948_v50  ;;  %15053 = vmatpush3.msra.mxu0 %v6490_v19 }
 0x74e   :  { %15054 = vmatprep.mubr.msk.f32.mxu0 %vm15755_vm0, %v16948_v50  ;;  %15034 = vmatmul.mubr.f32.vlgmr.msra.gmra.mxu1 %v16960_v43 }
 0x74f   :  { %15043 = vmatprep.subr.mxu1 %v16948_v50  ;;  %15055 = vmatmul.mubr.f32.vlgmr.msra.gmra.mxu0 %v16960_v43 }
 0x750   :  { %15044 = vmatpush3.msra.mxu1 %v16357_v7  ;;  %15047 = vmatprep.mubr.msk.f32.mxu1 %vm15755_vm0, %v16948_v50 }
 0x751   :  { %15045 = vmatprep.subr.mxu1 %v16948_v50  ;;  %15064 = vmatprep.subr.mxu0 %v16948_v50 }
 0x752   :  { %15046 = vmatpush3.msra.mxu1 %v16361_v22  ;;  %15065 = vmatpush3.msra.mxu0 %v15837_v4 }
 0x753   :  { %15048 = vmatmul.mubr.f32.vlgmr.msra.gmra.mxu1 %v16961_v57  ;;  %15057 = vmatprep.subr.mxu1 %v16948_v50 }
 0x754   :  { %15058 = vmatpush3.msra.mxu1 %v16357_v7  ;;  %15061 = vmatprep.mubr.msk.f32.mxu1 %vm15755_vm0, %v16948_v50 }
 0x755   :  { %15059 = vmatprep.subr.mxu1 %v16948_v50  ;;  %15066 = vmatprep.subr.mxu0 %v16948_v50 }
 0x756   :  { %15060 = vmatpush3.msra.mxu1 %v16361_v22  ;;  %15067 = vmatpush3.msra.mxu0 %v15839_v5 }
 0x757   :  { %15062 = vmatmul.mubr.f32.vlgmr.msra.gmra.mxu1 %v16960_v43  ;;  %15071 = vmatprep.subr.mxu1 %v16948_v50 }
 0x758   :  { %15072 = vmatpush3.msra.mxu1 %v16962_v3  ;;  %15075 = vmatprep.mubr.msk.f32.mxu1 %vm15755_vm0, %v16948_v50 }
 0x759   :  { %15073 = vmatprep.subr.mxu1 %v16948_v50  ;;  %15068 = vmatprep.mubr.msk.f32.mxu0 %vm15755_vm0, %v16948_v50 }
 0x75a   :  { %15074 = vmatpush3.msra.mxu1 %v16963_v63  ;;  %15078 = vmatprep.subr.mxu0 %v16948_v50 }
 0x75b   :  { %15085 = vmatprep.subr.mxu1 %v16948_v50 }
 0x7e2   :  { %v5521_v40 = vpop.f32.mrf.mxu0 }
 0x7e4   :  { %v14944_v20 = vpop.f32.mrf.mxu0 }
 0x7e6   :  { %v5678_v13 = vpop.f32.mrf.mxu0 }
 0x7e8   :  { %v14958_v49 = vpop.f32.mrf.mxu0 }
 0x7ea   :  { %v5602_v6 = vpop.f32.mrf.mxu1 }
 0x7eb   :  { %v5830_v32 = vpop.f32.mrf.mxu0  ;;  %v5603_v18 = vadd.f32 %v5602_v6, %v5521_v40 }
 0x7ec   :  { %v14951_v36 = vpop.f32.mrf.mxu1 }
 0x7ed   :  { %v14972_v44 = vpop.f32.mrf.mxu0  ;;  %v5679_v46 = vadd.f32 %v5678_v13, %v5603_v18 }
 0x7f0   :  { %v5753_v10 = vpop.f32.mrf.mxu1 }
 0x7f1   :  { %v5982_v17 = vpop.f32.mrf.mxu0  ;;  %v5754_v22 = vadd.f32 %v5753_v10, %v5679_v46 }
 0x7f2   :  { %v14965_v39 = vpop.f32.mrf.mxu1 }
 0x7f3   :  { %v14986_v29 = vpop.f32.mrf.mxu0  ;;  %v5831_v59 = vadd.f32 %v5830_v32, %v5754_v22 }
 0x7f6   :  { %v5903_v7 = vpop.f32.mrf.mxu1 }
 0x7f7   :  { %v6139_v55 = vpop.f32.mrf.mxu0  ;;  %v5904_v31 = vadd.f32 %v5903_v7, %v5831_v59 }
 0x7f8   :  { %v14979_v42 = vpop.f32.mrf.mxu1 }
 0x7f9   :  { %v15000_v37 = vpop.f32.mrf.mxu0  ;;  %v5983_v36 = vadd.f32 %v5982_v17, %v5904_v31 }
 0x7fc   :  { %v6063_v19 = vpop.f32.mrf.mxu1 }
 0x7fd   :  { %v6291_v15 = vpop.f32.mrf.mxu0  ;;  %v6064_v44 = vadd.f32 %v6063_v19, %v5983_v36 }
 0x7fe   :  { %v14993_v0 = vpop.f32.mrf.mxu1 }
 0x7ff   :  { %v15014_v60 = vpop.f32.mrf.mxu0  ;;  %v6140_v63 = vadd.f32 %v6139_v55, %v6064_v44 }
 0x802   :  { %v6214_v20 = vpop.f32.mrf.mxu1 }
 0x803   :  { %v6448_v49 = vpop.f32.mrf.mxu0  ;;  %v6215_v32 = vadd.f32 %v6214_v20, %v6140_v63 }
 0x804   :  { %v15007_v40 = vpop.f32.mrf.mxu1 }
 0x805   :  { %v15028_v6 = vpop.f32.mrf.mxu0  ;;  %v6292_v7 = vadd.f32 %v6291_v15, %v6215_v32 }
 0x808   :  { %v6364_v39 = vpop.f32.mrf.mxu1 }
 0x809   :  { %v6605_v29 = vpop.f32.mrf.mxu0  ;;  %v6365_v40 = vadd.f32 %v6364_v39, %v6292_v7 }
 0x80a   :  { %v15021_v13 = vpop.f32.mrf.mxu1 }
 0x80b   :  { %v15042_v18 = vpop.f32.mrf.mxu0 }
 0x80e   :  { %v6529_v10 = vpop.f32.mrf.mxu1 }
 0x80f   :  { %v6530_v46 = vadd.f32 %v6529_v10, %v6448_v49  ;;  %v6757_v42 = vpop.f32.mrf.mxu0 }
 0x810   :  { %v15035_v22 = vpop.f32.mrf.mxu1 }
 0x811   :  { %v15056_v37 = vpop.f32.mrf.mxu0  ;;  %v6606_v0 = vadd.f32 %v6605_v29, %v6530_v46 }
 0x813   :  { %v6680_v60 = vpop.f32.mrf.mxu1 }
 0x814   :  { %v6681_v59 = vadd.f32 %v6680_v60, %v6606_v0 }
 0x815   :  { %v15049_v3 = vpop.f32.mrf.mxu1 }
 0x816   :  { %v6758_v17 = vadd.f32 %v6757_v42, %v6681_v59 }
 0x817   :  { %v6830_v31 = vpop.f32.mrf.mxu1 }
 0x818   :  { %v6831_v19 = vadd.f32 %v6830_v31, %v6758_v17 }
 0x819   :  { %v15063_v36 = vpop.f32.mrf.mxu1 }
 0x81a   :  { %v6834_v6 = vadd.f32 %v6831_v19, %v6365_v40 }
 0x81c   :  { %v6835_v13 = vadd.f32 %v6834_v6, %v16222_v41 }
 0x81e   :  { %v6836_v55 = vmax.f32 %v6835_v13, 0.0 }
 0x820   :  { %6838 = vrot.lane.b32.xlu1 %v6836_v55, %s15758_s22 }
 0x892   :  { %v6839_v49 = vpop.permute.xlu1 %6838 }
 0x893   :  { %v6841_v63 = vadd.f32 %v6839_v49, %v6836_v55 }
 0x895   :  { %v6842_v20 = vmul.f32 0.5, %v6841_v63 }
 0x897   :  { %v6844_v44 = vsel %vm91_vm1, %v6842_v20, 0 }
 0x898   :  { %v6913_v29 = vand.u32 4294901760, %v6844_v44 }
 0x89a   :  { %v6914_v15 = vsub.f32 %v6844_v44, %v6913_v29  ;;  %15076 = vmatmul.mubr.f32.vlgmr.msra.gmra.mxu1 %v6913_v29 }
 0x89b   :  { %15086 = vmatpush3.msra.mxu1 %v15837_v4  ;;  %15089 = vmatprep.mubr.msk.f32.mxu1 %vm15755_vm0, %v16948_v50 }
 0x89c   :  { %15087 = vmatprep.subr.mxu1 %v16948_v50  ;;  %v6915_v3 = vand.u32 4294901760, %v6914_v15 }
 0x89d   :  { %15088 = vmatpush3.msra.mxu1 %v15839_v5 }
 0x89e   :  { %15090 = vmatmul.mubr.f32.vlgmr.msra.gmra.mxu1 %v6915_v3  ;;  %15099 = vmatprep.subr.mxu1 %v16948_v50  ;;  %v6916_v39 = vsub.f32 %v6914_v15, %v6915_v3 }
 0x89f   :  { %15100 = vmatpush3.msra.mxu1 %v15837_v4  ;;  %15103 = vmatprep.mubr.msk.f32.mxu1 %vm15755_vm0, %v16948_v50 }
 0x8a0   :  { %15101 = vmatprep.subr.mxu1 %v16948_v50  ;;  %v6917_v18 = vand.u32 4294901760, %v6916_v39 }
 0x8a1   :  { %15102 = vmatpush3.msra.mxu1 %v15839_v5 }
 0x8a2   :  { %15069 = vmatmul.mubr.f32.vlgmr.msra.gmra.mxu0 %v6917_v18  ;;  %15104 = vmatmul.mubr.f32.vlgmr.msra.gmra.mxu1 %v6913_v29 }
 0x8a3   :  { %15079 = vmatpush3.msra.mxu0 %v15844_v8  ;;  %15113 = vmatprep.mubr.f32.mxu1 %v15894_v24 }
 0x8a4   :  { %15080 = vmatprep.subr.mxu0 %v16948_v50  ;;  %15082 = vmatprep.mubr.msk.f32.mxu0 %vm15755_vm0, %v16948_v50 }
 0x8a5   :  { %15081 = vmatpush3.msra.mxu0 %v15847_v9 }
 0x8a6   :  { %15083 = vmatmul.mubr.f32.vlgmr.msra.gmra.mxu0 %v6914_v15  ;;  %15092 = vmatprep.subr.mxu0 %v16948_v50 }
 0x8a7   :  { %15093 = vmatpush3.msra.mxu0 %v15852_v11  ;;  %15096 = vmatprep.mubr.msk.f32.mxu0 %vm15755_vm0, %v16948_v50 }
 0x8a8   :  { %15094 = vmatprep.subr.mxu0 %v16948_v50 }
 0x8a9   :  { %15095 = vmatpush3.msra.mxu0 %v15855_v12 }
 0x8aa   :  { %15097 = vmatmul.mubr.f32.vlgmr.msra.gmra.mxu0 %v6913_v29 }
 0x8ab   :  { %15108 = vmatprep.mubr.f32.mxu0 %v15905_v33 }
 0x95a   :  { %v7000_v10 = vpop.f32.mrf.mxu1 }
 0x95c   :  { %v15077_v46 = vpop.f32.mrf.mxu1 }
 0x95e   :  { %v7151_v42 = vpop.f32.mrf.mxu1 }
 0x960   :  { %v15091_v32 = vpop.f32.mrf.mxu1 }
 0x962   :  { %v6919_v22 = vpop.f32.mrf.mxu0  ;;  %v7301_v37 = vpop.f32.mrf.mxu1 }
 0x963   :  { %v7001_v7 = vadd.f32 %v7000_v10, %v6919_v22 }
 0x964   :  { %v15070_v0 = vpop.f32.mrf.mxu0  ;;  %v15105_v60 = vpop.f32.mrf.mxu1 }
 0x966   :  { %v7076_v59 = vpop.f32.mrf.mxu0 }
 0x967   :  { %v7077_v17 = vadd.f32 %v7076_v59, %v7001_v7  ;;  %v16964_v59 = vld [vmem:[#allocation21_spill] sm:$0xff] }
 0x968   :  { %v15084_v31 = vpop.f32.mrf.mxu0 }
 0x969   :  { %v7152_v40 = vadd.f32 %v7151_v42, %v7077_v17  ;;  %v16965_v17 = vld [vmem:[#allocation22_spill] sm:$0xff]  ;;  %v16966_v31 = vld [vmem:[#allocation31_spill] sm:$0xff] }
 0x96a   :  { %v7228_v19 = vpop.f32.mrf.mxu0 }
 0x96b   :  { %v7229_v36 = vadd.f32 %v7228_v19, %v7152_v40  ;;  %v16967_v19 = vld [vmem:[#allocation25_spill] sm:$0xff] }
 0x96c   :  { %v15098_v6 = vpop.f32.mrf.mxu0 }
 0x96d   :  { %v7302_v13 = vadd.f32 %v7301_v37, %v7229_v36  ;;  %v16968_v36 = vld [vmem:[#allocation26_spill] sm:$0xff]  ;;  %v16969_v6 = vld [vmem:[#allocation23_spill] sm:$0xff] }
 0x96f   :  { %8290 = vrot.lane.b32.xlu1 %v7302_v13, %s15759_s23  ;;  %7306 = vrot.lane.b32.xlu0 %v7302_v13, %s15758_s22  ;;  %v7799_v55 = vsel %vm568_vm3, %v7302_v13, 0  ;;  %v16970_v13 = vld [vmem:[#allocation24_spill] sm:$0xff] }
 0x970   :  { %v16467_v44 = vand.u32 4294901760, %v7799_v55 }
 0x972   :  { %v7919_v3 = vsub.f32 %v7799_v55, %v16467_v44  ;;  %v16971_v55 = vld [vmem:[#allocation28_spill] sm:$0xff] }
 0x974   :  { %v7920_v46 = vand.u32 4294901760, %v7919_v3 }
 0x976   :  { %v7921_v22 = vsub.f32 %v7919_v3, %v7920_v46 }
 0x978   :  { %v7922_v0 = vand.u32 4294901760, %v7921_v22 }
 0x9e1   :  { %v7307_v49 = vpop.permute.xlu0 %7306  ;;  %v8291_v18 = vpop.permute.xlu1 %8290 }
 0x9e2   :  { %v7308_v63 = vsel %vm568_vm3, %v7307_v49, 0  ;;  %v8292_v42 = vsel %vm568_vm3, %v8291_v18, 0  ;;  %v16972_v49 = vld [vmem:[#allocation29_spill] sm:$0xff] }
 0x9e3   :  { %v7341_v20 = vand.u32 4294901760, %v7308_v63  ;;  %v8325_v32 = vand.u32 4294901760, %v8292_v42 }
 0x9e5   :  { %v7428_v29 = vsub.f32 %v7308_v63, %v7341_v20  ;;  %15106 = vmatprep.subr.mxu0 %v7341_v20  ;;  %v8412_v37 = vsub.f32 %v8292_v42, %v8325_v32 }
 0x9e6   :  { %15107 = vmatpush3.msra.mxu0 %v7341_v20 }
 0x9e7   :  { %15109 = vmatmul.mubr.f32.vlgmr.msra.gmra.mxu0 %v15933_v1  ;;  %15116 = vmatprep.subr.mxu0 %v7428_v29  ;;  %v7429_v15 = vand.u32 4294901760, %v7428_v29  ;;  %v8413_v60 = vand.u32 4294901760, %v8412_v37 }
 0x9e8   :  { %15117 = vmatpush3.msra.mxu0 %v7428_v29  ;;  %15118 = vmatprep.mubr.f32.mxu0 %v15897_v25 }
 0x9e9   :  { %15126 = vmatprep.subr.mxu0 %v7429_v15  ;;  %v7430_v39 = vsub.f32 %v7428_v29, %v7429_v15  ;;  %v8414_v7 = vsub.f32 %v8412_v37, %v8413_v60 }
 0x9eb   :  { %15119 = vmatmul.mubr.f32.vlgmr.msra.gmra.mxu0 %v15915_v52  ;;  %v7431_v10 = vand.u32 4294901760, %v7430_v39  ;;  %v8415_v40 = vand.u32 4294901760, %v8414_v7 }
 0x9ec   :  { %15127 = vmatpush3.msra.mxu0 %v7429_v15  ;;  %15128 = vmatprep.mubr.f32.mxu0 %v15894_v24 }
 0x9ed   :  { %15136 = vmatprep.subr.mxu0 %v16467_v44  ;;  %15111 = vmatprep.subr.mxu1 %v7431_v10 }
 0x9ee   :  { %15112 = vmatpush3.msra.mxu1 %v7431_v10 }
 0x9ef   :  { %15114 = vmatmul.mubr.f32.vlgmr.msra.gmra.mxu1 %v15912_v51  ;;  %15121 = vmatprep.subr.mxu1 %v7341_v20 }
 0x9f0   :  { %15129 = vmatmul.mubr.f32.vlgmr.msra.gmra.mxu0 %v15912_v51  ;;  %15122 = vmatpush3.msra.mxu1 %v7341_v20 }
 0x9f1   :  { %15137 = vmatpush3.msra.mxu0 %v16467_v44  ;;  %15123 = vmatprep.mubr.f32.mxu1 %v15901_v26 }
 0x9f2   :  { %15146 = vmatprep.subr.mxu0 %v7919_v3  ;;  %15131 = vmatprep.subr.mxu1 %v7341_v20 }
 0x9f3   :  { %15138 = vmatprep.mubr.f32.mxu0 %v15967_v35  ;;  %15124 = vmatmul.mubr.f32.vlgmr.msra.gmra.mxu1 %v15918_v53 }
 0x9f4   :  { %15132 = vmatpush3.msra.mxu1 %v7341_v20  ;;  %15139 = vmatmul.mubr.f32.vlgmr.msra.gmra.mxu0 %v15975_v38 }
 0x9f5   :  { %15147 = vmatpush3.msra.mxu0 %v7919_v3  ;;  %15133 = vmatprep.mubr.f32.mxu1 %v15894_v24 }
 0x9f6   :  { %15141 = vmatprep.subr.mxu1 %v7922_v0  ;;  %15156 = vmatprep.subr.mxu0 %v7920_v46 }
 0x9f7   :  { %15148 = vmatprep.mubr.f32.mxu0 %v15931_v62  ;;  %15134 = vmatmul.mubr.f32.vlgmr.msra.gmra.mxu1 %v15912_v51 }
 0x9f8   :  { %15142 = vmatpush3.msra.mxu1 %v7922_v0  ;;  %15149 = vmatmul.mubr.f32.vlgmr.msra.gmra.mxu0 %v15936_v2 }
 0x9f9   :  { %15157 = vmatpush3.msra.mxu0 %v7920_v46  ;;  %15151 = vmatprep.subr.mxu1 %v16467_v44 }
 0x9fa   :  { %15166 = vmatprep.subr.mxu0 %v8325_v32  ;;  %15143 = vmatprep.mubr.f32.mxu1 %v15922_v56 }
 0x9fb   :  { %15158 = vmatprep.mubr.f32.mxu0 %v15922_v56  ;;  %15144 = vmatmul.mubr.f32.vlgmr.msra.gmra.mxu1 %v15926_v58 }
 0x9fc   :  { %15152 = vmatpush3.msra.mxu1 %v16467_v44  ;;  %15159 = vmatmul.mubr.f32.vlgmr.msra.gmra.mxu0 %v15926_v58 }
 0x9fd   :  { %15167 = vmatpush3.msra.mxu0 %v8325_v32  ;;  %15161 = vmatprep.subr.mxu1 %v16467_v44 }
 0x9fe   :  { %15168 = vmatprep.mubr.f32.mxu0 %v16000_v47  ;;  %15176 = vmatprep.subr.mxu0 %v8412_v37 }
 0x9ff   :  { %15153 = vmatprep.mubr.f32.mxu1 %v16964_v59 }
 0xa00   :  { %15154 = vmatmul.mubr.f32.vlgmr.msra.gmra.mxu1 %v16965_v17  ;;  %15169 = vmatmul.mubr.f32.vlgmr.msra.gmra.mxu0 %v16966_v31 }
 0xa01   :  { %15162 = vmatpush3.msra.mxu1 %v16467_v44  ;;  %15177 = vmatpush3.msra.mxu0 %v8412_v37 }
 0xa02   :  { %15171 = vmatprep.subr.mxu1 %v8415_v40  ;;  %15178 = vmatprep.mubr.f32.mxu0 %v16967_v19 }
 0xa03   :  { %15186 = vmatprep.subr.mxu0 %v8413_v60  ;;  %15163 = vmatprep.mubr.f32.mxu1 %v15922_v56 }
 0xa04   :  { %15164 = vmatmul.mubr.f32.vlgmr.msra.gmra.mxu1 %v15926_v58  ;;  %15179 = vmatmul.mubr.f32.vlgmr.msra.gmra.mxu0 %v16968_v36 }
 0xa05   :  { %15172 = vmatpush3.msra.mxu1 %v8415_v40  ;;  %15187 = vmatpush3.msra.mxu0 %v8413_v60 }
 0xa06   :  { %15173 = vmatprep.mubr.f32.mxu1 %v16969_v6  ;;  %15181 = vmatprep.subr.mxu1 %v8325_v32 }
 0xa07   :  { %15188 = vmatprep.mubr.f32.mxu0 %v16969_v6  ;;  %15196 = vmatprep.subr.mxu0 %v16948_v50 }
 0xa08   :  { %15174 = vmatmul.mubr.f32.vlgmr.msra.gmra.mxu1 %v16970_v13  ;;  %15189 = vmatmul.mubr.f32.vlgmr.msra.gmra.mxu0 %v16970_v13 }
 0xa09   :  { %15182 = vmatpush3.msra.mxu1 %v8325_v32  ;;  %15183 = vmatprep.mubr.f32.mxu1 %v16971_v55 }
 0xa0a   :  { %15191 = vmatprep.subr.mxu1 %v8325_v32  ;;  %15200 = vmatprep.mubr.msk.f32.mxu0 %vm15755_vm0, %v16948_v50 }
 0xa0c   :  { %15184 = vmatmul.mubr.f32.vlgmr.msra.gmra.mxu1 %v16972_v49 }
 0xa0d   :  { %15192 = vmatpush3.msra.mxu1 %v8325_v32  ;;  %15193 = vmatprep.mubr.f32.mxu1 %v16969_v6 }
 0xa0e   :  { %15203 = vmatprep.subr.mxu1 %v16948_v50 }
 0xa10   :  { %15194 = vmatmul.mubr.f32.vlgmr.msra.gmra.mxu1 %v16970_v13 }
 0xa11   :  { %15207 = vmatprep.mubr.msk.f32.mxu1 %vm15755_vm0, %v16948_v50 }
 0xaa7   :  { %v15110_v63 = vpop.f32.mrf.mxu0 }
 0xaa9   :  { %v7382_v20 = vpop.f32.mrf.mxu0 }
 0xaab   :  { %v15120_v44 = vpop.f32.mrf.mxu0 }
 0xaad   :  { %v7548_v29 = vpop.f32.mrf.mxu0 }
 0xaaf   :  { %v15115_v15 = vpop.f32.mrf.mxu1 }
 0xab0   :  { %v7475_v3 = vadd.f32 %v15115_v15, %v15110_v63  ;;  %v15130_v39 = vpop.f32.mrf.mxu0 }
 0xab1   :  { %v7468_v18 = vpop.f32.mrf.mxu1 }
 0xab2   :  { %v7469_v10 = vadd.f32 %v7468_v18, %v7382_v20  ;;  %v7711_v46 = vpop.f32.mrf.mxu0  ;;  %v7556_v42 = vadd.f32 %v15120_v44, %v7475_v3 }
 0xab3   :  { %v15125_v32 = vpop.f32.mrf.mxu1 }
 0xab4   :  { %v7638_v22 = vadd.f32 %v15125_v32, %v7556_v42  ;;  %v15140_v37 = vpop.f32.mrf.mxu0  ;;  %v7549_v0 = vadd.f32 %v7548_v29, %v7469_v10 }
 0xab5   :  { %v7629_v60 = vpop.f32.mrf.mxu1 }
 0xab6   :  { %v7630_v7 = vadd.f32 %v7629_v60, %v7549_v0  ;;  %v7873_v40 = vpop.f32.mrf.mxu0  ;;  %v7718_v49 = vadd.f32 %v15130_v39, %v7638_v22 }
 0xab7   :  { %v15135_v55 = vpop.f32.mrf.mxu1 }
 0xab8   :  { %v15150_v13 = vpop.f32.mrf.mxu0  ;;  %v7712_v6 = vadd.f32 %v7711_v46, %v7630_v7  ;;  %v7796_v36 = vadd.f32 %v15135_v55, %v7718_v49 }
 0xab9   :  { %v7789_v19 = vpop.f32.mrf.mxu1 }
 0xaba   :  { %v8039_v31 = vpop.f32.mrf.mxu0  ;;  %v7790_v63 = vadd.f32 %v7789_v19, %v7712_v6  ;;  %v7884_v20 = vadd.f32 %v15140_v37, %v7796_v36 }
 0xabb   :  { %v15145_v15 = vpop.f32.mrf.mxu1 }
 0xabc   :  { %v15160_v17 = vpop.f32.mrf.mxu0  ;;  %v7874_v3 = vadd.f32 %v7873_v40, %v7790_v63  ;;  %v7966_v29 = vadd.f32 %v15145_v15, %v7884_v20 }
 0xabd   :  { %v7959_v18 = vpop.f32.mrf.mxu1 }
 0xabe   :  { %v8202_v44 = vpop.f32.mrf.mxu0  ;;  %v7960_v60 = vadd.f32 %v7959_v18, %v7874_v3  ;;  %v8047_v59 = vadd.f32 %v15150_v13, %v7966_v29 }
 0xac0   :  { %v15155_v42 = vpop.f32.mrf.mxu1  ;;  %v15170_v32 = vpop.f32.mrf.mxu0  ;;  %v8040_v55 = vadd.f32 %v8039_v31, %v7960_v60 }
 0xac1   :  { %v8129_v19 = vadd.f32 %v15155_v42, %v8047_v59 }
 0xac2   :  { %v8120_v10 = vpop.f32.mrf.mxu1  ;;  %v8366_v0 = vpop.f32.mrf.mxu0 }
 0xac3   :  { %v8121_v36 = vadd.f32 %v8120_v10, %v8040_v55  ;;  %v8209_v56 = vadd.f32 %v15160_v17, %v8129_v19 }
 0xac4   :  { %v15165_v39 = vpop.f32.mrf.mxu1  ;;  %v15180_v22 = vpop.f32.mrf.mxu0 }
 0xac5   :  { %v8203_v18 = vadd.f32 %v8202_v44, %v8121_v36  ;;  %v8287_v31 = vadd.f32 %v15165_v39, %v8209_v56 }
 0xac6   :  { %v8280_v46 = vpop.f32.mrf.mxu1  ;;  %v8532_v49 = vpop.f32.mrf.mxu0 }
 0xac7   :  { %v8281_v42 = vadd.f32 %v8280_v46, %v8203_v18 }
 0xac8   :  { %v15175_v7 = vpop.f32.mrf.mxu1  ;;  %v15190_v40 = vpop.f32.mrf.mxu0 }
 0xac9   :  { %v8459_v6 = vadd.f32 %v15175_v7, %v15170_v32 }
 0xaca   :  { %v8452_v47 = vpop.f32.mrf.mxu1  ;;  %v8695_v13 = vpop.f32.mrf.mxu0 }
 0xacb   :  { %v8453_v37 = vadd.f32 %v8452_v47, %v8366_v0  ;;  %v8540_v58 = vadd.f32 %v15180_v22, %v8459_v6 }
 0xacc   :  { %v15185_v63 = vpop.f32.mrf.mxu1 }
 0xacd   :  { %v8622_v15 = vadd.f32 %v15185_v63, %v8540_v58  ;;  %v8533_v20 = vadd.f32 %v8532_v49, %v8453_v37 }
 0xace   :  { %v8613_v2 = vpop.f32.mrf.mxu1 }
 0xacf   :  { %v8614_v3 = vadd.f32 %v8613_v2, %v8533_v20  ;;  %v8702_v62 = vadd.f32 %v15190_v40, %v8622_v15 }
 0xad0   :  { %v15195_v29 = vpop.f32.mrf.mxu1 }
 0xad1   :  { %v8780_v60 = vadd.f32 %v15195_v29, %v8702_v62  ;;  %v8696_v38 = vadd.f32 %v8695_v13, %v8614_v3 }
 0xad2   :  { %v8773_v59 = vpop.f32.mrf.mxu1 }
 0xad3   :  { %v8784_v32 = vadd.f32 %v8780_v60, %v8287_v31  ;;  %v8774_v10 = vadd.f32 %v8773_v59, %v8696_v38 }
 0xad5   :  { %v8783_v47 = vadd.f32 %v8774_v10, %v8281_v42  ;;  %v8786_v0 = vadd.f32 %v8784_v32, %v16043_v61 }
 0xad7   :  { %v8785_v17 = vadd.f32 %v8783_v47, %v16045_v14  ;;  %v8788_v58 = vmax.f32 %v8786_v0, 0.0 }
 0xad9   :  { %v8787_v22 = vmax.f32 %v8785_v17, 0.0  ;;  %8793 = vrot.lane.b32.xlu0 %v8788_v58, %s15758_s22  ;;  %v9257_v19 = vsel %vm568_vm3, %v8788_v58, 0 }
 0xada   :  { %v16533_v40 = vand.u32 4294901760, %v9257_v19 }
 0xadb   :  { %8791 = vrot.lane.b32.xlu1 %v8787_v22, %s15758_s22  ;;  %v16537_v63 = vand.u32 4294901760, %v8787_v22 }
 0xadc   :  { %v9366_v15 = vsub.f32 %v9257_v19, %v16533_v40 }
 0xadd   :  { %9720 = vrot.lane.b32.xlu0 %v8788_v58, %s15759_s23  ;;  %v9373_v20 = vsub.f32 %v8787_v22, %v16537_v63 }
 0xade   :  { %v9367_v18 = vand.u32 4294901760, %v9366_v15 }
 0xadf   :  { %9718 = vrot.lane.b32.xlu1 %v8787_v22, %s15759_s23  ;;  %v9374_v3 = vand.u32 4294901760, %v9373_v20 }
 0xae0   :  { %v9368_v29 = vsub.f32 %v9366_v15, %v9367_v18 }
 0xae1   :  { %v9375_v31 = vsub.f32 %v9373_v20, %v9374_v3 }
 0xae2   :  { %v9369_v59 = vand.u32 4294901760, %v9368_v29 }
 0xae3   :  { %v9376_v10 = vand.u32 4294901760, %v9375_v31 }
 0xb4b   :  { %v8794_v56 = vpop.permute.xlu0 %8793 }
 0xb4c   :  { %v8796_v62 = vsel %vm568_vm3, %v8794_v56, 0 }
 0xb4d   :  { %v8827_v2 = vand.u32 4294901760, %v8796_v62  ;;  %v8792_v38 = vpop.permute.xlu1 %8791 }
 0xb4e   :  { %v8830_v44 = vand.u32 4294901760, %v8792_v38 }
 0xb4f   :  { %v8905_v39 = vsub.f32 %v8796_v62, %v8827_v2  ;;  %15197 = vmatpush3.msra.mxu0 %v8827_v2  ;;  %v9721_v13 = vpop.permute.xlu0 %9720 }
 0xb50   :  { %v8912_v46 = vsub.f32 %v8792_v38, %v8830_v44  ;;  %15198 = vmatprep.subr.mxu0 %v16948_v50  ;;  %v9723_v60 = vsel %vm568_vm3, %v9721_v13, 0 }
 0xb51   :  { %v8906_v55 = vand.u32 4294901760, %v8905_v39  ;;  %15199 = vmatpush3.msra.mxu0 %v8830_v44  ;;  %v9719_v42 = vpop.permute.xlu1 %9718  ;;  %v16569_v32 = vand.u32 4294901760, %v9723_v60 }
 0xb52   :  { %v8913_v49 = vand.u32 4294901760, %v8912_v46  ;;  %15201 = vmatmul.mubr.f32.vlgmr.msra.gmra.mxu0 %v16073_v45  ;;  %15210 = vmatprep.subr.mxu0 %v16948_v50  ;;  %v16573_v47 = vand.u32 4294901760, %v9719_v42 }
 0xb53   :  { %v8907_v7 = vsub.f32 %v8905_v39, %v8906_v55  ;;  %15211 = vmatpush3.msra.mxu0 %v8905_v39  ;;  %15214 = vmatprep.mubr.msk.f32.mxu0 %vm15755_vm0, %v16948_v50  ;;  %v9832_v0 = vsub.f32 %v9723_v60, %v16569_v32  ;;  %v16974_v39 = vld [vmem:[#allocation16_spill] sm:$0xff] }
 0xb54   :  { %v8914_v6 = vsub.f32 %v8912_v46, %v8913_v49  ;;  %15212 = vmatprep.subr.mxu0 %v16948_v50  ;;  %v9839_v17 = vsub.f32 %v9719_v42, %v16573_v47 }
 0xb55   :  { %v8908_v36 = vand.u32 4294901760, %v8907_v7  ;;  %15213 = vmatpush3.msra.mxu0 %v8912_v46  ;;  %v9833_v58 = vand.u32 4294901760, %v9832_v0 }
 0xb56   :  { %v8915_v37 = vand.u32 4294901760, %v8914_v6  ;;  %15215 = vmatmul.mubr.f32.vlgmr.msra.gmra.mxu0 %v16061_v23  ;;  %15224 = vmatprep.subr.mxu0 %v16948_v50  ;;  %v9840_v22 = vand.u32 4294901760, %v9839_v17 }
 0xb57   :  { %15204 = vmatpush3.msra.mxu1 %v8908_v36  ;;  %15225 = vmatpush3.msra.mxu0 %v8906_v55  ;;  %v9834_v56 = vsub.f32 %v9832_v0, %v9833_v58 }
 0xb58   :  { %15205 = vmatprep.subr.mxu1 %v16948_v50  ;;  %15226 = vmatprep.subr.mxu0 %v16948_v50  ;;  %v9841_v62 = vsub.f32 %v9839_v17, %v9840_v22 }
 0xb59   :  { %15206 = vmatpush3.msra.mxu1 %v8915_v37  ;;  %15227 = vmatpush3.msra.mxu0 %v8913_v49 }
 0xb5a   :  { %15228 = vmatprep.mubr.msk.f32.mxu0 %vm15755_vm0, %v16948_v50  ;;  %15208 = vmatmul.mubr.f32.vlgmr.msra.gmra.mxu1 %v16058_v21  ;;  %v9842_v38 = vand.u32 4294901760, %v9841_v62 }
 0xb5b   :  { %15217 = vmatprep.subr.mxu1 %v16948_v50  ;;  %15229 = vmatmul.mubr.f32.vlgmr.msra.gmra.mxu0 %v16058_v21 }
 0xb5c   :  { %15238 = vmatprep.subr.mxu0 %v16948_v50  ;;  %15218 = vmatpush3.msra.mxu1 %v8827_v2 }
 0xb5d   :  { %15239 = vmatpush3.msra.mxu0 %v16533_v40  ;;  %15219 = vmatprep.subr.mxu1 %v16948_v50 }
 0xb5e   :  { %15240 = vmatprep.subr.mxu0 %v16948_v50  ;;  %15220 = vmatpush3.msra.mxu1 %v8830_v44 }
 0xb5f   :  { %15221 = vmatprep.mubr.msk.f32.mxu1 %vm15755_vm0, %v16948_v50  ;;  %15241 = vmatpush3.msra.mxu0 %v16537_v63 }
 0xb60   :  { %15242 = vmatprep.mubr.msk.f32.mxu0 %vm15755_vm0, %v16948_v50  ;;  %15222 = vmatmul.mubr.f32.vlgmr.msra.gmra.mxu1 %v16064_v27 }
 0xb61   :  { %15231 = vmatprep.subr.mxu1 %v16948_v50  ;;  %15243 = vmatmul.mubr.f32.vlgmr.msra.gmra.mxu0 %v16109_v30 }
 0xb62   :  { %15252 = vmatprep.subr.mxu0 %v16948_v50  ;;  %15232 = vmatpush3.msra.mxu1 %v8827_v2  ;;  %v9835_v2 = vand.u32 4294901760, %v9834_v56 }
 0xb63   :  { %15253 = vmatpush3.msra.mxu0 %v9366_v15  ;;  %15233 = vmatprep.subr.mxu1 %v16948_v50 }
 0xb64   :  { %15254 = vmatprep.subr.mxu0 %v16948_v50  ;;  %15234 = vmatpush3.msra.mxu1 %v8830_v44  ;;  %v16973_v44 = vld [vmem:[#allocation15_spill] sm:$0xff] }
 0xb65   :  { %15235 = vmatprep.mubr.msk.f32.mxu1 %vm15755_vm0, %v16948_v50  ;;  %15255 = vmatpush3.msra.mxu0 %v9373_v20 }
 0xb66   :  { %15256 = vmatprep.mubr.msk.f32.mxu0 %vm15755_vm0, %v16948_v50  ;;  %15236 = vmatmul.mubr.f32.vlgmr.msra.gmra.mxu1 %v16058_v21 }
 0xb67   :  { %15245 = vmatprep.subr.mxu1 %v16948_v50  ;;  %15257 = vmatmul.mubr.f32.vlgmr.msra.gmra.mxu0 %v16077_v54 }
 0xb68   :  { %15266 = vmatprep.subr.mxu0 %v16948_v50  ;;  %15246 = vmatpush3.msra.mxu1 %v9369_v59 }
 0xb69   :  { %15267 = vmatpush3.msra.mxu0 %v9367_v18  ;;  %15247 = vmatprep.subr.mxu1 %v16948_v50 }
 0xb6a   :  { %15268 = vmatprep.subr.mxu0 %v16948_v50  ;;  %15248 = vmatpush3.msra.mxu1 %v9376_v10 }
 0xb6b   :  { %15249 = vmatprep.mubr.msk.f32.mxu1 %vm15755_vm0, %v16948_v50  ;;  %15269 = vmatpush3.msra.mxu0 %v9374_v3 }
 0xb6c   :  { %15270 = vmatprep.mubr.msk.f32.mxu0 %vm15755_vm0, %v16948_v50  ;;  %15250 = vmatmul.mubr.f32.vlgmr.msra.gmra.mxu1 %v16956_v16 }
 0xb6d   :  { %15259 = vmatprep.subr.mxu1 %v16948_v50  ;;  %15271 = vmatmul.mubr.f32.vlgmr.msra.gmra.mxu0 %v16956_v16 }
 0xb6e   :  { %15280 = vmatprep.subr.mxu0 %v16948_v50  ;;  %15260 = vmatpush3.msra.mxu1 %v16533_v40 }
 0xb6f   :  { %15281 = vmatpush3.msra.mxu0 %v16569_v32  ;;  %15261 = vmatprep.subr.mxu1 %v16948_v50 }
 0xb70   :  { %15282 = vmatprep.subr.mxu0 %v16948_v50  ;;  %15262 = vmatpush3.msra.mxu1 %v16537_v63 }
 0xb71   :  { %15263 = vmatprep.mubr.msk.f32.mxu1 %vm15755_vm0, %v16948_v50  ;;  %15283 = vmatpush3.msra.mxu0 %v16573_v47 }
 0xb72   :  { %15284 = vmatprep.mubr.msk.f32.mxu0 %vm15755_vm0, %v16948_v50  ;;  %15264 = vmatmul.mubr.f32.vlgmr.msra.gmra.mxu1 %v16957_v34 }
 0xb73   :  { %15273 = vmatprep.subr.mxu1 %v16948_v50  ;;  %15285 = vmatmul.mubr.f32.vlgmr.msra.gmra.mxu0 %v16958_v48 }
 0xb74   :  { %15294 = vmatprep.subr.mxu0 %v16948_v50  ;;  %15274 = vmatpush3.msra.mxu1 %v16533_v40 }
 0xb75   :  { %15295 = vmatpush3.msra.mxu0 %v9832_v0  ;;  %15275 = vmatprep.subr.mxu1 %v16948_v50 }
 0xb76   :  { %15296 = vmatprep.subr.mxu0 %v16948_v50  ;;  %15276 = vmatpush3.msra.mxu1 %v16537_v63 }
 0xb77   :  { %15277 = vmatprep.mubr.msk.f32.mxu1 %vm15755_vm0, %v16948_v50  ;;  %15297 = vmatpush3.msra.mxu0 %v9839_v17 }
 0xb78   :  { %15298 = vmatprep.mubr.msk.f32.mxu0 %vm15755_vm0, %v16948_v50  ;;  %15278 = vmatmul.mubr.f32.vlgmr.msra.gmra.mxu1 %v16956_v16 }
 0xb79   :  { %15287 = vmatprep.subr.mxu1 %v16948_v50  ;;  %15299 = vmatmul.mubr.f32.vlgmr.msra.gmra.mxu0 %v16959_v28 }
 0xb7a   :  { %15308 = vmatprep.subr.mxu0 %v16948_v50  ;;  %15288 = vmatpush3.msra.mxu1 %v9835_v2 }
 0xb7b   :  { %15309 = vmatpush3.msra.mxu0 %v9833_v58  ;;  %15289 = vmatprep.subr.mxu1 %v16948_v50 }
 0xb7c   :  { %15310 = vmatprep.subr.mxu0 %v16948_v50  ;;  %15290 = vmatpush3.msra.mxu1 %v9842_v38 }
 0xb7d   :  { %15291 = vmatprep.mubr.msk.f32.mxu1 %vm15755_vm0, %v16948_v50  ;;  %15311 = vmatpush3.msra.mxu0 %v9840_v22 }
 0xb7e   :  { %15312 = vmatprep.mubr.msk.f32.mxu0 %vm15755_vm0, %v16948_v50  ;;  %15292 = vmatmul.mubr.f32.vlgmr.msra.gmra.mxu1 %v16960_v43 }
 0xb7f   :  { %15301 = vmatprep.subr.mxu1 %v16948_v50  ;;  %15313 = vmatmul.mubr.f32.vlgmr.msra.gmra.mxu0 %v16960_v43 }
 0xb80   :  { %15302 = vmatpush3.msra.mxu1 %v16569_v32  ;;  %15305 = vmatprep.mubr.msk.f32.mxu1 %vm15755_vm0, %v16948_v50 }
 0xb81   :  { %15303 = vmatprep.subr.mxu1 %v16948_v50  ;;  %15322 = vmatprep.subr.mxu0 %v16948_v50 }
 0xb82   :  { %15304 = vmatpush3.msra.mxu1 %v16573_v47  ;;  %15323 = vmatpush3.msra.mxu0 %v15837_v4 }
 0xb83   :  { %15306 = vmatmul.mubr.f32.vlgmr.msra.gmra.mxu1 %v16961_v57  ;;  %15315 = vmatprep.subr.mxu1 %v16948_v50 }
 0xb84   :  { %15316 = vmatpush3.msra.mxu1 %v16569_v32  ;;  %15319 = vmatprep.mubr.msk.f32.mxu1 %vm15755_vm0, %v16948_v50 }
 0xb85   :  { %15317 = vmatprep.subr.mxu1 %v16948_v50  ;;  %15324 = vmatprep.subr.mxu0 %v16948_v50 }
 0xb86   :  { %15318 = vmatpush3.msra.mxu1 %v16573_v47  ;;  %15325 = vmatpush3.msra.mxu0 %v15839_v5 }
 0xb87   :  { %15320 = vmatmul.mubr.f32.vlgmr.msra.gmra.mxu1 %v16960_v43  ;;  %15329 = vmatprep.subr.mxu1 %v16948_v50 }
 0xb88   :  { %15330 = vmatpush3.msra.mxu1 %v16973_v44  ;;  %15333 = vmatprep.mubr.msk.f32.mxu1 %vm15755_vm0, %v16948_v50 }
 0xb89   :  { %15331 = vmatprep.subr.mxu1 %v16948_v50  ;;  %15326 = vmatprep.mubr.msk.f32.mxu0 %vm15755_vm0, %v16948_v50 }
 0xb8a   :  { %15332 = vmatpush3.msra.mxu1 %v16974_v39  ;;  %15336 = vmatprep.subr.mxu0 %v16948_v50 }
 0xb8b   :  { %15343 = vmatprep.subr.mxu1 %v16948_v50 }
 0xc12   :  { %v8871_v46 = vpop.f32.mrf.mxu0 }
 0xc14   :  { %v15202_v55 = vpop.f32.mrf.mxu0 }
 0xc16   :  { %v9028_v49 = vpop.f32.mrf.mxu0 }
 0xc18   :  { %v15216_v7 = vpop.f32.mrf.mxu0 }
 0xc1a   :  { %v8952_v19 = vpop.f32.mrf.mxu1 }
 0xc1b   :  { %v9180_v6 = vpop.f32.mrf.mxu0  ;;  %v8953_v40 = vadd.f32 %v8952_v19, %v8871_v46 }
 0xc1c   :  { %v15209_v36 = vpop.f32.mrf.mxu1 }
 0xc1d   :  { %v15230_v37 = vpop.f32.mrf.mxu0  ;;  %v9029_v3 = vadd.f32 %v9028_v49, %v8953_v40 }
 0xc20   :  { %v9103_v63 = vpop.f32.mrf.mxu1 }
 0xc21   :  { %v9332_v15 = vpop.f32.mrf.mxu0  ;;  %v9104_v31 = vadd.f32 %v9103_v63, %v9029_v3 }
 0xc22   :  { %v15223_v20 = vpop.f32.mrf.mxu1 }
 0xc23   :  { %v15244_v18 = vpop.f32.mrf.mxu0  ;;  %v9181_v42 = vadd.f32 %v9180_v6, %v9104_v31 }
 0xc26   :  { %v9253_v13 = vpop.f32.mrf.mxu1 }
 0xc27   :  { %v9489_v29 = vpop.f32.mrf.mxu0  ;;  %v9254_v17 = vadd.f32 %v9253_v13, %v9181_v42 }
 0xc28   :  { %v15237_v60 = vpop.f32.mrf.mxu1 }
 0xc29   :  { %v15258_v59 = vpop.f32.mrf.mxu0  ;;  %v9333_v56 = vadd.f32 %v9332_v15, %v9254_v17 }
 0xc2c   :  { %v9413_v32 = vpop.f32.mrf.mxu1 }
 0xc2d   :  { %v9641_v10 = vpop.f32.mrf.mxu0  ;;  %v9414_v38 = vadd.f32 %v9413_v32, %v9333_v56 }
 0xc2e   :  { %v15251_v47 = vpop.f32.mrf.mxu1 }
 0xc2f   :  { %v15272_v0 = vpop.f32.mrf.mxu0  ;;  %v9490_v49 = vadd.f32 %v9489_v29, %v9414_v38 }
 0xc32   :  { %v9564_v58 = vpop.f32.mrf.mxu1 }
 0xc33   :  { %v9798_v22 = vpop.f32.mrf.mxu0  ;;  %v9565_v6 = vadd.f32 %v9564_v58, %v9490_v49 }
 0xc34   :  { %v15265_v62 = vpop.f32.mrf.mxu1 }
 0xc35   :  { %v15286_v2 = vpop.f32.mrf.mxu0  ;;  %v9642_v18 = vadd.f32 %v9641_v10, %v9565_v6 }
 0xc38   :  { %v9714_v44 = vpop.f32.mrf.mxu1 }
 0xc39   :  { %v9955_v39 = vpop.f32.mrf.mxu0  ;;  %v9715_v60 = vadd.f32 %v9714_v44, %v9642_v18 }
 0xc3a   :  { %v15279_v46 = vpop.f32.mrf.mxu1 }
 0xc3b   :  { %v15300_v55 = vpop.f32.mrf.mxu0 }
 0xc3e   :  { %v9879_v7 = vpop.f32.mrf.mxu1 }
 0xc3f   :  { %v9880_v19 = vadd.f32 %v9879_v7, %v9798_v22  ;;  %v10107_v36 = vpop.f32.mrf.mxu0 }
 0xc40   :  { %v15293_v37 = vpop.f32.mrf.mxu1 }
 0xc41   :  { %v15314_v40 = vpop.f32.mrf.mxu0  ;;  %v9956_v63 = vadd.f32 %v9955_v39, %v9880_v19 }
 0xc43   :  { %v10030_v20 = vpop.f32.mrf.mxu1 }
 0xc44   :  { %v10031_v3 = vadd.f32 %v10030_v20, %v9956_v63 }
 0xc45   :  { %v15307_v13 = vpop.f32.mrf.mxu1 }
 0xc46   :  { %v10108_v15 = vadd.f32 %v10107_v36, %v10031_v3 }
 0xc47   :  { %v10180_v31 = vpop.f32.mrf.mxu1 }
 0xc48   :  { %v10181_v59 = vadd.f32 %v10180_v31, %v10108_v15 }
 0xc49   :  { %v15321_v42 = vpop.f32.mrf.mxu1 }
 0xc4a   :  { %v10184_v32 = vadd.f32 %v10181_v59, %v9715_v60 }
 0xc4c   :  { %v10185_v47 = vadd.f32 %v10184_v32, %v16222_v41 }
 0xc4e   :  { %v10186_v29 = vmax.f32 %v10185_v47, 0.0 }
 0xc50   :  { %10188 = vrot.lane.b32.xlu0 %v10186_v29, %s15758_s22 }
 0xcc2   :  { %v10189_v0 = vpop.permute.xlu0 %10188 }
 0xcc3   :  { %v10191_v17 = vadd.f32 %v10189_v0, %v10186_v29  ;;  %v16975_v29 = vld [vmem:[#allocation27_spill] sm:$0xff] }
 0xcc5   :  { %v10192_v58 = vmul.f32 0.5, %v10191_v17  ;;  %v16976_v17 = vld [vmem:[#allocation19_spill] sm:$0xff] }
 0xcc7   :  { %v10194_v22 = vsel %vm91_vm1, %v10192_v58, 0  ;;  %v16979_v58 = vld [vmem:[#allocation18_spill] sm:$0xff] }
 0xcc8   :  { %v10263_v56 = vand.u32 4294901760, %v10194_v22 }
 0xcca   :  { %v10264_v10 = vsub.f32 %v10194_v22, %v10263_v56  ;;  %15334 = vmatmul.mubr.f32.vlgmr.msra.gmra.mxu1 %v10263_v56  ;;  %v16981_v22 = vld [vmem:[#allocation21_spill] sm:$0xff] }
 0xccb   :  { %15344 = vmatpush3.msra.mxu1 %v15837_v4  ;;  %15347 = vmatprep.mubr.msk.f32.mxu1 %vm15755_vm0, %v16948_v50 }
 0xccc   :  { %v10265_v62 = vand.u32 4294901760, %v10264_v10  ;;  %15345 = vmatprep.subr.mxu1 %v16948_v50 }
 0xccd   :  { %15346 = vmatpush3.msra.mxu1 %v15839_v5 }
 0xcce   :  { %v10266_v2 = vsub.f32 %v10264_v10, %v10265_v62  ;;  %15348 = vmatmul.mubr.f32.vlgmr.msra.gmra.mxu1 %v10265_v62  ;;  %15357 = vmatprep.subr.mxu1 %v16948_v50 }
 0xccf   :  { %15358 = vmatpush3.msra.mxu1 %v15837_v4  ;;  %15361 = vmatprep.mubr.msk.f32.mxu1 %vm15755_vm0, %v16948_v50 }
 0xcd0   :  { %v10267_v38 = vand.u32 4294901760, %v10266_v2  ;;  %15359 = vmatprep.subr.mxu1 %v16948_v50  ;;  %v16984_v2 = vld [vmem:[#allocation25_spill] sm:$0xff] }
 0xcd1   :  { %15360 = vmatpush3.msra.mxu1 %v15839_v5 }
 0xcd2   :  { %15327 = vmatmul.mubr.f32.vlgmr.msra.gmra.mxu0 %v10267_v38  ;;  %15362 = vmatmul.mubr.f32.vlgmr.msra.gmra.mxu1 %v10263_v56  ;;  %v16985_v38 = vld [vmem:[#allocation26_spill] sm:$0xff] }
 0xcd3   :  { %15337 = vmatpush3.msra.mxu0 %v15844_v8  ;;  %15371 = vmatprep.mubr.f32.mxu1 %v15894_v24 }
 0xcd4   :  { %15338 = vmatprep.subr.mxu0 %v16948_v50  ;;  %15340 = vmatprep.mubr.msk.f32.mxu0 %vm15755_vm0, %v16948_v50 }
 0xcd5   :  { %15339 = vmatpush3.msra.mxu0 %v15847_v9 }
 0xcd6   :  { %15341 = vmatmul.mubr.f32.vlgmr.msra.gmra.mxu0 %v10264_v10  ;;  %15350 = vmatprep.subr.mxu0 %v16948_v50  ;;  %v16983_v10 = vld [vmem:[#allocation31_spill] sm:$0xff] }
 0xcd7   :  { %15351 = vmatpush3.msra.mxu0 %v15852_v11  ;;  %15354 = vmatprep.mubr.msk.f32.mxu0 %vm15755_vm0, %v16948_v50 }
 0xcd8   :  { %15352 = vmatprep.subr.mxu0 %v16948_v50 }
 0xcd9   :  { %15353 = vmatpush3.msra.mxu0 %v15855_v12 }
 0xcda   :  { %15355 = vmatmul.mubr.f32.vlgmr.msra.gmra.mxu0 %v10263_v56  ;;  %v16982_v56 = vld [vmem:[#allocation22_spill] sm:$0xff] }
 0xcdb   :  { %15366 = vmatprep.mubr.f32.mxu0 %v15905_v33 }
 0xd8a   :  { %v10350_v4 = vpop.f32.mrf.mxu1 }
 0xd8c   :  { %v15335_v5 = vpop.f32.mrf.mxu1 }
 0xd8d   :  { %v16987_v5 = vld [vmem:[#allocation24_spill] sm:$0xff] }
 0xd8e   :  { %v10501_v8 = vpop.f32.mrf.mxu1 }
 0xd90   :  { %v15349_v44 = vpop.f32.mrf.mxu1 }
 0xd91   :  { %v16989_v44 = vld [vmem:[#allocation29_spill] sm:$0xff] }
 0xd92   :  { %v10269_v9 = vpop.f32.mrf.mxu0  ;;  %v10651_v39 = vpop.f32.mrf.mxu1 }
 0xd93   :  { %v10351_v49 = vadd.f32 %v10350_v4, %v10269_v9  ;;  %v16986_v4 = vld [vmem:[#allocation23_spill] sm:$0xff] }
 0xd94   :  { %v15328_v46 = vpop.f32.mrf.mxu0  ;;  %v15363_v55 = vpop.f32.mrf.mxu1 }
 0xd96   :  { %v10426_v11 = vpop.f32.mrf.mxu0 }
 0xd97   :  { %v10427_v7 = vadd.f32 %v10426_v11, %v10351_v49 }
 0xd98   :  { %v15342_v19 = vpop.f32.mrf.mxu0 }
 0xd99   :  { %v10502_v36 = vadd.f32 %v10501_v8, %v10427_v7  ;;  %v16988_v8 = vld [vmem:[#allocation28_spill] sm:$0xff] }
 0xd9a   :  { %v10578_v6 = vpop.f32.mrf.mxu0 }
 0xd9b   :  { %v10579_v37 = vadd.f32 %v10578_v6, %v10502_v36 }
 0xd9c   :  { %v15356_v40 = vpop.f32.mrf.mxu0 }
 0xd9d   :  { %v10652_v12 = vadd.f32 %v10651_v39, %v10579_v37 }
 0xd9f   :  { %11640 = vrot.lane.b32.xlu0 %v10652_v12, %s15759_s23  ;;  %10656 = vrot.lane.b32.xlu1 %v10652_v12, %s15758_s22  ;;  %v11149_v33 = vsel %vm568_vm3, %v10652_v12, 0 }
 0xda0   :  { %v16679_v3 = vand.u32 4294901760, %v11149_v33 }
 0xda2   :  { %v11269_v31 = vsub.f32 %v11149_v33, %v16679_v3 }
 0xda4   :  { %v11270_v32 = vand.u32 4294901760, %v11269_v31 }
 0xe11   :  { %v10657_v63 = vpop.permute.xlu1 %10656  ;;  %v11641_v59 = vpop.permute.xlu0 %11640 }
 0xe12   :  { %v10658_v20 = vsel %vm568_vm3, %v10657_v63, 0  ;;  %v11642_v47 = vsel %vm568_vm3, %v11641_v59, 0 }
 0xe13   :  { %v10691_v18 = vand.u32 4294901760, %v10658_v20 }
 0xe15   :  { %v10778_v13 = vsub.f32 %v10658_v20, %v10691_v18  ;;  %15364 = vmatprep.subr.mxu0 %v10691_v18 }
 0xe16   :  { %15365 = vmatpush3.msra.mxu0 %v10691_v18 }
 0xe17   :  { %15367 = vmatmul.mubr.f32.vlgmr.msra.gmra.mxu0 %v15933_v1  ;;  %15374 = vmatprep.subr.mxu0 %v10778_v13  ;;  %v10779_v15 = vand.u32 4294901760, %v10778_v13  ;;  %v11271_v1 = vsub.f32 %v11269_v31, %v11270_v32 }
 0xe18   :  { %15375 = vmatpush3.msra.mxu0 %v10778_v13  ;;  %15376 = vmatprep.mubr.f32.mxu0 %v15897_v25  ;;  %v11675_v25 = vand.u32 4294901760, %v11642_v47 }
 0xe19   :  { %15384 = vmatprep.subr.mxu0 %v10779_v15  ;;  %v10780_v60 = vsub.f32 %v10778_v13, %v10779_v15  ;;  %v11272_v0 = vand.u32 4294901760, %v11271_v1 }
 0xe1b   :  { %15377 = vmatmul.mubr.f32.vlgmr.msra.gmra.mxu0 %v15915_v52  ;;  %v10781_v42 = vand.u32 4294901760, %v10780_v60  ;;  %v11762_v52 = vsub.f32 %v11642_v47, %v11675_v25 }
 0xe1c   :  { %15385 = vmatpush3.msra.mxu0 %v10779_v15  ;;  %15386 = vmatprep.mubr.f32.mxu0 %v15894_v24 }
 0xe1d   :  { %15394 = vmatprep.subr.mxu0 %v16679_v3  ;;  %15369 = vmatprep.subr.mxu1 %v10781_v42 }
 0xe1e   :  { %15370 = vmatpush3.msra.mxu1 %v10781_v42 }
 0xe1f   :  { %15372 = vmatmul.mubr.f32.vlgmr.msra.gmra.mxu1 %v15912_v51  ;;  %15379 = vmatprep.subr.mxu1 %v10691_v18 }
 0xe20   :  { %15387 = vmatmul.mubr.f32.vlgmr.msra.gmra.mxu0 %v15912_v51  ;;  %15380 = vmatpush3.msra.mxu1 %v10691_v18 }
 0xe21   :  { %15395 = vmatpush3.msra.mxu0 %v16679_v3  ;;  %15381 = vmatprep.mubr.f32.mxu1 %v15901_v26  ;;  %v16977_v26 = vld [vmem:[#allocation20_spill] sm:$0xff] }
 0xe22   :  { %15404 = vmatprep.subr.mxu0 %v11269_v31  ;;  %15389 = vmatprep.subr.mxu1 %v10691_v18 }
 0xe23   :  { %15396 = vmatprep.mubr.f32.mxu0 %v15967_v35  ;;  %15382 = vmatmul.mubr.f32.vlgmr.msra.gmra.mxu1 %v15918_v53  ;;  %v11763_v35 = vand.u32 4294901760, %v11762_v52  ;;  %v16978_v53 = vld [vmem:[#allocation17_spill] sm:$0xff] }
 0xe24   :  { %15390 = vmatpush3.msra.mxu1 %v10691_v18  ;;  %15397 = vmatmul.mubr.f32.vlgmr.msra.gmra.mxu0 %v16975_v29 }
 0xe25   :  { %15405 = vmatpush3.msra.mxu0 %v11269_v31  ;;  %15391 = vmatprep.mubr.f32.mxu1 %v15894_v24  ;;  %v11764_v24 = vsub.f32 %v11762_v52, %v11763_v35 }
 0xe26   :  { %15399 = vmatprep.subr.mxu1 %v11272_v0  ;;  %15414 = vmatprep.subr.mxu0 %v11270_v32 }
 0xe27   :  { %15406 = vmatprep.mubr.f32.mxu0 %v16976_v17  ;;  %15392 = vmatmul.mubr.f32.vlgmr.msra.gmra.mxu1 %v15912_v51  ;;  %v16980_v51 = vld [vmem:[#allocation30_spill] sm:$0xff]  ;;  %v11765_v62 = vand.u32 4294901760, %v11764_v24 }
 0xe28   :  { %15400 = vmatpush3.msra.mxu1 %v11272_v0  ;;  %15407 = vmatmul.mubr.f32.vlgmr.msra.gmra.mxu0 %v16977_v26 }
 0xe29   :  { %15415 = vmatpush3.msra.mxu0 %v11270_v32  ;;  %15409 = vmatprep.subr.mxu1 %v16679_v3 }
 0xe2a   :  { %15424 = vmatprep.subr.mxu0 %v11675_v25  ;;  %15401 = vmatprep.mubr.f32.mxu1 %v16978_v53 }
 0xe2b   :  { %15416 = vmatprep.mubr.f32.mxu0 %v16978_v53  ;;  %15402 = vmatmul.mubr.f32.vlgmr.msra.gmra.mxu1 %v16979_v58 }
 0xe2c   :  { %15410 = vmatpush3.msra.mxu1 %v16679_v3  ;;  %15417 = vmatmul.mubr.f32.vlgmr.msra.gmra.mxu0 %v16979_v58 }
 0xe2d   :  { %15425 = vmatpush3.msra.mxu0 %v11675_v25  ;;  %15419 = vmatprep.subr.mxu1 %v16679_v3 }
 0xe2e   :  { %15426 = vmatprep.mubr.f32.mxu0 %v16980_v51  ;;  %15434 = vmatprep.subr.mxu0 %v11762_v52 }
 0xe2f   :  { %15411 = vmatprep.mubr.f32.mxu1 %v16981_v22 }
 0xe30   :  { %15412 = vmatmul.mubr.f32.vlgmr.msra.gmra.mxu1 %v16982_v56  ;;  %15427 = vmatmul.mubr.f32.vlgmr.msra.gmra.mxu0 %v16983_v10 }
 0xe31   :  { %15420 = vmatpush3.msra.mxu1 %v16679_v3  ;;  %15435 = vmatpush3.msra.mxu0 %v11762_v52 }
 0xe32   :  { %15429 = vmatprep.subr.mxu1 %v11765_v62  ;;  %15436 = vmatprep.mubr.f32.mxu0 %v16984_v2 }
 0xe33   :  { %15444 = vmatprep.subr.mxu0 %v11763_v35  ;;  %15421 = vmatprep.mubr.f32.mxu1 %v16978_v53 }
 0xe34   :  { %15422 = vmatmul.mubr.f32.vlgmr.msra.gmra.mxu1 %v16979_v58  ;;  %15437 = vmatmul.mubr.f32.vlgmr.msra.gmra.mxu0 %v16985_v38 }
 0xe35   :  { %15430 = vmatpush3.msra.mxu1 %v11765_v62  ;;  %15445 = vmatpush3.msra.mxu0 %v11763_v35 }
 0xe36   :  { %15431 = vmatprep.mubr.f32.mxu1 %v16986_v4  ;;  %15439 = vmatprep.subr.mxu1 %v11675_v25 }
 0xe37   :  { %15446 = vmatprep.mubr.f32.mxu0 %v16986_v4  ;;  %15454 = vmatprep.subr.mxu0 %v16948_v50 }
 0xe38   :  { %15432 = vmatmul.mubr.f32.vlgmr.msra.gmra.mxu1 %v16987_v5  ;;  %15447 = vmatmul.mubr.f32.vlgmr.msra.gmra.mxu0 %v16987_v5 }
 0xe39   :  { %15440 = vmatpush3.msra.mxu1 %v11675_v25  ;;  %15441 = vmatprep.mubr.f32.mxu1 %v16988_v8 }
 0xe3a   :  { %15449 = vmatprep.subr.mxu1 %v11675_v25  ;;  %15458 = vmatprep.mubr.msk.f32.mxu0 %vm15755_vm0, %v16948_v50 }
 0xe3c   :  { %15442 = vmatmul.mubr.f32.vlgmr.msra.gmra.mxu1 %v16989_v44 }
 0xe3d   :  { %15450 = vmatpush3.msra.mxu1 %v11675_v25  ;;  %15451 = vmatprep.mubr.f32.mxu1 %v16986_v4 }
 0xe3e   :  { %15461 = vmatprep.subr.mxu1 %v16948_v50 }
 0xe40   :  { %15452 = vmatmul.mubr.f32.vlgmr.msra.gmra.mxu1 %v16987_v5 }
 0xe41   :  { %15465 = vmatprep.mubr.msk.f32.mxu1 %vm15755_vm0, %v16948_v50 }
 0xed7   :  { %v15368_v9 = vpop.f32.mrf.mxu0 }
 0xed9   :  { %v10732_v39 = vpop.f32.mrf.mxu0 }
 0xedb   :  { %v15378_v46 = vpop.f32.mrf.mxu0 }
 0xedd   :  { %v10898_v55 = vpop.f32.mrf.mxu0 }
 0xedf   :  { %v15373_v49 = vpop.f32.mrf.mxu1 }
 0xee0   :  { %v10825_v11 = vadd.f32 %v15373_v49, %v15368_v9  ;;  %v15388_v7 = vpop.f32.mrf.mxu0 }
 0xee1   :  { %v10818_v19 = vpop.f32.mrf.mxu1 }
 0xee2   :  { %v10819_v36 = vadd.f32 %v10818_v19, %v10732_v39  ;;  %v11061_v6 = vpop.f32.mrf.mxu0  ;;  %v10906_v37 = vadd.f32 %v15378_v46, %v10825_v11 }
 0xee3   :  { %v15383_v40 = vpop.f32.mrf.mxu1 }
 0xee4   :  { %v10988_v12 = vadd.f32 %v15383_v40, %v10906_v37  ;;  %v15398_v33 = vpop.f32.mrf.mxu0  ;;  %v10899_v63 = vadd.f32 %v10898_v55, %v10819_v36 }
 0xee5   :  { %v10979_v20 = vpop.f32.mrf.mxu1 }
 0xee6   :  { %v10980_v18 = vadd.f32 %v10979_v20, %v10899_v63  ;;  %v11223_v3 = vpop.f32.mrf.mxu0  ;;  %v11068_v13 = vadd.f32 %v15388_v7, %v10988_v12 }
 0xee7   :  { %v15393_v15 = vpop.f32.mrf.mxu1 }
 0xee8   :  { %v15408_v31 = vpop.f32.mrf.mxu0  ;;  %v11062_v60 = vadd.f32 %v11061_v6, %v10980_v18  ;;  %v11146_v59 = vadd.f32 %v15393_v15, %v11068_v13 }
 0xee9   :  { %v11139_v42 = vpop.f32.mrf.mxu1 }
 0xeea   :  { %v11389_v32 = vpop.f32.mrf.mxu0  ;;  %v11140_v47 = vadd.f32 %v11139_v42, %v11062_v60  ;;  %v11234_v52 = vadd.f32 %v15398_v33, %v11146_v59 }
 0xeeb   :  { %v15403_v25 = vpop.f32.mrf.mxu1 }
 0xeec   :  { %v15418_v1 = vpop.f32.mrf.mxu0  ;;  %v11224_v17 = vadd.f32 %v11223_v3, %v11140_v47  ;;  %v11316_v53 = vadd.f32 %v15403_v25, %v11234_v52 }
 0xeed   :  { %v11309_v29 = vpop.f32.mrf.mxu1 }
 0xeee   :  { %v11552_v0 = vpop.f32.mrf.mxu0  ;;  %v11310_v51 = vadd.f32 %v11309_v29, %v11224_v17  ;;  %v11397_v10 = vadd.f32 %v15408_v31, %v11316_v53 }
 0xef0   :  { %v15413_v26 = vpop.f32.mrf.mxu1  ;;  %v15428_v35 = vpop.f32.mrf.mxu0  ;;  %v11390_v2 = vadd.f32 %v11389_v32, %v11310_v51 }
 0xef1   :  { %v11479_v5 = vadd.f32 %v15413_v26, %v11397_v10 }
 0xef2   :  { %v11470_v58 = vpop.f32.mrf.mxu1  ;;  %v11716_v24 = vpop.f32.mrf.mxu0 }
 0xef3   :  { %v11471_v9 = vadd.f32 %v11470_v58, %v11390_v2  ;;  %v11559_v11 = vadd.f32 %v15418_v1, %v11479_v5 }
 0xef4   :  { %v15423_v22 = vpop.f32.mrf.mxu1  ;;  %v15438_v56 = vpop.f32.mrf.mxu0 }
 0xef5   :  { %v11553_v6 = vadd.f32 %v11552_v0, %v11471_v9  ;;  %v11637_v63 = vadd.f32 %v15423_v22, %v11559_v11 }
 0xef6   :  { %v11630_v62 = vpop.f32.mrf.mxu1  ;;  %v11882_v38 = vpop.f32.mrf.mxu0 }
 0xef7   :  { %v11631_v13 = vadd.f32 %v11630_v62, %v11553_v6 }
 0xef8   :  { %v15433_v4 = vpop.f32.mrf.mxu1  ;;  %v15448_v55 = vpop.f32.mrf.mxu0 }
 0xef9   :  { %v11809_v8 = vadd.f32 %v15433_v4, %v15428_v35 }
 0xefa   :  { %v11802_v44 = vpop.f32.mrf.mxu1  ;;  %v12045_v12 = vpop.f32.mrf.mxu0 }
 0xefb   :  { %v11803_v39 = vadd.f32 %v11802_v44, %v11716_v24  ;;  %v11890_v46 = vadd.f32 %v15438_v56, %v11809_v8 }
 0xefc   :  { %v15443_v49 = vpop.f32.mrf.mxu1 }
 0xefd   :  { %v11972_v7 = vadd.f32 %v15443_v49, %v11890_v46  ;;  %v11883_v19 = vadd.f32 %v11882_v38, %v11803_v39 }
 0xefe   :  { %v11963_v36 = vpop.f32.mrf.mxu1 }
 0xeff   :  { %v11964_v37 = vadd.f32 %v11963_v36, %v11883_v19  ;;  %v12052_v40 = vadd.f32 %v15448_v55, %v11972_v7 }
 0xf00   :  { %v15453_v33 = vpop.f32.mrf.mxu1 }
 0xf01   :  { %v12130_v20 = vadd.f32 %v15453_v33, %v12052_v40  ;;  %v12046_v18 = vadd.f32 %v12045_v12, %v11964_v37 }
 0xf02   :  { %v12123_v3 = vpop.f32.mrf.mxu1 }
 0xf03   :  { %v12134_v15 = vadd.f32 %v12130_v20, %v11637_v63  ;;  %v12124_v31 = vadd.f32 %v12123_v3, %v12046_v18 }
 0xf05   :  { %v12133_v60 = vadd.f32 %v12124_v31, %v11631_v13  ;;  %v12136_v59 = vadd.f32 %v12134_v15, %v16043_v61 }
 0xf07   :  { %v12135_v42 = vadd.f32 %v12133_v60, %v16045_v14  ;;  %v12138_v32 = vmax.f32 %v12136_v59, 0.0 }
 0xf09   :  { %v12137_v47 = vmax.f32 %v12135_v42, 0.0  ;;  %12143 = vrot.lane.b32.xlu1 %v12138_v32, %s15758_s22  ;;  %v12607_v53 = vsel %vm568_vm3, %v12138_v32, 0 }
 0xf0b   :  { %12141 = vrot.lane.b32.xlu0 %v12137_v47, %s15758_s22  ;;  %v16749_v22 = vand.u32 4294901760, %v12137_v47 }
 0xf0d   :  { %13070 = vrot.lane.b32.xlu1 %v12138_v32, %s15759_s23  ;;  %v12723_v56 = vsub.f32 %v12137_v47, %v16749_v22 }
 0xf0f   :  { %13068 = vrot.lane.b32.xlu0 %v12137_v47, %s15759_s23  ;;  %v12724_v62 = vand.u32 4294901760, %v12723_v56 }
 0xf11   :  { %v12725_v4 = vsub.f32 %v12723_v56, %v12724_v62 }
 0xf13   :  { %v12726_v44 = vand.u32 4294901760, %v12725_v4 }
 0xf7b   :  { %v12144_v25 = vpop.permute.xlu1 %12143 }
 0xf7c   :  { %v12146_v1 = vsel %vm568_vm3, %v12144_v25, 0 }
 0xf7d   :  { %v12177_v52 = vand.u32 4294901760, %v12146_v1  ;;  %v12142_v29 = vpop.permute.xlu0 %12141 }
 0xf7e   :  { %v12180_v0 = vand.u32 4294901760, %v12142_v29 }
 0xf7f   :  { %v12255_v17 = vsub.f32 %v12146_v1, %v12177_v52  ;;  %15455 = vmatpush3.msra.mxu0 %v12177_v52  ;;  %v13071_v2 = vpop.permute.xlu1 %13070 }
 0xf80   :  { %v12262_v61 = vsub.f32 %v12142_v29, %v12180_v0  ;;  %15456 = vmatprep.subr.mxu0 %v16948_v50  ;;  %v13073_v5 = vsel %vm568_vm3, %v13071_v2, 0 }
 0xf81   :  { %v12256_v14 = vand.u32 4294901760, %v12255_v17  ;;  %15457 = vmatpush3.msra.mxu0 %v12180_v0  ;;  %v16781_v8 = vand.u32 4294901760, %v13073_v5 }
 0xf82   :  { %v12263_v26 = vand.u32 4294901760, %v12262_v61  ;;  %15459 = vmatmul.mubr.f32.vlgmr.msra.gmra.mxu0 %v16073_v45  ;;  %15468 = vmatprep.subr.mxu0 %v16948_v50  ;;  %v16745_v45 = vand.u32 4294901760, %v12607_v53 }
 0xf83   :  { %v12257_v35 = vsub.f32 %v12255_v17, %v12256_v14  ;;  %15469 = vmatpush3.msra.mxu0 %v12255_v17  ;;  %15472 = vmatprep.mubr.msk.f32.mxu0 %vm15755_vm0, %v16948_v50 }
 0xf84   :  { %v12264_v58 = vsub.f32 %v12262_v61, %v12263_v26  ;;  %15470 = vmatprep.subr.mxu0 %v16948_v50 }
 0xf85   :  { %v12258_v24 = vand.u32 4294901760, %v12257_v35  ;;  %15471 = vmatpush3.msra.mxu0 %v12262_v61 }
 0xf86   :  { %v12265_v51 = vand.u32 4294901760, %v12264_v58  ;;  %15473 = vmatmul.mubr.f32.vlgmr.msra.gmra.mxu0 %v16061_v23  ;;  %15482 = vmatprep.subr.mxu0 %v16948_v50  ;;  %v12716_v23 = vsub.f32 %v12607_v53, %v16745_v45  ;;  %v13544_v58 = vld [vmem:[#allocation8 + $0x8] sm:$0xff] }
 0xf87   :  { %15462 = vmatpush3.msra.mxu1 %v12258_v24  ;;  %15483 = vmatpush3.msra.mxu0 %v12256_v14  ;;  %v13577_v24 = vand.u32 4294901760, %v13544_v58 }
 0xf88   :  { %15463 = vmatprep.subr.mxu1 %v16948_v50  ;;  %15484 = vmatprep.subr.mxu0 %v16948_v50  ;;  %v12717_v10 = vand.u32 4294901760, %v12716_v23 }
 0xf89   :  { %15464 = vmatpush3.msra.mxu1 %v12265_v51  ;;  %15485 = vmatpush3.msra.mxu0 %v12263_v26 }
 0xf8a   :  { %15486 = vmatprep.mubr.msk.f32.mxu0 %vm15755_vm0, %v16948_v50  ;;  %15466 = vmatmul.mubr.f32.vlgmr.msra.gmra.mxu1 %v16058_v21  ;;  %v12718_v38 = vsub.f32 %v12716_v23, %v12717_v10 }
 0xf8b   :  { %15475 = vmatprep.subr.mxu1 %v16948_v50  ;;  %15487 = vmatmul.mubr.f32.vlgmr.msra.gmra.mxu0 %v16058_v21 }
 0xf8c   :  { %15496 = vmatprep.subr.mxu0 %v16948_v50  ;;  %15476 = vmatpush3.msra.mxu1 %v12177_v52 }
 0xf8d   :  { %15497 = vmatpush3.msra.mxu0 %v16745_v45  ;;  %15477 = vmatprep.subr.mxu1 %v16948_v50 }
 0xf8e   :  { %15498 = vmatprep.subr.mxu0 %v16948_v50  ;;  %15478 = vmatpush3.msra.mxu1 %v12180_v0 }
 0xf8f   :  { %15479 = vmatprep.mubr.msk.f32.mxu1 %vm15755_vm0, %v16948_v50  ;;  %15499 = vmatpush3.msra.mxu0 %v16749_v22 }
 0xf90   :  { %15500 = vmatprep.mubr.msk.f32.mxu0 %vm15755_vm0, %v16948_v50  ;;  %15480 = vmatmul.mubr.f32.vlgmr.msra.gmra.mxu1 %v16064_v27  ;;  %v12719_v27 = vand.u32 4294901760, %v12718_v38 }
 0xf91   :  { %15489 = vmatprep.subr.mxu1 %v16948_v50  ;;  %15501 = vmatmul.mubr.f32.vlgmr.msra.gmra.mxu0 %v16109_v30  ;;  %v13069_v30 = vpop.permute.xlu0 %13068 }
 0xf92   :  { %15510 = vmatprep.subr.mxu0 %v16948_v50  ;;  %15490 = vmatpush3.msra.mxu1 %v12177_v52  ;;  %v16785_v9 = vand.u32 4294901760, %v13069_v30 }
 0xf93   :  { %15511 = vmatpush3.msra.mxu0 %v12716_v23  ;;  %15491 = vmatprep.subr.mxu1 %v16948_v50 }
 0xf94   :  { %15512 = vmatprep.subr.mxu0 %v16948_v50  ;;  %15492 = vmatpush3.msra.mxu1 %v12180_v0 }
 0xf95   :  { %15493 = vmatprep.mubr.msk.f32.mxu1 %vm15755_vm0, %v16948_v50  ;;  %15513 = vmatpush3.msra.mxu0 %v12723_v56  ;;  %v13655_v56 = vsub.f32 %v13544_v58, %v13577_v24 }
 0xf96   :  { %15514 = vmatprep.mubr.msk.f32.mxu0 %vm15755_vm0, %v16948_v50  ;;  %15494 = vmatmul.mubr.f32.vlgmr.msra.gmra.mxu1 %v16058_v21  ;;  %v13182_v21 = vsub.f32 %v13073_v5, %v16781_v8 }
 0xf97   :  { %15503 = vmatprep.subr.mxu1 %v16948_v50  ;;  %15515 = vmatmul.mubr.f32.vlgmr.msra.gmra.mxu0 %v16077_v54  ;;  %v13189_v54 = vsub.f32 %v13069_v30, %v16785_v9  ;;  %v13656_v5 = vand.u32 4294901760, %v13655_v56 }
 0xf98   :  { %15524 = vmatprep.subr.mxu0 %v16948_v50  ;;  %15504 = vmatpush3.msra.mxu1 %v12719_v27  ;;  %v13183_v39 = vand.u32 4294901760, %v13182_v21 }
 0xf99   :  { %15525 = vmatpush3.msra.mxu0 %v12717_v10  ;;  %15505 = vmatprep.subr.mxu1 %v16948_v50  ;;  %v13190_v46 = vand.u32 4294901760, %v13189_v54 }
 0xf9a   :  { %15526 = vmatprep.subr.mxu0 %v16948_v50  ;;  %15506 = vmatpush3.msra.mxu1 %v12726_v44  ;;  %v13184_v55 = vsub.f32 %v13182_v21, %v13183_v39 }
 0xf9b   :  { %15507 = vmatprep.mubr.msk.f32.mxu1 %vm15755_vm0, %v16948_v50  ;;  %15527 = vmatpush3.msra.mxu0 %v12724_v62  ;;  %v13191_v49 = vsub.f32 %v13189_v54, %v13190_v46 }
 0xf9c   :  { %15528 = vmatprep.mubr.msk.f32.mxu0 %vm15755_vm0, %v16948_v50  ;;  %15508 = vmatmul.mubr.f32.vlgmr.msra.gmra.mxu1 %v16956_v16 }
 0xf9d   :  { %15517 = vmatprep.subr.mxu1 %v16948_v50  ;;  %15529 = vmatmul.mubr.f32.vlgmr.msra.gmra.mxu0 %v16956_v16 }
 0xf9e   :  { %15538 = vmatprep.subr.mxu0 %v16948_v50  ;;  %15518 = vmatpush3.msra.mxu1 %v16745_v45 }
 0xf9f   :  { %15539 = vmatpush3.msra.mxu0 %v16781_v8  ;;  %15519 = vmatprep.subr.mxu1 %v16948_v50 }
 0xfa0   :  { %15540 = vmatprep.subr.mxu0 %v16948_v50  ;;  %15520 = vmatpush3.msra.mxu1 %v16749_v22 }
 0xfa1   :  { %15521 = vmatprep.mubr.msk.f32.mxu1 %vm15755_vm0, %v16948_v50  ;;  %15541 = vmatpush3.msra.mxu0 %v16785_v9 }
 0xfa2   :  { %15542 = vmatprep.mubr.msk.f32.mxu0 %vm15755_vm0, %v16948_v50  ;;  %15522 = vmatmul.mubr.f32.vlgmr.msra.gmra.mxu1 %v16957_v34  ;;  %v13185_v34 = vand.u32 4294901760, %v13184_v55 }
 0xfa3   :  { %15531 = vmatprep.subr.mxu1 %v16948_v50  ;;  %15543 = vmatmul.mubr.f32.vlgmr.msra.gmra.mxu0 %v16958_v48  ;;  %v13192_v48 = vand.u32 4294901760, %v13191_v49 }
 0xfa4   :  { %15552 = vmatprep.subr.mxu0 %v16948_v50  ;;  %15532 = vmatpush3.msra.mxu1 %v16745_v45  ;;  %v13543_v45 = vld [vmem:[#allocation8] sm:$0xff] }
 0xfa5   :  { %15553 = vmatpush3.msra.mxu0 %v13182_v21  ;;  %15533 = vmatprep.subr.mxu1 %v16948_v50  ;;  %v13580_v10 = vand.u32 4294901760, %v13543_v45 }
 0xfa6   :  { %15554 = vmatprep.subr.mxu0 %v16948_v50  ;;  %15534 = vmatpush3.msra.mxu1 %v16749_v22 }
 0xfa7   :  { %15535 = vmatprep.mubr.msk.f32.mxu1 %vm15755_vm0, %v16948_v50  ;;  %15555 = vmatpush3.msra.mxu0 %v13189_v54  ;;  %v13662_v27 = vsub.f32 %v13543_v45, %v13580_v10 }
 0xfa8   :  { %15556 = vmatprep.mubr.msk.f32.mxu0 %vm15755_vm0, %v16948_v50  ;;  %15536 = vmatmul.mubr.f32.vlgmr.msra.gmra.mxu1 %v16956_v16 }
 0xfa9   :  { %15545 = vmatprep.subr.mxu1 %v16948_v50  ;;  %15557 = vmatmul.mubr.f32.vlgmr.msra.gmra.mxu0 %v16959_v28  ;;  %v13663_v44 = vand.u32 4294901760, %v13662_v27 }
 0xfaa   :  { %15566 = vmatprep.subr.mxu0 %v16948_v50  ;;  %15546 = vmatpush3.msra.mxu1 %v13185_v34 }
 0xfab   :  { %15567 = vmatpush3.msra.mxu0 %v13183_v39  ;;  %15547 = vmatprep.subr.mxu1 %v16948_v50 }
 0xfac   :  { %15568 = vmatprep.subr.mxu0 %v16948_v50  ;;  %15548 = vmatpush3.msra.mxu1 %v13192_v48 }
 0xfad   :  { %15549 = vmatprep.mubr.msk.f32.mxu1 %vm15755_vm0, %v16948_v50  ;;  %15569 = vmatpush3.msra.mxu0 %v13190_v46  ;;  %v13664_v46 = vsub.f32 %v13662_v27, %v13663_v44 }
 0xfae   :  { %15570 = vmatprep.mubr.msk.f32.mxu0 %vm15755_vm0, %v16948_v50  ;;  %15550 = vmatmul.mubr.f32.vlgmr.msra.gmra.mxu1 %v16960_v43 }
 0xfaf   :  { %15559 = vmatprep.subr.mxu1 %v16948_v50  ;;  %15571 = vmatmul.mubr.f32.vlgmr.msra.gmra.mxu0 %v16960_v43  ;;  %v13665_v34 = vand.u32 4294901760, %v13664_v46 }
 0xfb0   :  { %15560 = vmatpush3.msra.mxu1 %v16781_v8  ;;  %15563 = vmatprep.mubr.msk.f32.mxu1 %vm15755_vm0, %v16948_v50 }
 0xfb1   :  { %15561 = vmatprep.subr.mxu1 %v16948_v50  ;;  %15580 = vmatprep.subr.mxu0 %v16948_v50 }
 0xfb2   :  { %15562 = vmatpush3.msra.mxu1 %v16785_v9  ;;  %15584 = vmatprep.mubr.msk.f32.mxu0 %vm15755_vm0, %v16948_v50 }
 0xfb3   :  { %15564 = vmatmul.mubr.f32.vlgmr.msra.gmra.mxu1 %v16961_v57  ;;  %15573 = vmatprep.subr.mxu1 %v16948_v50 }
 0xfb4   :  { %15574 = vmatpush3.msra.mxu1 %v16781_v8  ;;  %15577 = vmatprep.mubr.msk.f32.mxu1 %vm15755_vm0, %v16948_v50  ;;  %v13657_v8 = vsub.f32 %v13655_v56, %v13656_v5 }
 0xfb5   :  { %15575 = vmatprep.subr.mxu1 %v16948_v50  ;;  %15581 = vmatpush3.msra.mxu0 %v13577_v24 }
 0xfb6   :  { %15576 = vmatpush3.msra.mxu1 %v16785_v9  ;;  %15582 = vmatprep.subr.mxu0 %v16948_v50  ;;  %v13658_v39 = vand.u32 4294901760, %v13657_v8 }
 0xfb7   :  { %15578 = vmatmul.mubr.f32.vlgmr.msra.gmra.mxu1 %v16960_v43  ;;  %15587 = vmatprep.subr.mxu1 %v16948_v50 }
 0xfb8   :  { %15591 = vmatprep.mubr.msk.f32.mxu1 %vm15755_vm0, %v16948_v50  ;;  %15583 = vmatpush3.msra.mxu0 %v13580_v10 }
 0xfb9   :  { %15594 = vmatprep.subr.mxu0 %v16948_v50  ;;  %15588 = vmatpush3.msra.mxu1 %v13658_v39 }
 0xfba   :  { %15589 = vmatprep.subr.mxu1 %v16948_v50 }
 0xfbb   :  { %15590 = vmatpush3.msra.mxu1 %v13665_v34 }
 0xfbc   :  { %15601 = vmatprep.subr.mxu1 %v16948_v50 }
0x1042   :  { %v12221_v16 = vpop.f32.mrf.mxu0 }
0x1044   :  { %v15460_v28 = vpop.f32.mrf.mxu0 }
0x1046   :  { %v12378_v57 = vpop.f32.mrf.mxu0 }
0x1048   :  { %v15474_v11 = vpop.f32.mrf.mxu0 }
0x104a   :  { %v12302_v7 = vpop.f32.mrf.mxu1 }
0x104b   :  { %v12530_v19 = vpop.f32.mrf.mxu0  ;;  %v12303_v37 = vadd.f32 %v12302_v7, %v12221_v16 }
0x104c   :  { %v15467_v36 = vpop.f32.mrf.mxu1 }
0x104d   :  { %v15488_v6 = vpop.f32.mrf.mxu0  ;;  %v12379_v20 = vadd.f32 %v12378_v57, %v12303_v37 }
0x1050   :  { %v12453_v40 = vpop.f32.mrf.mxu1 }
0x1051   :  { %v12682_v12 = vpop.f32.mrf.mxu0  ;;  %v12454_v3 = vadd.f32 %v12453_v40, %v12379_v20 }
0x1052   :  { %v15481_v33 = vpop.f32.mrf.mxu1 }
0x1053   :  { %v15502_v63 = vpop.f32.mrf.mxu0  ;;  %v12531_v31 = vadd.f32 %v12530_v19, %v12454_v3 }
0x1056   :  { %v12603_v43 = vpop.f32.mrf.mxu1 }
0x1057   :  { %v12839_v18 = vpop.f32.mrf.mxu0  ;;  %v12604_v47 = vadd.f32 %v12603_v43, %v12531_v31 }
0x1058   :  { %v15495_v13 = vpop.f32.mrf.mxu1 }
0x1059   :  { %v15516_v15 = vpop.f32.mrf.mxu0  ;;  %v12683_v52 = vadd.f32 %v12682_v12, %v12604_v47 }
0x105c   :  { %v12763_v60 = vpop.f32.mrf.mxu1 }
0x105d   :  { %v12991_v59 = vpop.f32.mrf.mxu0  ;;  %v12764_v17 = vadd.f32 %v12763_v60, %v12683_v52 }
0x105e   :  { %v15509_v42 = vpop.f32.mrf.mxu1 }
0x105f   :  { %v15530_v32 = vpop.f32.mrf.mxu0  ;;  %v12840_v53 = vadd.f32 %v12839_v18, %v12764_v17 }
0x1062   :  { %v12914_v25 = vpop.f32.mrf.mxu1 }
0x1063   :  { %v13148_v1 = vpop.f32.mrf.mxu0  ;;  %v12915_v62 = vadd.f32 %v12914_v25, %v12840_v53 }
0x1064   :  { %v15523_v29 = vpop.f32.mrf.mxu1 }
0x1065   :  { %v15544_v0 = vpop.f32.mrf.mxu0  ;;  %v12992_v9 = vadd.f32 %v12991_v59, %v12915_v62 }
0x1068   :  { %v13064_v61 = vpop.f32.mrf.mxu1 }
0x1069   :  { %v13305_v14 = vpop.f32.mrf.mxu0  ;;  %v13065_v48 = vadd.f32 %v13064_v61, %v12992_v9 }
0x106a   :  { %v15537_v26 = vpop.f32.mrf.mxu1 }
0x106b   :  { %v15558_v35 = vpop.f32.mrf.mxu0 }
0x106e   :  { %v13229_v51 = vpop.f32.mrf.mxu1 }
0x106f   :  { %v13230_v22 = vadd.f32 %v13229_v51, %v13148_v1  ;;  %v13457_v23 = vpop.f32.mrf.mxu0 }
0x1070   :  { %v15551_v2 = vpop.f32.mrf.mxu1 }
0x1071   :  { %v15572_v38 = vpop.f32.mrf.mxu0  ;;  %v13306_v4 = vadd.f32 %v13305_v14, %v13230_v22 }
0x1073   :  { %v13380_v30 = vpop.f32.mrf.mxu1 }
0x1074   :  { %v13381_v21 = vadd.f32 %v13380_v30, %v13306_v4 }
0x1075   :  { %v15565_v54 = vpop.f32.mrf.mxu1 }
0x1076   :  { %v13458_v55 = vadd.f32 %v13457_v23, %v13381_v21 }
0x1077   :  { %v13530_v49 = vpop.f32.mrf.mxu1 }
0x1078   :  { %v13531_v16 = vadd.f32 %v13530_v49, %v13458_v55 }
0x1079   :  { %v15579_v28 = vpop.f32.mrf.mxu1 }
0x107a   :  { %v13534_v57 = vadd.f32 %v13531_v16, %v13065_v48 }
0x107c   :  { %v13535_v11 = vadd.f32 %v13534_v57, %v16222_v41 }
0x107e   :  { %v13536_v7 = vmax.f32 %v13535_v11, 0.0 }
0x1080   :  { %13538 = vrot.lane.b32.xlu1 %v13536_v7, %s15758_s22 }
0x10f2   :  { %v13539_v19 = vpop.permute.xlu1 %13538 }
0x10f3   :  { %v13541_v36 = vadd.f32 %v13539_v19, %v13536_v7 }
0x10f5   :  { %v13542_v6 = vmul.f32 0.5, %v13541_v36 }
0x10f7   :  { %v13546_v37 = vsel %vm91_vm1, %v13542_v6, 0 }
0x10f8   :  { %v13615_v40 = vand.u32 4294901760, %v13546_v37 }
0x10fa   :  { %v13616_v12 = vsub.f32 %v13546_v37, %v13615_v40  ;;  %15592 = vmatmul.mubr.f32.vlgmr.msra.gmra.mxu1 %v13615_v40 }
0x10fb   :  { %15602 = vmatpush3.msra.mxu1 %v13577_v24  ;;  %15605 = vmatprep.mubr.msk.f32.mxu1 %vm15755_vm0, %v16948_v50 }
0x10fc   :  { %v13617_v33 = vand.u32 4294901760, %v13616_v12  ;;  %15603 = vmatprep.subr.mxu1 %v16948_v50 }
0x10fd   :  { %15604 = vmatpush3.msra.mxu1 %v13580_v10 }
0x10fe   :  { %v13618_v41 = vsub.f32 %v13616_v12, %v13617_v33  ;;  %15606 = vmatmul.mubr.f32.vlgmr.msra.gmra.mxu1 %v13617_v33  ;;  %15615 = vmatprep.subr.mxu1 %v16948_v50 }
0x10ff   :  { %15616 = vmatpush3.msra.mxu1 %v13577_v24  ;;  %15619 = vmatprep.mubr.msk.f32.mxu1 %vm15755_vm0, %v16948_v50 }
0x1100   :  { %v13619_v63 = vand.u32 4294901760, %v13618_v41  ;;  %15617 = vmatprep.subr.mxu1 %v16948_v50 }
0x1101   :  { %15618 = vmatpush3.msra.mxu1 %v13580_v10 }
0x1102   :  { %15585 = vmatmul.mubr.f32.vlgmr.msra.gmra.mxu0 %v13619_v63  ;;  %15620 = vmatmul.mubr.f32.vlgmr.msra.gmra.mxu1 %v13615_v40 }
0x1103   :  { %15595 = vmatpush3.msra.mxu0 %v13655_v56  ;;  %15598 = vmatprep.mubr.msk.f32.mxu0 %vm15755_vm0, %v16948_v50 }
0x1104   :  { %15596 = vmatprep.subr.mxu0 %v16948_v50 }
0x1105   :  { %15597 = vmatpush3.msra.mxu0 %v13662_v27 }
0x1106   :  { %15599 = vmatmul.mubr.f32.vlgmr.msra.gmra.mxu0 %v13616_v12  ;;  %15608 = vmatprep.subr.mxu0 %v16948_v50 }
0x1107   :  { %15609 = vmatpush3.msra.mxu0 %v13656_v5  ;;  %15612 = vmatprep.mubr.msk.f32.mxu0 %vm15755_vm0, %v16948_v50 }
0x1108   :  { %15610 = vmatprep.subr.mxu0 %v16948_v50 }
0x1109   :  { %15611 = vmatpush3.msra.mxu0 %v13663_v44 }
0x110a   :  { %15613 = vmatmul.mubr.f32.vlgmr.msra.gmra.mxu0 %v13615_v40 }
0x11ba   :  { %v13702_v20 = vpop.f32.mrf.mxu1 }
0x11bc   :  { %v15593_v43 = vpop.f32.mrf.mxu1 }
0x11be   :  { %v13853_v18 = vpop.f32.mrf.mxu1 }
0x11c0   :  { %v15607_v3 = vpop.f32.mrf.mxu1 }
0x11c2   :  { %v13621_v13 = vpop.f32.mrf.mxu0  ;;  %v14003_v15 = vpop.f32.mrf.mxu1 }
0x11c3   :  { %v13703_v59 = vadd.f32 %v13702_v20, %v13621_v13 }
0x11c4   :  { %v15586_v31 = vpop.f32.mrf.mxu0  ;;  %v15621_v60 = vpop.f32.mrf.mxu1 }
0x11c6   :  { %v13778_v42 = vpop.f32.mrf.mxu0 }
0x11c7   :  { %v13779_v32 = vadd.f32 %v13778_v42, %v13703_v59 }
0x11c8   :  { %v15600_v47 = vpop.f32.mrf.mxu0 }
0x11c9   :  { %v13854_v25 = vadd.f32 %v13853_v18, %v13779_v32 }
0x11ca   :  { %v13930_v1 = vpop.f32.mrf.mxu0 }
0x11cb   :  { %v13931_v52 = vadd.f32 %v13930_v1, %v13854_v25 }
0x11cc   :  { %v15614_v50 = vpop.f32.mrf.mxu0 }
0x11cd   :  { %v14004_v29 = vadd.f32 %v14003_v15, %v13931_v52 }
0x11cf   :  { %14008 = vst.msk [vmem:[#allocation10] sm:$0x3] %vm14007_vm5, %v14004_v29 }
0x11d0   :  { %15731 = shalt.err (!%p15728_p10)
}
0x11d1   :  { %14018 = dma.vmem_to_hbm [thread:$0]  %s14016_s29, 32, %s16883_s7, [#allocation4]  }
0x11d2   :  { %15746 = dma.done.wait [#allocation4], 32  }
0x11d3   :  { %15747 = vsyncadd [#allocation4], 4294967264 }
0x11d4   :  { %14022 = vsyncpa [#allocation3], 1 }
0x11d5   :  { %14023 = vsyncpa [#allocation6], 1 }
0x11d6   :  { %14024 = vsyncpa [#allocation9], 1 }
0x11d7   :  { %14025 = vsyncpa [#allocation4], 1 }

</bundles_post_ra>
